<compile_context>
chip_gen: v7x
topology: tpu7x:2x2x1
jax: 0.10.0
libtpu: 0.0.40
codegen_flags: <defaults>
</compile_context>

<pallas_src>
import functools

import jax
import jax.numpy as jnp
from jax.experimental import pallas as pl
from jax.experimental.pallas import tpu as pltpu

LANE = 128


def _round_up(x, m):
    return (x + m - 1) // m * m


@functools.lru_cache(maxsize=None)
def _vmem_limit():
    """Per-chip scoped-VMEM limit: ~3/4 of physical, capped at 96 MiB."""
    cap = None
    try:
        cap = getattr(pltpu.get_tpu_info(), "vmem_capacity_bytes", None)
    except Exception:
        cap = None
    if not cap:
        cap = 64 * 1024 * 1024          # conservative fallback (v7x physical)
    return int(min(cap * 3 // 4, 96 * 1024 * 1024))


def _pad_last(x, target):
    pad = target - x.shape[-1]
    if pad == 0:
        return x
    cfg = [(0, 0)] * (x.ndim - 1) + [(0, pad)]
    return jnp.pad(x, cfg)


def _choose_htile(Ho, Wo, max_rows=512):
    """Largest divisor of Ho whose row tile (th*Wo) stays <= max_rows."""
    best = None
    for th in range(1, Ho + 1):
        if Ho % th == 0 and th * Wo <= max_rows:
            best = th
    return best if best is not None else 1


def _choose_cout_tile(cout_p, T, cin_p, x_block_bytes, M, limit, scratch_bytes):
    """Largest cout tile (multiple of LANE dividing cout_p) fitting VMEM."""
    k = cout_p // LANE
    for d in range(k, 0, -1):
        if k % d:
            continue
        tcout = d * LANE
        w_b = T * cin_p * tcout * 2                 # bf16 weights (dbl-buffered)
        o_b = (M + 8) * tcout * 4                   # f32 out + stats rows
        est = 2 * (x_block_bytes + w_b + o_b) + scratch_bytes + (1 << 21)
        if est <= limit:
            return tcout
    return LANE


# ---------------------------------------------------------------------------
# Conv kernel: tap-accumulating GEMM, fused BN-stat epilogue, optional fused
# input prologue (BN-apply + ReLU + bf16 cast + in-VMEM zero padding).
# ---------------------------------------------------------------------------
def _make_conv_kernel(taps, Ho, Wo, cin_p, tcout, th, *, fuse_in,
                      Hin=0, Win=0, relu=False):
    rows = th * Wo
    n_ht = Ho // th if Ho % th == 0 else -(-Ho // th)
    assert Ho % th == 0

    def body(read_patch, w_ref, o_ref, stats_ref):
        s1 = jnp.zeros((1, tcout), jnp.float32)
        s2 = jnp.zeros((1, tcout), jnp.float32)
        for ht in range(n_ht):                       # static H row tiles
            hbase = ht * th
            acc = jnp.zeros((rows, tcout), jnp.float32)
            for t, (ph, h0, w0) in enumerate(taps):  # static unrolled taps
                patch = read_patch(ph, hbase + h0, w0)
                acc = acc + jnp.dot(patch.reshape(rows, cin_p), w_ref[t],
                                    preferred_element_type=jnp.float32)
            o_ref[hbase * Wo:hbase * Wo + rows, :] = acc
            # Fused BN statistics (VPU/XLU work hidden under the MXU matmuls).
            s1 = s1 + jnp.sum(acc, axis=0, keepdims=True)
            s2 = s2 + jnp.sum(acc * acc, axis=0, keepdims=True)
        row_id = jax.lax.broadcasted_iota(jnp.int32, (8, tcout), 0)
        stats_ref[...] = jnp.where(row_id == 0, s1,
                                   jnp.where(row_id == 1, s2, 0.0))[None]

    if not fuse_in:
        def kernel(x_ref, w_ref, o_ref, stats_ref):
            def read_patch(ph, h0, w0):
                return x_ref[0, h0:h0 + th, w0:w0 + Wo,
                             ph * cin_p:(ph + 1) * cin_p]
            body(read_patch, w_ref, o_ref, stats_ref)
        return kernel

    def kernel(x_ref, s_ref, b_ref, w_ref, o_ref, stats_ref, xpad_ref):
        # Fused prologue: BN-apply (+ReLU) + zero-pad, all inside VMEM.
        scale = s_ref[...][None]                     # (1, 1, cin_p)
        shift = b_ref[...][None]
        # TODO(synk): zero only the border instead of the whole scratch.
        xpad_ref[...] = jnp.zeros((Hin + 2, Win + 2, cin_p), jnp.float32)
        for hc in range(0, Hin, th):
            a = x_ref[0, hc:hc + th].astype(jnp.float32) * scale + shift
            if relu:
                a = jnp.maximum(a, 0.0)
            xpad_ref[1 + hc:1 + hc + th, 1:Win + 1, :] = a

        def read_patch(ph, h0, w0):
            return xpad_ref[h0:h0 + th, w0:w0 + Wo, :].astype(jnp.bfloat16)
        body(read_patch, w_ref, o_ref, stats_ref)
    return kernel


def conv2d_bn_stats(x, w_taps, taps, Ho, Wo, *, bn_scale=None, bn_shift=None,
                    bn_relu=False, ch_block=None):
    """Conv-as-tap-GEMM with fused per-channel (sum, sumsq) statistics.

    x      : [N, Hin, Win, pcin]  activation (bf16, or f32 when bn_scale given)
    w_taps : [T, cin_p, cout_p]   bf16 tap-major weights
    taps   : list of (phase_slab, h_off, w_off) static tap descriptors
    bn_scale/bn_shift/bn_relu : fuse `relu(x*s+b)` + zero-pad into the prologue
    ch_block : (n_slabs, block_index) to read only part of x's channel dim
    returns (out [N*Ho*Wo, cout_p] f32, stats [N, 8, cout_p] f32)
    """
    N, Hin, Win, pcin = x.shape
    T, cin_p, cout_p = w_taps.shape
    fuse_in = bn_scale is not None
    M = Ho * Wo
    # TODO(synk): pad rows / block multiple images when Ho*Wo % 8 != 0 (7x7).
    assert M % 8 == 0, "per-image output rows must be sublane aligned"
    assert cin_p % LANE == 0 and cout_p % LANE == 0

    if ch_block is None:
        ch_block = (pcin // cin_p, 0)
    ch_slabs, ch_idx = ch_block
    xc = ch_slabs * cin_p
    assert pcin % xc == 0 and (ch_idx + 1) * xc <= pcin
    if fuse_in:
        assert ch_slabs == 1 and ch_idx == 0 and pcin == cin_p
        assert (Hin, Win) == (Ho, Wo)

    limit = _vmem_limit()
    th = _choose_htile(Ho, Wo)
    x_block_bytes = Hin * Win * xc * x.dtype.itemsize
    scratch_bytes = (Hin + 2) * (Win + 2) * cin_p * 4 if fuse_in else 0
    tcout = _choose_cout_tile(cout_p, T, cin_p, x_block_bytes, M, limit,
                              scratch_bytes)
    nct = cout_p // tcout
    w_tile_bytes = T * cin_p * tcout * 2
    # Re-use the larger operand across the inner grid axis (no redundant DMA).
    cout_inner = x_block_bytes > w_tile_bytes

    kernel = _make_conv_kernel(taps, Ho, Wo, cin_p, tcout, th, fuse_in=fuse_in,
                               Hin=Hin, Win=Win, relu=bn_relu)

    if cout_inner:
        grid = (N, nct)
        x_map = lambda n, j: (n, 0, 0, ch_idx)
        v_map = lambda n, j: (0, 0)
        w_map = lambda n, j: (0, 0, j)
        o_map = lambda n, j: (n, j)
        s_map = lambda n, j: (n, 0, j)
    else:
        grid = (nct, N)
        x_map = lambda j, n: (n, 0, 0, ch_idx)
        v_map = lambda j, n: (0, 0)
        w_map = lambda j, n: (0, 0, j)
        o_map = lambda j, n: (n, j)
        s_map = lambda j, n: (n, 0, j)

    in_specs = [pl.BlockSpec((1, Hin, Win, xc), x_map)]
    args = [x]
    if fuse_in:
        in_specs += [pl.BlockSpec((1, cin_p), v_map),
                     pl.BlockSpec((1, cin_p), v_map)]
        args += [bn_scale.reshape(1, cin_p).astype(jnp.float32),
                 bn_shift.reshape(1, cin_p).astype(jnp.float32)]
    in_specs += [pl.BlockSpec((T, cin_p, tcout), w_map)]
    args += [w_taps]

    scratch = ([pltpu.VMEM((Hin + 2, Win + 2, cin_p), jnp.float32)]
               if fuse_in else [])

    out, stats = pl.pallas_call(
        kernel,
        out_shape=(jax.ShapeDtypeStruct((N * M, cout_p), jnp.float32),
                   jax.ShapeDtypeStruct((N, 8, cout_p), jnp.float32)),
        grid=grid,
        in_specs=in_specs,
        out_specs=(pl.BlockSpec((M, tcout), o_map),
                   pl.BlockSpec((1, 8, tcout), s_map)),
        scratch_shapes=scratch,
        compiler_params=pltpu.CompilerParams(
            dimension_semantics=("parallel", "parallel"),
            vmem_limit_bytes=limit),
    )(*args)
    return out, stats


# ---------------------------------------------------------------------------
# Fused bn2 + downsample-BN + residual add + ReLU kernel (wide tiles)
# ---------------------------------------------------------------------------
def _row_tile(rows):
    for cand in (1024, 512, 256, 128, 64, 32, 16, 8):
        if rows % cand == 0:
            return cand
    return rows


def _col_tile(cp):
    for cand in (512, 256, 128):
        if cp % cand == 0:
            return cand
    return cp


def _make_residual_bn_kernel(relu):
    def kernel(x_ref, s_ref, b_ref, r_ref, rs_ref, rb_ref, o_ref):
        y = x_ref[...].astype(jnp.float32) * s_ref[...] + b_ref[...]
        y = y + r_ref[...].astype(jnp.float32) * rs_ref[...] + rb_ref[...]
        if relu:
            y = jnp.maximum(y, 0.0)
        o_ref[...] = y.astype(o_ref.dtype)
    return kernel


def bn_residual_relu(x2d, scale, shift, resid, rscale, rshift, *, relu=True,
                     out_dtype=jnp.float32):
    rows, cp = x2d.shape
    assert resid.shape == (rows, cp)
    tn = _col_tile(cp)
    tm = _row_tile(rows)
    row_spec = pl.BlockSpec((tm, tn), lambda i, j: (i, j))
    vec_spec = pl.BlockSpec((1, tn), lambda i, j: (0, j))
    return pl.pallas_call(
        _make_residual_bn_kernel(relu),
        out_shape=jax.ShapeDtypeStruct((rows, cp), out_dtype),
        grid=(rows // tm, cp // tn),
        in_specs=[row_spec, vec_spec, vec_spec, row_spec, vec_spec, vec_spec],
        out_specs=row_spec,
        compiler_params=pltpu.CompilerParams(
            dimension_semantics=("parallel", "parallel"),
            vmem_limit_bytes=_vmem_limit()),
    )(x2d, scale.reshape(1, cp), shift.reshape(1, cp),
      resid, rscale.reshape(1, cp), rshift.reshape(1, cp))


def _bn_scale_shift_from_stats(stats, count, gamma_p, beta_p, eps):
    # stats: [N, 8, Cp]; rows 0/1 = per-image sum / sum of squares.
    # TODO(synk): switch to mean-subtracted accumulation if cancellation bites.
    s1 = jnp.sum(stats[:, 0, :], axis=0)
    s2 = jnp.sum(stats[:, 1, :], axis=0)
    mean = s1 / count
    var = s2 / count - mean * mean
    inv = jax.lax.rsqrt(var + eps)
    scale = gamma_p * inv
    shift = beta_p - mean * scale
    return scale, shift


# ---------------------------------------------------------------------------
# Plain-JAX layout glue (only for the stride-2 path / NCHW interface)
# ---------------------------------------------------------------------------
def _phase_stack_3x3_s2(x_nhwc):
    """Pad by 1 and phase-split so every stride-2 3x3 tap is contiguous."""
    # TODO(synk): fold pad + strided split + concat into the conv kernel.
    N, H, W, C = x_nhwc.shape
    xp = jnp.pad(x_nhwc, ((0, 0), (1, 1), (1, 1), (0, 0)))
    Hp, Wp = H + 2, W + 2
    Ho = (Hp - 3) // 2 + 1
    Wo = (Wp - 3) // 2 + 1
    Hph, Wph = -(-Hp // 2), -(-Wp // 2)
    phases = []
    for a in range(2):
        for b in range(2):
            p = xp[:, a::2, b::2, :]
            p = jnp.pad(p, ((0, 0), (0, Hph - p.shape[1]),
                            (0, Wph - p.shape[2]), (0, 0)))
            phases.append(p)
    taps = [((kh % 2) * 2 + (kw % 2), kh // 2, kw // 2)
            for kh in range(3) for kw in range(3)]
    return jnp.concatenate(phases, axis=-1), taps, Ho, Wo


def _weight_taps_3x3(w, cin_p, cout_p):
    cout, cin = w.shape[0], w.shape[1]
    wt = jnp.transpose(w, (2, 3, 1, 0)).reshape(9, cin, cout)
    wt = jnp.pad(wt, ((0, 0), (0, cin_p - cin), (0, cout_p - cout)))
    return wt.astype(jnp.bfloat16)


def _weight_taps_1x1(w, cin_p, cout_p):
    cout, cin = w.shape[0], w.shape[1]
    wt = w.reshape(cout, cin).T[None]
    wt = jnp.pad(wt, ((0, 0), (0, cin_p - cin), (0, cout_p - cout)))
    return wt.astype(jnp.bfloat16)


# ---------------------------------------------------------------------------
# BasicBlock forward
# ---------------------------------------------------------------------------
def basic_block_forward(x, params, *, stride, expansion, eps=1e-5):
    x = x.astype(jnp.float32)
    N, cin, H, W = x.shape
    cout = params["w1"].shape[0]
    cexp = params["w2"].shape[0]
    assert cexp == cout * expansion
    cin_p = _round_up(cin, LANE)
    cout_p = _round_up(cout, LANE)
    cexp_p = _round_up(cexp, LANE)

    def padc(v, cp):
        return jnp.pad(v.astype(jnp.float32), (0, cp - v.shape[0]))

    # NCHW -> NHWC, channel zero-pad, bf16 cast (one fused XLA pass).
    x_nhwc = _pad_last(jnp.transpose(x, (0, 2, 3, 1)), cin_p)
    x_bf16 = x_nhwc.astype(jnp.bfloat16)

    # ---- conv1 (3x3, stride, pad=1) + fused BN-stat epilogue --------------
    w1t = _weight_taps_3x3(params["w1"], cin_p, cout_p)
    if stride == 2:
        ph1, taps1, Ho, Wo = _phase_stack_3x3_s2(x_bf16)
        y1, st1 = conv2d_bn_stats(ph1, w1t, taps1, Ho, Wo)
    else:
        assert stride == 1, "BasicBlock uses stride 1 or 2"
        Ho, Wo = H, W
        taps1 = [(0, kh, kw) for kh in range(3) for kw in range(3)]
        # identity prologue affine -> in-kernel zero-pad, no XLA pad pass.
        y1, st1 = conv2d_bn_stats(
            x_bf16, w1t, taps1, Ho, Wo,
            bn_scale=jnp.ones((cin_p,), jnp.float32),
            bn_shift=jnp.zeros((cin_p,), jnp.float32), bn_relu=False)
    s1, b1 = _bn_scale_shift_from_stats(st1, float(N * Ho * Wo),
                                        padc(params["g1"], cout_p),
                                        padc(params["b1"], cout_p), eps)

    # ---- conv2 (3x3, stride 1, pad=1): bn1-apply + ReLU + bf16 cast + pad
    #      fused into its VMEM prologue (no HBM round trip for a1) ----------
    y1_img = y1.reshape(N, Ho, Wo, cout_p)            # free reshape, no copy
    w2t = _weight_taps_3x3(params["w2"], cout_p, cexp_p)
    taps2 = [(0, kh, kw) for kh in range(3) for kw in range(3)]
    y2, st2 = conv2d_bn_stats(y1_img, w2t, taps2, Ho, Wo,
                              bn_scale=s1, bn_shift=b1, bn_relu=True)
    s2, b2 = _bn_scale_shift_from_stats(st2, float(N * Ho * Wo),
                                        padc(params["g2"], cexp_p),
                                        padc(params["b2"], cexp_p), eps)

    # ---- residual branch ---------------------------------------------------
    if cin == cexp:
        assert stride == 1, "identity residual requires stride == 1"
        resid = x_nhwc.reshape(N * H * W, cin_p)      # cin_p == cexp_p
        rs = jnp.ones((cexp_p,), jnp.float32)
        rb = jnp.zeros((cexp_p,), jnp.float32)
    else:
        wdt = _weight_taps_1x1(params["wd"], cin_p, cexp_p)
        if stride == 2:
            # Phase (1,1) of ph1 is exactly x[:, ::2, ::2, :]; read only that
            # channel slab via the BlockSpec (no extra strided-slice pass).
            resid, std = conv2d_bn_stats(ph1, wdt, [(0, 0, 0)], Ho, Wo,
                                         ch_block=(1, 3))
        else:
            resid, std = conv2d_bn_stats(x_bf16, wdt, [(0, 0, 0)], Ho, Wo)
        rs, rb = _bn_scale_shift_from_stats(std, float(N * Ho * Wo),
                                            padc(params["gd"], cexp_p),
                                            padc(params["bd"], cexp_p), eps)

    # ---- bn2 + downsample-BN + residual add + relu: one fused tiled pass ---
    out = bn_residual_relu(y2, s2, b2, resid, rs, rb, relu=True)
    out = out[:, :cexp].reshape(N, Ho, Wo, cexp)
    return jnp.transpose(out, (0, 3, 1, 2))


# ---------------------------------------------------------------------------
# Pure-JAX reference (training-mode BatchNorm) for correctness checking
# ---------------------------------------------------------------------------
def reference_forward(x, params, *, stride, expansion, eps=1e-5,
                      conv_dtype=jnp.float32):
    def conv(x, w, s, p):
        return jax.lax.conv_general_dilated(
            x.astype(conv_dtype), w.astype(conv_dtype), (s, s),
            [(p, p), (p, p)], dimension_numbers=("NCHW", "OIHW", "NCHW"),
            preferred_element_type=jnp.float32)

    def bn(x, g, b):
        m = jnp.mean(x, axis=(0, 2, 3), keepdims=True)
        v = jnp.mean((x - m) ** 2, axis=(0, 2, 3), keepdims=True)
        return (x - m) * jax.lax.rsqrt(v + eps) * g.reshape(1, -1, 1, 1) \
            + b.reshape(1, -1, 1, 1)

    cin = x.shape[1]
    cexp = params["w2"].shape[0]
    y = jax.nn.relu(bn(conv(x, params["w1"], stride, 1),
                       params["g1"], params["b1"]))
    y = bn(conv(y, params["w2"], 1, 1), params["g2"], params["b2"])
    if cin == cexp:
        r = x
    else:
        r = bn(conv(x, params["wd"], stride, 0), params["gd"], params["bd"])
    return jax.nn.relu(y + r)


def init_params(key, in_channels, out_channels, expansion):
    cexp = out_channels * expansion
    ks = jax.random.split(key, 9)
    params = {
        "w1": 0.1 * jax.random.normal(ks[0], (out_channels, in_channels, 3, 3),
                                      jnp.float32),
        "g1": 1.0 + 0.1 * jax.random.normal(ks[1], (out_channels,), jnp.float32),
        "b1": 0.1 * jax.random.normal(ks[2], (out_channels,), jnp.float32),
        "w2": 0.1 * jax.random.normal(ks[3], (cexp, out_channels, 3, 3),
                                      jnp.float32),
        "g2": 1.0 + 0.1 * jax.random.normal(ks[4], (cexp,), jnp.float32),
        "b2": 0.1 * jax.random.normal(ks[5], (cexp,), jnp.float32),
    }
    if in_channels != cexp:
        params.update({
            "wd": 0.1 * jax.random.normal(ks[6], (cexp, in_channels, 1, 1),
                                          jnp.float32),
            "gd": 1.0 + 0.1 * jax.random.normal(ks[7], (cexp,), jnp.float32),
            "bd": 0.1 * jax.random.normal(ks[8], (cexp,), jnp.float32),
        })
    return params


if __name__ == "__main__":
    configs = [
        # (N, Cin, H, W, out_channels, stride, expansion)
        (2, 4, 16, 16, 8, 2, 1),   # stride-2 block with 1x1-conv downsample
        (2, 8, 16, 16, 8, 1, 1),   # stride-1 block with identity residual
    ]
    key = jax.random.PRNGKey(0)
    for (N, Cin, H, W, outc, stride, expansion) in configs:
        key, kx, kp = jax.random.split(key, 3)
        x = jax.random.normal(kx, (N, Cin, H, W), jnp.float32)
        params = init_params(kp, Cin, outc, expansion)

        fwd = jax.jit(functools.partial(basic_block_forward,
                                        stride=stride, expansion=expansion))
        out = jax.block_until_ready(fwd(x, params))

        ref_bf16 = reference_forward(x, params, stride=stride,
                                     expansion=expansion,
                                     conv_dtype=jnp.bfloat16)
        ref_f32 = reference_forward(x, params, stride=stride,
                                    expansion=expansion,
                                    conv_dtype=jnp.float32)
        assert out.shape == ref_f32.shape, (out.shape, ref_f32.shape)
        # Tight check vs a reference that also feeds the matmuls bf16.
        assert jnp.allclose(out, ref_bf16, atol=2e-3, rtol=2e-3), \
            float(jnp.max(jnp.abs(out - ref_bf16)))
        # Loose check vs pure-f32 semantics (only bf16 rounding of MXU inputs).
        assert jnp.allclose(out, ref_f32, atol=5e-2, rtol=5e-2), \
            float(jnp.max(jnp.abs(out - ref_f32)))

    print("KERNEL_OK")
</pallas_src>

<mosaic_0001>
module attributes {stable_mosaic.version = 11 : i64} {
  func.func @kernel(%arg0: i32, %arg1: i32, %arg2: memref<1x9x9x512xbf16, #tpu.memory_space<vmem>>, %arg3: memref<9x128x128xbf16, #tpu.memory_space<vmem>>, %arg4: memref<64x128xf32, #tpu.memory_space<vmem>>, %arg5: memref<1x8x128xf32, #tpu.memory_space<vmem>>) attributes {dimension_semantics = [#tpu.dimension_semantics<parallel>, #tpu.dimension_semantics<parallel>], iteration_bounds = array<i64: 1, 2>, scalar_prefetch = 0 : i64, scratch_operands = 0 : i64, tpu.core_type = #tpu.core_type<tc>, window_params = [{transform_indices = @transform_0, window_bounds = array<i64: 1, 9, 9, 512>}, {transform_indices = @transform_1, window_bounds = array<i64: 9, 128, 128>}, {transform_indices = @transform_2, window_bounds = array<i64: 64, 128>}, {transform_indices = @transform_3, window_bounds = array<i64: 1, 8, 128>}]} {
    %cst = arith.constant 0.000000e+00 : f32
    %0 = vector.broadcast %cst : f32 to vector<1x128xf32>
    %cst_0 = arith.constant 0.000000e+00 : f32
    %1 = vector.broadcast %cst_0 : f32 to vector<1x128xf32>
    %cst_1 = arith.constant 0.000000e+00 : f32
    %2 = vector.broadcast %cst_1 : f32 to vector<64x128xf32>
    %c0 = arith.constant 0 : index
    %c0_2 = arith.constant 0 : index
    %c0_3 = arith.constant 0 : index
    %c0_4 = arith.constant 0 : index
    %3 = vector.load %arg2[%c0, %c0_2, %c0_3, %c0_4] : memref<1x9x9x512xbf16, #tpu.memory_space<vmem>>, vector<1x8x8x128xbf16>
    %4 = vector.shape_cast %3 : vector<1x8x8x128xbf16> to vector<8x8x128xbf16>
    %5 = vector.shape_cast %4 : vector<8x8x128xbf16> to vector<64x128xbf16>
    %c0_5 = arith.constant 0 : index
    %c0_6 = arith.constant 0 : index
    %c0_7 = arith.constant 0 : index
    %6 = vector.load %arg3[%c0_5, %c0_6, %c0_7] : memref<9x128x128xbf16, #tpu.memory_space<vmem>>, vector<1x128x128xbf16>
    %7 = vector.shape_cast %6 : vector<1x128x128xbf16> to vector<128x128xbf16>
    %cst_8 = arith.constant dense<0.000000e+00> : vector<64x128xf32>
    %8 = tpu.matmul %5, %7, %cst_8 {dimension_numbers = #tpu.dot_dimension_numbers<[1], [0], [0], [1], [0, 0, 1, 1], [], []>} : vector<64x128xbf16>, vector<128x128xbf16>, vector<64x128xf32> -> vector<64x128xf32>
    %9 = arith.addf %2, %8 : vector<64x128xf32>
    %c0_9 = arith.constant 0 : index
    %c0_10 = arith.constant 0 : index
    %c0_11 = arith.constant 0 : index
    %c128 = arith.constant 128 : index
    %10 = vector.load %arg2[%c0_9, %c0_10, %c0_11, %c128] : memref<1x9x9x512xbf16, #tpu.memory_space<vmem>>, vector<1x8x8x128xbf16>
    %11 = vector.shape_cast %10 : vector<1x8x8x128xbf16> to vector<8x8x128xbf16>
    %12 = vector.shape_cast %11 : vector<8x8x128xbf16> to vector<64x128xbf16>
    %c1 = arith.constant 1 : index
    %c0_12 = arith.constant 0 : index
    %c0_13 = arith.constant 0 : index
    %13 = vector.load %arg3[%c1, %c0_12, %c0_13] : memref<9x128x128xbf16, #tpu.memory_space<vmem>>, vector<1x128x128xbf16>
    %14 = vector.shape_cast %13 : vector<1x128x128xbf16> to vector<128x128xbf16>
    %cst_14 = arith.constant dense<0.000000e+00> : vector<64x128xf32>
    %15 = tpu.matmul %12, %14, %cst_14 {dimension_numbers = #tpu.dot_dimension_numbers<[1], [0], [0], [1], [0, 0, 1, 1], [], []>} : vector<64x128xbf16>, vector<128x128xbf16>, vector<64x128xf32> -> vector<64x128xf32>
    %16 = arith.addf %9, %15 : vector<64x128xf32>
    %c0_15 = arith.constant 0 : index
    %c0_16 = arith.constant 0 : index
    %c1_17 = arith.constant 1 : index
    %c0_18 = arith.constant 0 : index
    %17 = vector.load %arg2[%c0_15, %c0_16, %c1_17, %c0_18] : memref<1x9x9x512xbf16, #tpu.memory_space<vmem>>, vector<1x8x8x128xbf16>
    %18 = vector.shape_cast %17 : vector<1x8x8x128xbf16> to vector<8x8x128xbf16>
    %19 = vector.shape_cast %18 : vector<8x8x128xbf16> to vector<64x128xbf16>
    %c2 = arith.constant 2 : index
    %c0_19 = arith.constant 0 : index
    %c0_20 = arith.constant 0 : index
    %20 = vector.load %arg3[%c2, %c0_19, %c0_20] : memref<9x128x128xbf16, #tpu.memory_space<vmem>>, vector<1x128x128xbf16>
    %21 = vector.shape_cast %20 : vector<1x128x128xbf16> to vector<128x128xbf16>
    %cst_21 = arith.constant dense<0.000000e+00> : vector<64x128xf32>
    %22 = tpu.matmul %19, %21, %cst_21 {dimension_numbers = #tpu.dot_dimension_numbers<[1], [0], [0], [1], [0, 0, 1, 1], [], []>} : vector<64x128xbf16>, vector<128x128xbf16>, vector<64x128xf32> -> vector<64x128xf32>
    %23 = arith.addf %16, %22 : vector<64x128xf32>
    %c0_22 = arith.constant 0 : index
    %c0_23 = arith.constant 0 : index
    %c0_24 = arith.constant 0 : index
    %c256 = arith.constant 256 : index
    %24 = vector.load %arg2[%c0_22, %c0_23, %c0_24, %c256] : memref<1x9x9x512xbf16, #tpu.memory_space<vmem>>, vector<1x8x8x128xbf16>
    %25 = vector.shape_cast %24 : vector<1x8x8x128xbf16> to vector<8x8x128xbf16>
    %26 = vector.shape_cast %25 : vector<8x8x128xbf16> to vector<64x128xbf16>
    %c3 = arith.constant 3 : index
    %c0_25 = arith.constant 0 : index
    %c0_26 = arith.constant 0 : index
    %27 = vector.load %arg3[%c3, %c0_25, %c0_26] : memref<9x128x128xbf16, #tpu.memory_space<vmem>>, vector<1x128x128xbf16>
    %28 = vector.shape_cast %27 : vector<1x128x128xbf16> to vector<128x128xbf16>
    %cst_27 = arith.constant dense<0.000000e+00> : vector<64x128xf32>
    %29 = tpu.matmul %26, %28, %cst_27 {dimension_numbers = #tpu.dot_dimension_numbers<[1], [0], [0], [1], [0, 0, 1, 1], [], []>} : vector<64x128xbf16>, vector<128x128xbf16>, vector<64x128xf32> -> vector<64x128xf32>
    %30 = arith.addf %23, %29 : vector<64x128xf32>
    %c0_28 = arith.constant 0 : index
    %c0_29 = arith.constant 0 : index
    %c0_30 = arith.constant 0 : index
    %c384 = arith.constant 384 : index
    %31 = vector.load %arg2[%c0_28, %c0_29, %c0_30, %c384] : memref<1x9x9x512xbf16, #tpu.memory_space<vmem>>, vector<1x8x8x128xbf16>
    %32 = vector.shape_cast %31 : vector<1x8x8x128xbf16> to vector<8x8x128xbf16>
    %33 = vector.shape_cast %32 : vector<8x8x128xbf16> to vector<64x128xbf16>
    %c4 = arith.constant 4 : index
    %c0_31 = arith.constant 0 : index
    %c0_32 = arith.constant 0 : index
    %34 = vector.load %arg3[%c4, %c0_31, %c0_32] : memref<9x128x128xbf16, #tpu.memory_space<vmem>>, vector<1x128x128xbf16>
    %35 = vector.shape_cast %34 : vector<1x128x128xbf16> to vector<128x128xbf16>
    %cst_33 = arith.constant dense<0.000000e+00> : vector<64x128xf32>
    %36 = tpu.matmul %33, %35, %cst_33 {dimension_numbers = #tpu.dot_dimension_numbers<[1], [0], [0], [1], [0, 0, 1, 1], [], []>} : vector<64x128xbf16>, vector<128x128xbf16>, vector<64x128xf32> -> vector<64x128xf32>
    %37 = arith.addf %30, %36 : vector<64x128xf32>
    %c0_34 = arith.constant 0 : index
    %c0_35 = arith.constant 0 : index
    %c1_36 = arith.constant 1 : index
    %c256_37 = arith.constant 256 : index
    %38 = vector.load %arg2[%c0_34, %c0_35, %c1_36, %c256_37] : memref<1x9x9x512xbf16, #tpu.memory_space<vmem>>, vector<1x8x8x128xbf16>
    %39 = vector.shape_cast %38 : vector<1x8x8x128xbf16> to vector<8x8x128xbf16>
    %40 = vector.shape_cast %39 : vector<8x8x128xbf16> to vector<64x128xbf16>
    %c5 = arith.constant 5 : index
    %c0_38 = arith.constant 0 : index
    %c0_39 = arith.constant 0 : index
    %41 = vector.load %arg3[%c5, %c0_38, %c0_39] : memref<9x128x128xbf16, #tpu.memory_space<vmem>>, vector<1x128x128xbf16>
    %42 = vector.shape_cast %41 : vector<1x128x128xbf16> to vector<128x128xbf16>
    %cst_40 = arith.constant dense<0.000000e+00> : vector<64x128xf32>
    %43 = tpu.matmul %40, %42, %cst_40 {dimension_numbers = #tpu.dot_dimension_numbers<[1], [0], [0], [1], [0, 0, 1, 1], [], []>} : vector<64x128xbf16>, vector<128x128xbf16>, vector<64x128xf32> -> vector<64x128xf32>
    %44 = arith.addf %37, %43 : vector<64x128xf32>
    %c0_41 = arith.constant 0 : index
    %c1_42 = arith.constant 1 : index
    %c0_43 = arith.constant 0 : index
    %c0_44 = arith.constant 0 : index
    %45 = vector.load %arg2[%c0_41, %c1_42, %c0_43, %c0_44] : memref<1x9x9x512xbf16, #tpu.memory_space<vmem>>, vector<1x8x8x128xbf16>
    %46 = vector.shape_cast %45 : vector<1x8x8x128xbf16> to vector<8x8x128xbf16>
    %47 = vector.shape_cast %46 : vector<8x8x128xbf16> to vector<64x128xbf16>
    %c6 = arith.constant 6 : index
    %c0_45 = arith.constant 0 : index
    %c0_46 = arith.constant 0 : index
    %48 = vector.load %arg3[%c6, %c0_45, %c0_46] : memref<9x128x128xbf16, #tpu.memory_space<vmem>>, vector<1x128x128xbf16>
    %49 = vector.shape_cast %48 : vector<1x128x128xbf16> to vector<128x128xbf16>
    %cst_47 = arith.constant dense<0.000000e+00> : vector<64x128xf32>
    %50 = tpu.matmul %47, %49, %cst_47 {dimension_numbers = #tpu.dot_dimension_numbers<[1], [0], [0], [1], [0, 0, 1, 1], [], []>} : vector<64x128xbf16>, vector<128x128xbf16>, vector<64x128xf32> -> vector<64x128xf32>
    %51 = arith.addf %44, %50 : vector<64x128xf32>
    %c0_48 = arith.constant 0 : index
    %c1_49 = arith.constant 1 : index
    %c0_50 = arith.constant 0 : index
    %c128_51 = arith.constant 128 : index
    %52 = vector.load %arg2[%c0_48, %c1_49, %c0_50, %c128_51] : memref<1x9x9x512xbf16, #tpu.memory_space<vmem>>, vector<1x8x8x128xbf16>
    %53 = vector.shape_cast %52 : vector<1x8x8x128xbf16> to vector<8x8x128xbf16>
    %54 = vector.shape_cast %53 : vector<8x8x128xbf16> to vector<64x128xbf16>
    %c7 = arith.constant 7 : index
    %c0_52 = arith.constant 0 : index
    %c0_53 = arith.constant 0 : index
    %55 = vector.load %arg3[%c7, %c0_52, %c0_53] : memref<9x128x128xbf16, #tpu.memory_space<vmem>>, vector<1x128x128xbf16>
    %56 = vector.shape_cast %55 : vector<1x128x128xbf16> to vector<128x128xbf16>
    %cst_54 = arith.constant dense<0.000000e+00> : vector<64x128xf32>
    %57 = tpu.matmul %54, %56, %cst_54 {dimension_numbers = #tpu.dot_dimension_numbers<[1], [0], [0], [1], [0, 0, 1, 1], [], []>} : vector<64x128xbf16>, vector<128x128xbf16>, vector<64x128xf32> -> vector<64x128xf32>
    %58 = arith.addf %51, %57 : vector<64x128xf32>
    %c0_55 = arith.constant 0 : index
    %c1_56 = arith.constant 1 : index
    %c1_57 = arith.constant 1 : index
    %c0_58 = arith.constant 0 : index
    %59 = vector.load %arg2[%c0_55, %c1_56, %c1_57, %c0_58] : memref<1x9x9x512xbf16, #tpu.memory_space<vmem>>, vector<1x8x8x128xbf16>
    %60 = vector.shape_cast %59 : vector<1x8x8x128xbf16> to vector<8x8x128xbf16>
    %61 = vector.shape_cast %60 : vector<8x8x128xbf16> to vector<64x128xbf16>
    %c8 = arith.constant 8 : index
    %c0_59 = arith.constant 0 : index
    %c0_60 = arith.constant 0 : index
    %62 = vector.load %arg3[%c8, %c0_59, %c0_60] : memref<9x128x128xbf16, #tpu.memory_space<vmem>>, vector<1x128x128xbf16>
    %63 = vector.shape_cast %62 : vector<1x128x128xbf16> to vector<128x128xbf16>
    %cst_61 = arith.constant dense<0.000000e+00> : vector<64x128xf32>
    %64 = tpu.matmul %61, %63, %cst_61 {dimension_numbers = #tpu.dot_dimension_numbers<[1], [0], [0], [1], [0, 0, 1, 1], [], []>} : vector<64x128xbf16>, vector<128x128xbf16>, vector<64x128xf32> -> vector<64x128xf32>
    %65 = arith.addf %58, %64 : vector<64x128xf32>
    %c0_62 = arith.constant 0 : index
    %c0_63 = arith.constant 0 : index
    %66 = vector.load %arg4[%c0_62, %c0_63] : memref<64x128xf32, #tpu.memory_space<vmem>>, vector<64x128xf32>
    tpu.vector_store %arg4[%c0_62, %c0_63], %65 {strides = array<i32>} : memref<64x128xf32, #tpu.memory_space<vmem>>, vector<64x128xf32>,
    %cst_64 = arith.constant dense<0.000000e+00> : vector<128xf32>
    %67 = vector.multi_reduction <add>, %65, %cst_64 [0] : vector<64x128xf32> to vector<128xf32>
    %68 = vector.shape_cast %67 : vector<128xf32> to vector<1x128xf32>
    %69 = arith.addf %0, %68 : vector<1x128xf32>
    %70 = arith.mulf %65, %65 : vector<64x128xf32>
    %cst_65 = arith.constant dense<0.000000e+00> : vector<128xf32>
    %71 = vector.multi_reduction <add>, %70, %cst_65 [0] : vector<64x128xf32> to vector<128xf32>
    %72 = vector.shape_cast %71 : vector<128xf32> to vector<1x128xf32>
    %73 = arith.addf %1, %72 : vector<1x128xf32>
    %74 = tpu.iota {dimensions = array<i32: 0>} : vector<8x128xi32>
    %c0_i32 = arith.constant 0 : i32
    %75 = vector.broadcast %c0_i32 : i32 to vector<8x128xi32>
    %76 = arith.cmpi eq, %74, %75 : vector<8x128xi32>
    %c1_i32 = arith.constant 1 : i32
    %77 = vector.broadcast %c1_i32 : i32 to vector<8x128xi32>
    %78 = arith.cmpi eq, %74, %77 : vector<8x128xi32>
    %cst_66 = arith.constant 0.000000e+00 : f32
    %79 = vector.shape_cast %73 : vector<1x128xf32> to vector<1x128xf32>
    %80 = vector.broadcast %79 : vector<1x128xf32> to vector<8x128xf32>
    %81 = vector.broadcast %cst_66 : f32 to vector<8x128xf32>
    %82 = arith.select %78, %80, %81 : vector<8x128xi1>, vector<8x128xf32>
    %83 = vector.shape_cast %69 : vector<1x128xf32> to vector<1x128xf32>
    %84 = vector.broadcast %83 : vector<1x128xf32> to vector<8x128xf32>
    %85 = arith.select %76, %84, %82 : vector<8x128xi1>, vector<8x128xf32>
    %86 = vector.shape_cast %85 : vector<8x128xf32> to vector<1x8x128xf32>
    %c0_67 = arith.constant 0 : index
    %c0_68 = arith.constant 0 : index
    %c0_69 = arith.constant 0 : index
    %87 = vector.load %arg5[%c0_67, %c0_68, %c0_69] : memref<1x8x128xf32, #tpu.memory_space<vmem>>, vector<1x8x128xf32>
    tpu.vector_store %arg5[%c0_67, %c0_68, %c0_69], %86 {strides = array<i32>} : memref<1x8x128xf32, #tpu.memory_space<vmem>>, vector<1x8x128xf32>,
    return
  }
  func.func @transform_0(%arg0: i32, %arg1: i32) -> (i32, i32, i32, i32) {
    %c0_i32 = arith.constant 0 : i32
    %c0_i32_0 = arith.constant 0 : i32
    %c0_i32_1 = arith.constant 0 : i32
    %c0_i32_2 = arith.constant 0 : i32
    return %arg1, %c0_i32, %c0_i32_0, %c0_i32_1 : i32, i32, i32, i32
  }
  func.func @transform_1(%arg0: i32, %arg1: i32) -> (i32, i32, i32) {
    %c0_i32 = arith.constant 0 : i32
    %c0_i32_0 = arith.constant 0 : i32
    %c0_i32_1 = arith.constant 0 : i32
    return %c0_i32, %c0_i32_0, %arg0 : i32, i32, i32
  }
  func.func @transform_2(%arg0: i32, %arg1: i32) -> (i32, i32) {
    %c0_i32 = arith.constant 0 : i32
    return %arg1, %arg0 : i32, i32
  }
  func.func @transform_3(%arg0: i32, %arg1: i32) -> (i32, i32, i32) {
    %c0_i32 = arith.constant 0 : i32
    %c0_i32_0 = arith.constant 0 : i32
    return %arg1, %c0_i32, %arg0 : i32, i32, i32
  }
}

module attributes {stable_mosaic.version = 11 : i64} {
  func.func @kernel(%arg0: i32, %arg1: i32, %arg2: memref<1x8x8x128xf32, #tpu.memory_space<vmem>>, %arg3: memref<1x128xf32, #tpu.memory_space<vmem>>, %arg4: memref<1x128xf32, #tpu.memory_space<vmem>>, %arg5: memref<9x128x128xbf16, #tpu.memory_space<vmem>>, %arg6: memref<64x128xf32, #tpu.memory_space<vmem>>, %arg7: memref<1x8x128xf32, #tpu.memory_space<vmem>>, %arg8: memref<10x10x128xf32, #tpu.memory_space<vmem>>) attributes {dimension_semantics = [#tpu.dimension_semantics<parallel>, #tpu.dimension_semantics<parallel>], iteration_bounds = array<i64: 1, 2>, scalar_prefetch = 0 : i64, scratch_operands = 1 : i64, tpu.core_type = #tpu.core_type<tc>, window_params = [{transform_indices = @transform_0, window_bounds = array<i64: 1, 8, 8, 128>}, {pipeline_mode = #tpu.pipeline_mode<synchronous>, transform_indices = @transform_1, window_bounds = array<i64: 1, 128>}, {pipeline_mode = #tpu.pipeline_mode<synchronous>, transform_indices = @transform_2, window_bounds = array<i64: 1, 128>}, {transform_indices = @transform_3, window_bounds = array<i64: 9, 128, 128>}, {transform_indices = @transform_4, window_bounds = array<i64: 64, 128>}, {transform_indices = @transform_5, window_bounds = array<i64: 1, 8, 128>}]} {
    %c0 = arith.constant 0 : index
    %c0_0 = arith.constant 0 : index
    %0 = vector.load %arg3[%c0, %c0_0] : memref<1x128xf32, #tpu.memory_space<vmem>>, vector<1x128xf32>
    %1 = vector.shape_cast %0 : vector<1x128xf32> to vector<1x1x128xf32>
    %c0_1 = arith.constant 0 : index
    %c0_2 = arith.constant 0 : index
    %2 = vector.load %arg4[%c0_1, %c0_2] : memref<1x128xf32, #tpu.memory_space<vmem>>, vector<1x128xf32>
    %3 = vector.shape_cast %2 : vector<1x128xf32> to vector<1x1x128xf32>
    %cst = arith.constant 0.000000e+00 : f32
    %4 = vector.broadcast %cst : f32 to vector<10x10x128xf32>
    %c0_3 = arith.constant 0 : index
    %c0_4 = arith.constant 0 : index
    %c0_5 = arith.constant 0 : index
    %5 = vector.load %arg8[%c0_3, %c0_4, %c0_5] : memref<10x10x128xf32, #tpu.memory_space<vmem>>, vector<10x10x128xf32>
    tpu.vector_store %arg8[%c0_3, %c0_4, %c0_5], %4 {strides = array<i32>} : memref<10x10x128xf32, #tpu.memory_space<vmem>>, vector<10x10x128xf32>,
    %c0_6 = arith.constant 0 : index
    %c0_7 = arith.constant 0 : index
    %c0_8 = arith.constant 0 : index
    %c0_9 = arith.constant 0 : index
    %6 = vector.load %arg2[%c0_6, %c0_7, %c0_8, %c0_9] : memref<1x8x8x128xf32, #tpu.memory_space<vmem>>, vector<1x8x8x128xf32>
    %7 = vector.shape_cast %6 : vector<1x8x8x128xf32> to vector<8x8x128xf32>
    %8 = vector.broadcast %1 : vector<1x1x128xf32> to vector<8x8x128xf32>
    %9 = arith.mulf %7, %8 : vector<8x8x128xf32>
    %10 = vector.broadcast %3 : vector<1x1x128xf32> to vector<8x8x128xf32>
    %11 = arith.addf %9, %10 : vector<8x8x128xf32>
    %cst_10 = arith.constant 0.000000e+00 : f32
    %12 = vector.broadcast %cst_10 : f32 to vector<8x8x128xf32>
    %13 = arith.maximumf %11, %12 : vector<8x8x128xf32>
    %c1 = arith.constant 1 : index
    %c1_11 = arith.constant 1 : index
    %c0_12 = arith.constant 0 : index
    %14 = vector.load %arg8[%c1, %c1_11, %c0_12] : memref<10x10x128xf32, #tpu.memory_space<vmem>>, vector<8x8x128xf32>
    tpu.vector_store %arg8[%c1, %c1_11, %c0_12], %13 {strides = array<i32>} : memref<10x10x128xf32, #tpu.memory_space<vmem>>, vector<8x8x128xf32>,
    %cst_13 = arith.constant 0.000000e+00 : f32
    %15 = vector.broadcast %cst_13 : f32 to vector<1x128xf32>
    %cst_14 = arith.constant 0.000000e+00 : f32
    %16 = vector.broadcast %cst_14 : f32 to vector<1x128xf32>
    %cst_15 = arith.constant 0.000000e+00 : f32
    %17 = vector.broadcast %cst_15 : f32 to vector<64x128xf32>
    %c0_16 = arith.constant 0 : index
    %c0_17 = arith.constant 0 : index
    %c0_18 = arith.constant 0 : index
    %18 = vector.load %arg8[%c0_16, %c0_17, %c0_18] : memref<10x10x128xf32, #tpu.memory_space<vmem>>, vector<8x8x128xf32>
    %19 = arith.truncf %18 : vector<8x8x128xf32> to vector<8x8x128xbf16>
    %20 = vector.shape_cast %19 : vector<8x8x128xbf16> to vector<64x128xbf16>
    %c0_19 = arith.constant 0 : index
    %c0_20 = arith.constant 0 : index
    %c0_21 = arith.constant 0 : index
    %21 = vector.load %arg5[%c0_19, %c0_20, %c0_21] : memref<9x128x128xbf16, #tpu.memory_space<vmem>>, vector<1x128x128xbf16>
    %22 = vector.shape_cast %21 : vector<1x128x128xbf16> to vector<128x128xbf16>
    %cst_22 = arith.constant dense<0.000000e+00> : vector<64x128xf32>
    %23 = tpu.matmul %20, %22, %cst_22 {dimension_numbers = #tpu.dot_dimension_numbers<[1], [0], [0], [1], [0, 0, 1, 1], [], []>} : vector<64x128xbf16>, vector<128x128xbf16>, vector<64x128xf32> -> vector<64x128xf32>
    %24 = arith.addf %17, %23 : vector<64x128xf32>
    %c0_23 = arith.constant 0 : index
    %c1_24 = arith.constant 1 : index
    %c0_25 = arith.constant 0 : index
    %25 = vector.load %arg8[%c0_23, %c1_24, %c0_25] : memref<10x10x128xf32, #tpu.memory_space<vmem>>, vector<8x8x128xf32>
    %26 = arith.truncf %25 : vector<8x8x128xf32> to vector<8x8x128xbf16>
    %27 = vector.shape_cast %26 : vector<8x8x128xbf16> to vector<64x128xbf16>
    %c1_26 = arith.constant 1 : index
    %c0_27 = arith.constant 0 : index
    %c0_28 = arith.constant 0 : index
    %28 = vector.load %arg5[%c1_26, %c0_27, %c0_28] : memref<9x128x128xbf16, #tpu.memory_space<vmem>>, vector<1x128x128xbf16>
    %29 = vector.shape_cast %28 : vector<1x128x128xbf16> to vector<128x128xbf16>
    %cst_29 = arith.constant dense<0.000000e+00> : vector<64x128xf32>
    %30 = tpu.matmul %27, %29, %cst_29 {dimension_numbers = #tpu.dot_dimension_numbers<[1], [0], [0], [1], [0, 0, 1, 1], [], []>} : vector<64x128xbf16>, vector<128x128xbf16>, vector<64x128xf32> -> vector<64x128xf32>
    %31 = arith.addf %24, %30 : vector<64x128xf32>
    %c0_30 = arith.constant 0 : index
    %c2 = arith.constant 2 : index
    %c0_31 = arith.constant 0 : index
    %32 = vector.load %arg8[%c0_30, %c2, %c0_31] : memref<10x10x128xf32, #tpu.memory_space<vmem>>, vector<8x8x128xf32>
    %33 = arith.truncf %32 : vector<8x8x128xf32> to vector<8x8x128xbf16>
    %34 = vector.shape_cast %33 : vector<8x8x128xbf16> to vector<64x128xbf16>
    %c2_32 = arith.constant 2 : index
    %c0_33 = arith.constant 0 : index
    %c0_34 = arith.constant 0 : index
    %35 = vector.load %arg5[%c2_32, %c0_33, %c0_34] : memref<9x128x128xbf16, #tpu.memory_space<vmem>>, vector<1x128x128xbf16>
    %36 = vector.shape_cast %35 : vector<1x128x128xbf16> to vector<128x128xbf16>
    %cst_35 = arith.constant dense<0.000000e+00> : vector<64x128xf32>
    %37 = tpu.matmul %34, %36, %cst_35 {dimension_numbers = #tpu.dot_dimension_numbers<[1], [0], [0], [1], [0, 0, 1, 1], [], []>} : vector<64x128xbf16>, vector<128x128xbf16>, vector<64x128xf32> -> vector<64x128xf32>
    %38 = arith.addf %31, %37 : vector<64x128xf32>
    %c1_36 = arith.constant 1 : index
    %c0_37 = arith.constant 0 : index
    %c0_38 = arith.constant 0 : index
    %39 = vector.load %arg8[%c1_36, %c0_37, %c0_38] : memref<10x10x128xf32, #tpu.memory_space<vmem>>, vector<8x8x128xf32>
    %40 = arith.truncf %39 : vector<8x8x128xf32> to vector<8x8x128xbf16>
    %41 = vector.shape_cast %40 : vector<8x8x128xbf16> to vector<64x128xbf16>
    %c3 = arith.constant 3 : index
    %c0_39 = arith.constant 0 : index
    %c0_40 = arith.constant 0 : index
    %42 = vector.load %arg5[%c3, %c0_39, %c0_40] : memref<9x128x128xbf16, #tpu.memory_space<vmem>>, vector<1x128x128xbf16>
    %43 = vector.shape_cast %42 : vector<1x128x128xbf16> to vector<128x128xbf16>
    %cst_41 = arith.constant dense<0.000000e+00> : vector<64x128xf32>
    %44 = tpu.matmul %41, %43, %cst_41 {dimension_numbers = #tpu.dot_dimension_numbers<[1], [0], [0], [1], [0, 0, 1, 1], [], []>} : vector<64x128xbf16>, vector<128x128xbf16>, vector<64x128xf32> -> vector<64x128xf32>
    %45 = arith.addf %38, %44 : vector<64x128xf32>
    %c1_42 = arith.constant 1 : index
    %c1_43 = arith.constant 1 : index
    %c0_44 = arith.constant 0 : index
    %46 = vector.load %arg8[%c1_42, %c1_43, %c0_44] : memref<10x10x128xf32, #tpu.memory_space<vmem>>, vector<8x8x128xf32>
    %47 = arith.truncf %46 : vector<8x8x128xf32> to vector<8x8x128xbf16>
    %48 = vector.shape_cast %47 : vector<8x8x128xbf16> to vector<64x128xbf16>
    %c4 = arith.constant 4 : index
    %c0_45 = arith.constant 0 : index
    %c0_46 = arith.constant 0 : index
    %49 = vector.load %arg5[%c4, %c0_45, %c0_46] : memref<9x128x128xbf16, #tpu.memory_space<vmem>>, vector<1x128x128xbf16>
    %50 = vector.shape_cast %49 : vector<1x128x128xbf16> to vector<128x128xbf16>
    %cst_47 = arith.constant dense<0.000000e+00> : vector<64x128xf32>
    %51 = tpu.matmul %48, %50, %cst_47 {dimension_numbers = #tpu.dot_dimension_numbers<[1], [0], [0], [1], [0, 0, 1, 1], [], []>} : vector<64x128xbf16>, vector<128x128xbf16>, vector<64x128xf32> -> vector<64x128xf32>
    %52 = arith.addf %45, %51 : vector<64x128xf32>
    %c1_48 = arith.constant 1 : index
    %c2_49 = arith.constant 2 : index
    %c0_50 = arith.constant 0 : index
    %53 = vector.load %arg8[%c1_48, %c2_49, %c0_50] : memref<10x10x128xf32, #tpu.memory_space<vmem>>, vector<8x8x128xf32>
    %54 = arith.truncf %53 : vector<8x8x128xf32> to vector<8x8x128xbf16>
    %55 = vector.shape_cast %54 : vector<8x8x128xbf16> to vector<64x128xbf16>
    %c5 = arith.constant 5 : index
    %c0_51 = arith.constant 0 : index
    %c0_52 = arith.constant 0 : index
    %56 = vector.load %arg5[%c5, %c0_51, %c0_52] : memref<9x128x128xbf16, #tpu.memory_space<vmem>>, vector<1x128x128xbf16>
    %57 = vector.shape_cast %56 : vector<1x128x128xbf16> to vector<128x128xbf16>
    %cst_53 = arith.constant dense<0.000000e+00> : vector<64x128xf32>
    %58 = tpu.matmul %55, %57, %cst_53 {dimension_numbers = #tpu.dot_dimension_numbers<[1], [0], [0], [1], [0, 0, 1, 1], [], []>} : vector<64x128xbf16>, vector<128x128xbf16>, vector<64x128xf32> -> vector<64x128xf32>
    %59 = arith.addf %52, %58 : vector<64x128xf32>
    %c2_54 = arith.constant 2 : index
    %c0_55 = arith.constant 0 : index
    %c0_56 = arith.constant 0 : index
    %60 = vector.load %arg8[%c2_54, %c0_55, %c0_56] : memref<10x10x128xf32, #tpu.memory_space<vmem>>, vector<8x8x128xf32>
    %61 = arith.truncf %60 : vector<8x8x128xf32> to vector<8x8x128xbf16>
    %62 = vector.shape_cast %61 : vector<8x8x128xbf16> to vector<64x128xbf16>
    %c6 = arith.constant 6 : index
    %c0_57 = arith.constant 0 : index
    %c0_58 = arith.constant 0 : index
    %63 = vector.load %arg5[%c6, %c0_57, %c0_58] : memref<9x128x128xbf16, #tpu.memory_space<vmem>>, vector<1x128x128xbf16>
    %64 = vector.shape_cast %63 : vector<1x128x128xbf16> to vector<128x128xbf16>
    %cst_59 = arith.constant dense<0.000000e+00> : vector<64x128xf32>
    %65 = tpu.matmul %62, %64, %cst_59 {dimension_numbers = #tpu.dot_dimension_numbers<[1], [0], [0], [1], [0, 0, 1, 1], [], []>} : vector<64x128xbf16>, vector<128x128xbf16>, vector<64x128xf32> -> vector<64x128xf32>
    %66 = arith.addf %59, %65 : vector<64x128xf32>
    %c2_60 = arith.constant 2 : index
    %c1_61 = arith.constant 1 : index
    %c0_62 = arith.constant 0 : index
    %67 = vector.load %arg8[%c2_60, %c1_61, %c0_62] : memref<10x10x128xf32, #tpu.memory_space<vmem>>, vector<8x8x128xf32>
    %68 = arith.truncf %67 : vector<8x8x128xf32> to vector<8x8x128xbf16>
    %69 = vector.shape_cast %68 : vector<8x8x128xbf16> to vector<64x128xbf16>
    %c7 = arith.constant 7 : index
    %c0_63 = arith.constant 0 : index
    %c0_64 = arith.constant 0 : index
    %70 = vector.load %arg5[%c7, %c0_63, %c0_64] : memref<9x128x128xbf16, #tpu.memory_space<vmem>>, vector<1x128x128xbf16>
    %71 = vector.shape_cast %70 : vector<1x128x128xbf16> to vector<128x128xbf16>
    %cst_65 = arith.constant dense<0.000000e+00> : vector<64x128xf32>
    %72 = tpu.matmul %69, %71, %cst_65 {dimension_numbers = #tpu.dot_dimension_numbers<[1], [0], [0], [1], [0, 0, 1, 1], [], []>} : vector<64x128xbf16>, vector<128x128xbf16>, vector<64x128xf32> -> vector<64x128xf32>
    %73 = arith.addf %66, %72 : vector<64x128xf32>
    %c2_66 = arith.constant 2 : index
    %c2_67 = arith.constant 2 : index
    %c0_68 = arith.constant 0 : index
    %74 = vector.load %arg8[%c2_66, %c2_67, %c0_68] : memref<10x10x128xf32, #tpu.memory_space<vmem>>, vector<8x8x128xf32>
    %75 = arith.truncf %74 : vector<8x8x128xf32> to vector<8x8x128xbf16>
    %76 = vector.shape_cast %75 : vector<8x8x128xbf16> to vector<64x128xbf16>
    %c8 = arith.constant 8 : index
    %c0_69 = arith.constant 0 : index
    %c0_70 = arith.constant 0 : index
    %77 = vector.load %arg5[%c8, %c0_69, %c0_70] : memref<9x128x128xbf16, #tpu.memory_space<vmem>>, vector<1x128x128xbf16>
    %78 = vector.shape_cast %77 : vector<1x128x128xbf16> to vector<128x128xbf16>
    %cst_71 = arith.constant dense<0.000000e+00> : vector<64x128xf32>
    %79 = tpu.matmul %76, %78, %cst_71 {dimension_numbers = #tpu.dot_dimension_numbers<[1], [0], [0], [1], [0, 0, 1, 1], [], []>} : vector<64x128xbf16>, vector<128x128xbf16>, vector<64x128xf32> -> vector<64x128xf32>
    %80 = arith.addf %73, %79 : vector<64x128xf32>
    %c0_72 = arith.constant 0 : index
    %c0_73 = arith.constant 0 : index
    %81 = vector.load %arg6[%c0_72, %c0_73] : memref<64x128xf32, #tpu.memory_space<vmem>>, vector<64x128xf32>
    tpu.vector_store %arg6[%c0_72, %c0_73], %80 {strides = array<i32>} : memref<64x128xf32, #tpu.memory_space<vmem>>, vector<64x128xf32>,
    %cst_74 = arith.constant dense<0.000000e+00> : vector<128xf32>
    %82 = vector.multi_reduction <add>, %80, %cst_74 [0] : vector<64x128xf32> to vector<128xf32>
    %83 = vector.shape_cast %82 : vector<128xf32> to vector<1x128xf32>
    %84 = arith.addf %15, %83 : vector<1x128xf32>
    %85 = arith.mulf %80, %80 : vector<64x128xf32>
    %cst_75 = arith.constant dense<0.000000e+00> : vector<128xf32>
    %86 = vector.multi_reduction <add>, %85, %cst_75 [0] : vector<64x128xf32> to vector<128xf32>
    %87 = vector.shape_cast %86 : vector<128xf32> to vector<1x128xf32>
    %88 = arith.addf %16, %87 : vector<1x128xf32>
    %89 = tpu.iota {dimensions = array<i32: 0>} : vector<8x128xi32>
    %c0_i32 = arith.constant 0 : i32
    %90 = vector.broadcast %c0_i32 : i32 to vector<8x128xi32>
    %91 = arith.cmpi eq, %89, %90 : vector<8x128xi32>
    %c1_i32 = arith.constant 1 : i32
    %92 = vector.broadcast %c1_i32 : i32 to vector<8x128xi32>
    %93 = arith.cmpi eq, %89, %92 : vector<8x128xi32>
    %cst_76 = arith.constant 0.000000e+00 : f32
    %94 = vector.shape_cast %88 : vector<1x128xf32> to vector<1x128xf32>
    %95 = vector.broadcast %94 : vector<1x128xf32> to vector<8x128xf32>
    %96 = vector.broadcast %cst_76 : f32 to vector<8x128xf32>
    %97 = arith.select %93, %95, %96 : vector<8x128xi1>, vector<8x128xf32>
    %98 = vector.shape_cast %84 : vector<1x128xf32> to vector<1x128xf32>
    %99 = vector.broadcast %98 : vector<1x128xf32> to vector<8x128xf32>
    %100 = arith.select %91, %99, %97 : vector<8x128xi1>, vector<8x128xf32>
    %101 = vector.shape_cast %100 : vector<8x128xf32> to vector<1x8x128xf32>
    %c0_77 = arith.constant 0 : index
    %c0_78 = arith.constant 0 : index
    %c0_79 = arith.constant 0 : index
    %102 = vector.load %arg7[%c0_77, %c0_78, %c0_79] : memref<1x8x128xf32, #tpu.memory_space<vmem>>, vector<1x8x128xf32>
    tpu.vector_store %arg7[%c0_77, %c0_78, %c0_79], %101 {strides = array<i32>} : memref<1x8x128xf32, #tpu.memory_space<vmem>>, vector<1x8x128xf32>,
    return
  }
  func.func @transform_0(%arg0: i32, %arg1: i32) -> (i32, i32, i32, i32) {
    %c0_i32 = arith.constant 0 : i32
    %c0_i32_0 = arith.constant 0 : i32
    %c0_i32_1 = arith.constant 0 : i32
    %c0_i32_2 = arith.constant 0 : i32
    return %arg1, %c0_i32, %c0_i32_0, %c0_i32_1 : i32, i32, i32, i32
  }
  func.func @transform_1(%arg0: i32, %arg1: i32) -> (i32, i32) {
    %c0_i32 = arith.constant 0 : i32
    %c0_i32_0 = arith.constant 0 : i32
    %c0_i32_1 = arith.constant 0 : i32
    return %c0_i32, %c0_i32_0 : i32, i32
  }
  func.func @transform_2(%arg0: i32, %arg1: i32) -> (i32, i32) {
    %c0_i32 = arith.constant 0 : i32
    %c0_i32_0 = arith.constant 0 : i32
    %c0_i32_1 = arith.constant 0 : i32
    return %c0_i32, %c0_i32_0 : i32, i32
  }
  func.func @transform_3(%arg0: i32, %arg1: i32) -> (i32, i32, i32) {
    %c0_i32 = arith.constant 0 : i32
    %c0_i32_0 = arith.constant 0 : i32
    %c0_i32_1 = arith.constant 0 : i32
    return %c0_i32, %c0_i32_0, %arg0 : i32, i32, i32
  }
  func.func @transform_4(%arg0: i32, %arg1: i32) -> (i32, i32) {
    %c0_i32 = arith.constant 0 : i32
    return %arg1, %arg0 : i32, i32
  }
  func.func @transform_5(%arg0: i32, %arg1: i32) -> (i32, i32, i32) {
    %c0_i32 = arith.constant 0 : i32
    %c0_i32_0 = arith.constant 0 : i32
    return %arg1, %c0_i32, %arg0 : i32, i32, i32
  }
}

module attributes {stable_mosaic.version = 11 : i64} {
  func.func @kernel(%arg0: i32, %arg1: i32, %arg2: memref<1x9x9x128xbf16, #tpu.memory_space<vmem>>, %arg3: memref<1x128x128xbf16, #tpu.memory_space<vmem>>, %arg4: memref<64x128xf32, #tpu.memory_space<vmem>>, %arg5: memref<1x8x128xf32, #tpu.memory_space<vmem>>) attributes {dimension_semantics = [#tpu.dimension_semantics<parallel>, #tpu.dimension_semantics<parallel>], iteration_bounds = array<i64: 1, 2>, scalar_prefetch = 0 : i64, scratch_operands = 0 : i64, tpu.core_type = #tpu.core_type<tc>, window_params = [{transform_indices = @transform_0, window_bounds = array<i64: 1, 9, 9, 128>}, {transform_indices = @transform_1, window_bounds = array<i64: 1, 128, 128>}, {transform_indices = @transform_2, window_bounds = array<i64: 64, 128>}, {transform_indices = @transform_3, window_bounds = array<i64: 1, 8, 128>}]} {
    %cst = arith.constant 0.000000e+00 : f32
    %0 = vector.broadcast %cst : f32 to vector<1x128xf32>
    %cst_0 = arith.constant 0.000000e+00 : f32
    %1 = vector.broadcast %cst_0 : f32 to vector<1x128xf32>
    %cst_1 = arith.constant 0.000000e+00 : f32
    %2 = vector.broadcast %cst_1 : f32 to vector<64x128xf32>
    %c0 = arith.constant 0 : index
    %c0_2 = arith.constant 0 : index
    %c0_3 = arith.constant 0 : index
    %c0_4 = arith.constant 0 : index
    %3 = vector.load %arg2[%c0, %c0_2, %c0_3, %c0_4] : memref<1x9x9x128xbf16, #tpu.memory_space<vmem>>, vector<1x8x8x128xbf16>
    %4 = vector.shape_cast %3 : vector<1x8x8x128xbf16> to vector<8x8x128xbf16>
    %5 = vector.shape_cast %4 : vector<8x8x128xbf16> to vector<64x128xbf16>
    %c0_5 = arith.constant 0 : index
    %c0_6 = arith.constant 0 : index
    %c0_7 = arith.constant 0 : index
    %6 = vector.load %arg3[%c0_5, %c0_6, %c0_7] : memref<1x128x128xbf16, #tpu.memory_space<vmem>>, vector<1x128x128xbf16>
    %7 = vector.shape_cast %6 : vector<1x128x128xbf16> to vector<128x128xbf16>
    %cst_8 = arith.constant dense<0.000000e+00> : vector<64x128xf32>
    %8 = tpu.matmul %5, %7, %cst_8 {dimension_numbers = #tpu.dot_dimension_numbers<[1], [0], [0], [1], [0, 0, 1, 1], [], []>} : vector<64x128xbf16>, vector<128x128xbf16>, vector<64x128xf32> -> vector<64x128xf32>
    %9 = arith.addf %2, %8 : vector<64x128xf32>
    %c0_9 = arith.constant 0 : index
    %c0_10 = arith.constant 0 : index
    %10 = vector.load %arg4[%c0_9, %c0_10] : memref<64x128xf32, #tpu.memory_space<vmem>>, vector<64x128xf32>
    tpu.vector_store %arg4[%c0_9, %c0_10], %9 {strides = array<i32>} : memref<64x128xf32, #tpu.memory_space<vmem>>, vector<64x128xf32>,
    %cst_11 = arith.constant dense<0.000000e+00> : vector<128xf32>
    %11 = vector.multi_reduction <add>, %9, %cst_11 [0] : vector<64x128xf32> to vector<128xf32>
    %12 = vector.shape_cast %11 : vector<128xf32> to vector<1x128xf32>
    %13 = arith.addf %0, %12 : vector<1x128xf32>
    %14 = arith.mulf %9, %9 : vector<64x128xf32>
    %cst_12 = arith.constant dense<0.000000e+00> : vector<128xf32>
    %15 = vector.multi_reduction <add>, %14, %cst_12 [0] : vector<64x128xf32> to vector<128xf32>
    %16 = vector.shape_cast %15 : vector<128xf32> to vector<1x128xf32>
    %17 = arith.addf %1, %16 : vector<1x128xf32>
    %18 = tpu.iota {dimensions = array<i32: 0>} : vector<8x128xi32>
    %c0_i32 = arith.constant 0 : i32
    %19 = vector.broadcast %c0_i32 : i32 to vector<8x128xi32>
    %20 = arith.cmpi eq, %18, %19 : vector<8x128xi32>
    %c1_i32 = arith.constant 1 : i32
    %21 = vector.broadcast %c1_i32 : i32 to vector<8x128xi32>
    %22 = arith.cmpi eq, %18, %21 : vector<8x128xi32>
    %cst_13 = arith.constant 0.000000e+00 : f32
    %23 = vector.shape_cast %17 : vector<1x128xf32> to vector<1x128xf32>
    %24 = vector.broadcast %23 : vector<1x128xf32> to vector<8x128xf32>
    %25 = vector.broadcast %cst_13 : f32 to vector<8x128xf32>
    %26 = arith.select %22, %24, %25 : vector<8x128xi1>, vector<8x128xf32>
    %27 = vector.shape_cast %13 : vector<1x128xf32> to vector<1x128xf32>
    %28 = vector.broadcast %27 : vector<1x128xf32> to vector<8x128xf32>
    %29 = arith.select %20, %28, %26 : vector<8x128xi1>, vector<8x128xf32>
    %30 = vector.shape_cast %29 : vector<8x128xf32> to vector<1x8x128xf32>
    %c0_14 = arith.constant 0 : index
    %c0_15 = arith.constant 0 : index
    %c0_16 = arith.constant 0 : index
    %31 = vector.load %arg5[%c0_14, %c0_15, %c0_16] : memref<1x8x128xf32, #tpu.memory_space<vmem>>, vector<1x8x128xf32>
    tpu.vector_store %arg5[%c0_14, %c0_15, %c0_16], %30 {strides = array<i32>} : memref<1x8x128xf32, #tpu.memory_space<vmem>>, vector<1x8x128xf32>,
    return
  }
  func.func @transform_0(%arg0: i32, %arg1: i32) -> (i32, i32, i32, i32) {
    %c0_i32 = arith.constant 0 : i32
    %c0_i32_0 = arith.constant 0 : i32
    %c3_i32 = arith.constant 3 : i32
    %c0_i32_1 = arith.constant 0 : i32
    return %arg1, %c0_i32, %c0_i32_0, %c3_i32 : i32, i32, i32, i32
  }
  func.func @transform_1(%arg0: i32, %arg1: i32) -> (i32, i32, i32) {
    %c0_i32 = arith.constant 0 : i32
    %c0_i32_0 = arith.constant 0 : i32
    %c0_i32_1 = arith.constant 0 : i32
    return %c0_i32, %c0_i32_0, %arg0 : i32, i32, i32
  }
  func.func @transform_2(%arg0: i32, %arg1: i32) -> (i32, i32) {
    %c0_i32 = arith.constant 0 : i32
    return %arg1, %arg0 : i32, i32
  }
  func.func @transform_3(%arg0: i32, %arg1: i32) -> (i32, i32, i32) {
    %c0_i32 = arith.constant 0 : i32
    %c0_i32_0 = arith.constant 0 : i32
    return %arg1, %c0_i32, %arg0 : i32, i32, i32
  }
}

module attributes {stable_mosaic.version = 11 : i64} {
  func.func @kernel(%arg0: i32, %arg1: i32, %arg2: memref<128x128xf32, #tpu.memory_space<vmem>>, %arg3: memref<1x128xf32, #tpu.memory_space<vmem>>, %arg4: memref<1x128xf32, #tpu.memory_space<vmem>>, %arg5: memref<128x128xf32, #tpu.memory_space<vmem>>, %arg6: memref<1x128xf32, #tpu.memory_space<vmem>>, %arg7: memref<1x128xf32, #tpu.memory_space<vmem>>, %arg8: memref<128x128xf32, #tpu.memory_space<vmem>>) attributes {dimension_semantics = [#tpu.dimension_semantics<parallel>, #tpu.dimension_semantics<parallel>], iteration_bounds = array<i64: 1, 1>, scalar_prefetch = 0 : i64, scratch_operands = 0 : i64, tpu.core_type = #tpu.core_type<tc>, window_params = [{transform_indices = @transform_0, window_bounds = array<i64: 128, 128>}, {transform_indices = @transform_1, window_bounds = array<i64: 1, 128>}, {transform_indices = @transform_2, window_bounds = array<i64: 1, 128>}, {transform_indices = @transform_3, window_bounds = array<i64: 128, 128>}, {transform_indices = @transform_4, window_bounds = array<i64: 1, 128>}, {transform_indices = @transform_5, window_bounds = array<i64: 1, 128>}, {transform_indices = @transform_6, window_bounds = array<i64: 128, 128>}]} {
    %c0 = arith.constant 0 : index
    %c0_0 = arith.constant 0 : index
    %0 = vector.load %arg2[%c0, %c0_0] : memref<128x128xf32, #tpu.memory_space<vmem>>, vector<128x128xf32>
    %c0_1 = arith.constant 0 : index
    %c0_2 = arith.constant 0 : index
    %1 = vector.load %arg3[%c0_1, %c0_2] : memref<1x128xf32, #tpu.memory_space<vmem>>, vector<1x128xf32>
    %2 = vector.broadcast %1 : vector<1x128xf32> to vector<128x128xf32>
    %3 = arith.mulf %0, %2 : vector<128x128xf32>
    %c0_3 = arith.constant 0 : index
    %c0_4 = arith.constant 0 : index
    %4 = vector.load %arg4[%c0_3, %c0_4] : memref<1x128xf32, #tpu.memory_space<vmem>>, vector<1x128xf32>
    %5 = vector.broadcast %4 : vector<1x128xf32> to vector<128x128xf32>
    %6 = arith.addf %3, %5 : vector<128x128xf32>
    %c0_5 = arith.constant 0 : index
    %c0_6 = arith.constant 0 : index
    %7 = vector.load %arg5[%c0_5, %c0_6] : memref<128x128xf32, #tpu.memory_space<vmem>>, vector<128x128xf32>
    %c0_7 = arith.constant 0 : index
    %c0_8 = arith.constant 0 : index
    %8 = vector.load %arg6[%c0_7, %c0_8] : memref<1x128xf32, #tpu.memory_space<vmem>>, vector<1x128xf32>
    %9 = vector.broadcast %8 : vector<1x128xf32> to vector<128x128xf32>
    %10 = arith.mulf %7, %9 : vector<128x128xf32>
    %11 = arith.addf %6, %10 : vector<128x128xf32>
    %c0_9 = arith.constant 0 : index
    %c0_10 = arith.constant 0 : index
    %12 = vector.load %arg7[%c0_9, %c0_10] : memref<1x128xf32, #tpu.memory_space<vmem>>, vector<1x128xf32>
    %13 = vector.broadcast %12 : vector<1x128xf32> to vector<128x128xf32>
    %14 = arith.addf %11, %13 : vector<128x128xf32>
    %cst = arith.constant 0.000000e+00 : f32
    %15 = vector.broadcast %cst : f32 to vector<128x128xf32>
    %16 = arith.maximumf %14, %15 : vector<128x128xf32>
    %c0_11 = arith.constant 0 : index
    %c0_12 = arith.constant 0 : index
    %17 = vector.load %arg8[%c0_11, %c0_12] : memref<128x128xf32, #tpu.memory_space<vmem>>, vector<128x128xf32>
    tpu.vector_store %arg8[%c0_11, %c0_12], %16 {strides = array<i32>} : memref<128x128xf32, #tpu.memory_space<vmem>>, vector<128x128xf32>,
    return
  }
  func.func @transform_0(%arg0: i32, %arg1: i32) -> (i32, i32) {
    %c0_i32 = arith.constant 0 : i32
    return %arg0, %arg1 : i32, i32
  }
  func.func @transform_1(%arg0: i32, %arg1: i32) -> (i32, i32) {
    %c0_i32 = arith.constant 0 : i32
    %c0_i32_0 = arith.constant 0 : i32
    return %c0_i32, %arg1 : i32, i32
  }
  func.func @transform_2(%arg0: i32, %arg1: i32) -> (i32, i32) {
    %c0_i32 = arith.constant 0 : i32
    %c0_i32_0 = arith.constant 0 : i32
    return %c0_i32, %arg1 : i32, i32
  }
  func.func @transform_3(%arg0: i32, %arg1: i32) -> (i32, i32) {
    %c0_i32 = arith.constant 0 : i32
    return %arg0, %arg1 : i32, i32
  }
  func.func @transform_4(%arg0: i32, %arg1: i32) -> (i32, i32) {
    %c0_i32 = arith.constant 0 : i32
    %c0_i32_0 = arith.constant 0 : i32
    return %c0_i32, %arg1 : i32, i32
  }
  func.func @transform_5(%arg0: i32, %arg1: i32) -> (i32, i32) {
    %c0_i32 = arith.constant 0 : i32
    %c0_i32_0 = arith.constant 0 : i32
    return %c0_i32, %arg1 : i32, i32
  }
  func.func @transform_6(%arg0: i32, %arg1: i32) -> (i32, i32) {
    %c0_i32 = arith.constant 0 : i32
    return %arg0, %arg1 : i32, i32
  }
}

</mosaic_0001>

<bundles_post_ra>
// kernel: basic_block_forward.6
= control target key start
LH: loop header
LB: loop body
LE: loop exit
PB: predicated region body
PF: predicated region fallthrough
CT: control target
= control target key end

     0   :  { %s899_s12 = smov 0   ;;  %s901_s13 = smov 0   ;;  %s1033_s0 = inlined_call_operand.vmem [shape: bf16[2,9,9,512], index: 0, kind: input, shape index: {}]   ;;  %s1034_s1 = inlined_call_operand.vmem [shape: bf16[1,128,128], index: 1, kind: input, shape index: {}]   ;;  %s1035_s2 = inlined_call_operand.vmem [shape: f32[128,128], index: 2, kind: output, shape index: {0}]   ;;  %s1036_s3 = inlined_call_operand.vmem [shape: f32[2,8,128], index: 3, kind: output, shape index: {1}]  }
   0x1   :  { %s903_s14 = smov 0   ;;  %s905_s15 = smov 0  }
   0x2   :  { %s907_s16 = smov 0  }
   0x3 LB: > { %s23_s17 = sadd.s32 1, %s873_s15  ;;  %p40_p1 = scmp.ne.s32.totalorder %s865_s13, %s861_s12  ;;  %s877_s16 = sphi %s907_s16, %s14_s16   ;;  %s873_s15 = sphi %s905_s15, %s1040_s15   ;;  %s869_s14 = sphi %s903_s14, %s1039_s14   ;;  %s865_s13 = sphi %s901_s13, %s1038_s13   ;;  %s861_s12 = sphi %s899_s12, %s1037_s12  }
   0x4   : > { %p24_p0 = scmp.ge.s32.totalorder %s23_s17, 2  ;;  %p41_p2 = scmp.eq.s32.totalorder %s877_s16, 0 }
   0x5   : > { %s33_s19 = sadd.s32 1, %s865_s13  ;;  %p695_p5 = scmp.ge.s32.totalorder %s877_s16, 2 }
   0x6   : > { %s1042_s17 = smov (%p24_p0, %s23_s17), 0  ;;  %p42_p3 = por %p41_p2, %p40_p1 }
   0x7   : > { %s30_s18 = ssub.s32 %s873_s15, %s1042_s17  ;;  %155 = sbr.rel (%p695_p5) target bundleno = 31 (0x1f), region = 20 }
   0x8   : > { %p31_p4 = scmp.eq.s32.totalorder %s30_s18, 0 }
   0xa   : > { %s934_s20 = scalar_select %p31_p4, %s865_s13, %s33_s19  }
   0xe   : > { %158 = sbr.rel (!%p42_p3) target bundleno = 31 (0x1f), region = 24  ;;  %s160_s21 = sand.u32 (%p42_p3), 1, %s865_s13  }
   0xf   : > { %s696_s22 = smul.u32 (%p42_p3), 288, %s873_s15 }
  0x10   : > { %s785_s23 = smul.u32 (%p42_p3), 72, %s160_s21 }
  0x11   : > { %s942_s26 = scalar_lea.vmem (%p42_p3), %s1033_s0, %s696_s22 }
  0x12   : > { %v697_v0 = vld [vmem:[%s942_s26 + $0xc] sm:$0xf] (%p42_p3)  ;;  %v698_v1 = vld [vmem:[%s942_s26 + $0x1c] sm:$0xf] (%p42_p3)  ;;  %s946_s27 = scalar_lea.vmem (%p42_p3), [#allocation2], %s785_s23 }
  0x13   : > { %183 = vst [vmem:[%s946_s27] sm:$0xf] (%p42_p3), %v697_v0  ;;  %185 = vst [vmem:[%s946_s27 + $0x4] sm:$0xf] (%p42_p3), %v698_v1  ;;  %v699_v2 = vld [vmem:[%s942_s26 + $0x2c] sm:$0xf] (%p42_p3) }
  0x14   : > { %v700_v3 = vld [vmem:[%s942_s26 + $0x3c] sm:$0xf] (%p42_p3)  ;;  %v701_v4 = vld [vmem:[%s942_s26 + $0x4c] sm:$0xf] (%p42_p3)  ;;  %187 = vst [vmem:[%s946_s27 + $0x8] sm:$0xf] (%p42_p3), %v699_v2 }
  0x15   : > { %189 = vst [vmem:[%s946_s27 + $0xc] sm:$0xf] %v700_v3  ;;  %191 = vst [vmem:[%s946_s27 + $0x10] sm:$0xf] %v701_v4  ;;  %v702_v5 = vld [vmem:[%s942_s26 + $0x5c] sm:$0xf] }
  0x16   : > { %v703_v6 = vld [vmem:[%s942_s26 + $0x6c] sm:$0xf]  ;;  %v704_v7 = vld [vmem:[%s942_s26 + $0x7c] sm:$0xf]  ;;  %193 = vst [vmem:[%s946_s27 + $0x14] sm:$0xf] %v702_v5 }
  0x17   : > { %195 = vst [vmem:[%s946_s27 + $0x18] sm:$0xf] %v703_v6  ;;  %197 = vst [vmem:[%s946_s27 + $0x1c] sm:$0xf] %v704_v7  ;;  %v705_v8 = vld [vmem:[%s942_s26 + $0x8c] sm:$0xf] }
  0x18   : > { %v706_v9 = vld [vmem:[%s942_s26 + $0x9c] sm:$0xf]  ;;  %v707_v10 = vld [vmem:[%s942_s26 + $0xac] sm:$0xf]  ;;  %199 = vst [vmem:[%s946_s27 + $0x20] sm:$0xf] %v705_v8 }
  0x19   : > { %201 = vst [vmem:[%s946_s27 + $0x24] sm:$0xf] %v706_v9  ;;  %203 = vst [vmem:[%s946_s27 + $0x28] sm:$0xf] %v707_v10  ;;  %v708_v11 = vld [vmem:[%s942_s26 + $0xbc] sm:$0xf] }
  0x1a   : > { %v709_v12 = vld [vmem:[%s942_s26 + $0xcc] sm:$0xf]  ;;  %v710_v13 = vld [vmem:[%s942_s26 + $0xdc] sm:$0xf]  ;;  %205 = vst [vmem:[%s946_s27 + $0x2c] sm:$0xf] %v708_v11 }
  0x1b   : > { %207 = vst [vmem:[%s946_s27 + $0x30] sm:$0xf] %v709_v12  ;;  %209 = vst [vmem:[%s946_s27 + $0x34] sm:$0xf] %v710_v13  ;;  %v711_v14 = vld [vmem:[%s942_s26 + $0xec] sm:$0xf] }
  0x1c   : > { %v712_v15 = vld [vmem:[%s942_s26 + $0xfc] sm:$0xf]  ;;  %v713_v16 = vld [vmem:[%s942_s26 + $0x10c] sm:$0xf]  ;;  %211 = vst [vmem:[%s946_s27 + $0x38] sm:$0xf] %v711_v14 }
  0x1d   : > { %213 = vst [vmem:[%s946_s27 + $0x3c] sm:$0xf] %v712_v15  ;;  %215 = vst [vmem:[%s946_s27 + $0x40] sm:$0xf] %v713_v16  ;;  %v714_v17 = vld [vmem:[%s942_s26 + $0x11c] sm:$0xf] }
  0x1e   : > { %217 = vst [vmem:[%s946_s27 + $0x44] sm:$0xf] %v714_v17 }
  0x1f PF: > { %p715_p6 = scmp.ge.s32.totalorder %s877_s16, 1  ;;  %p275_p7 = scmp.lt.s32.totalorder %s877_s16, 3 }
  0x21   : > { %p276_p8 = pnand %p715_p6, %p275_p7 }
  0x22   : > { %v827_v18 = vld [vmem:[%s1034_s1] sm:$0xff] (!%p276_p8)   ;;  %s282_s30 = sand.u32 (!%p276_p8), 1, %s861_s12   ;;  %v828_v19 = vld [vmem:[%s1034_s1 + $0x8] sm:$0xff] (!%p276_p8)   ;;  %v829_v20 = vld [vmem:[%s1034_s1 + $0x10] sm:$0xff] (!%p276_p8)   ;;  %s716_s26 = sshll.u32 (!%p276_p8), %s869_s14, 3  ;;  %v545_v63 = vlaneseq (!%p276_p8) }
  0x23   : > { %279 = sbr.rel (%p276_p8) target bundleno = 313 (0x139), region = 65  ;;  %745 = vmatprep.subr.bf16.mxu0 (!%p276_p8), %v827_v18  ;;  %769 = vmatprep.subr.bf16.mxu1 (!%p276_p8), %v827_v18  ;;  %v830_v21 = vld [vmem:[%s1034_s1 + $0x18] sm:$0xff] (!%p276_p8)   ;;  %v831_v24 = vld [vmem:[%s1034_s1 + $0x20] sm:$0xff] (!%p276_p8)   ;;  %v832_v25 = vld [vmem:[%s1034_s1 + $0x28] sm:$0xff] (!%p276_p8)   ;;  %p324_p9 = scmp.lt.s32.totalorder (!%p276_p8), %s716_s26, 15 }
  0x24   : > { %s786_s6 = smul.u32 (!%p276_p8), 72, %s282_s30  ;;  %746 = vmatpush3.bf16.msra.mxu0 (!%p276_p8), %v827_v18  ;;  %777 = vmatpush3.bf16.msra.mxu1 (!%p276_p8), %v827_v18  ;;  %v833_v26 = vld [vmem:[%s1034_s1 + $0x30] sm:$0xff] (!%p276_p8)   ;;  %v834_v27 = vld [vmem:[%s1034_s1 + $0x38] sm:$0xff] (!%p276_p8)   ;;  %p332_p10 = scmp.lt.s32.totalorder (!%p276_p8), %s869_s14, 1  ;;  %v546_v4 = vshrl.u32 (!%p276_p8), %v545_v63, 7 }
  0x25   : > { %747 = vmatprep.subr.bf16.mxu0 (!%p276_p8), %v828_v19  ;;  %770 = vmatprep.subr.bf16.mxu1 (!%p276_p8), %v828_v19 }
  0x26   : > { %s284_s11 = scalar_lea.vmem (!%p276_p8), [#allocation2], %s786_s6  ;;  %vm548_vm0 = vcmp.eq.s32.totalorder (!%p276_p8), %v546_v4, 1  ;;  %vm547_vm1 = vcmp.eq.s32.totalorder (!%p276_p8), %v546_v4, 0 }
  0x27   : > { %v835_v22 = vld [vmem:[%s284_s11] ss:$8 sps:$4 sm:$0xff] (!%p276_p8)   ;;  %v836_v28 = vld [vmem:[%s284_s11 + $0x10] ss:$8 sps:$4 sm:$0xff] (!%p276_p8)  }
  0x28   : > { %748 = vmatpush3.bf16.msra.mxu0 (!%p276_p8), %v828_v19  ;;  %778 = vmatpush3.bf16.msra.mxu1 (!%p276_p8), %v828_v19  ;;  %v837_v23 = vld [vmem:[%s284_s11 + $0x20] ss:$8 sps:$4 sm:$0xff] (!%p276_p8)   ;;  %v838_v29 = vld [vmem:[%s284_s11 + $0x30] ss:$8 sps:$4 sm:$0xff] (!%p276_p8)  }
  0x29   : > { %749 = vmatprep.subr.bf16.mxu0 (!%p276_p8), %v829_v20  ;;  %771 = vmatprep.subr.bf16.mxu1 (!%p276_p8), %v829_v20 }
  0x2a   : > { %761 = vmatprep.mubr.bf16.mxu0 %v835_v22  ;;  %765 = vmatprep.mubr.bf16.mxu1 %v837_v23  ;;  %s1044_s26 = smov (!%p324_p9, %s716_s26), 15  ;;  %s1046_s14 = smov (!%p332_p10, %s869_s14), 1 }
  0x2b   : > { %s717_s27 = sshll.u32 %s1044_s26, 3  ;;  %s718_s4 = sshll.u32 %s1046_s14, 3 }
  0x2c   : > { %750 = vmatpush3.bf16.msra.mxu0 %v829_v20  ;;  %779 = vmatpush3.bf16.msra.mxu1 %v829_v20  ;;  %s330_s30 = scalar_lea.vmem %s1035_s2, %s717_s27  ;;  %s338_s7 = scalar_lea.vmem %s1036_s3, %s718_s4 }
  0x2d   : > { %751 = vmatprep.subr.bf16.mxu0 %v830_v21  ;;  %772 = vmatprep.subr.bf16.mxu1 %v830_v21 }
  0x30   : > { %752 = vmatpush3.bf16.msra.mxu0 %v830_v21  ;;  %780 = vmatpush3.bf16.msra.mxu1 %v830_v21 }
  0x31   : > { %753 = vmatprep.subr.bf16.mxu0 %v831_v24  ;;  %773 = vmatprep.subr.bf16.mxu1 %v831_v24 }
  0x34   : > { %754 = vmatpush3.bf16.msra.mxu0 %v831_v24  ;;  %781 = vmatpush3.bf16.msra.mxu1 %v831_v24 }
  0x35   : > { %755 = vmatprep.subr.bf16.mxu0 %v832_v25  ;;  %774 = vmatprep.subr.bf16.mxu1 %v832_v25 }
  0x38   : > { %756 = vmatpush3.bf16.msra.mxu0 %v832_v25  ;;  %782 = vmatpush3.bf16.msra.mxu1 %v832_v25 }
  0x39   : > { %757 = vmatprep.subr.bf16.mxu0 %v833_v26  ;;  %775 = vmatprep.subr.bf16.mxu1 %v833_v26 }
  0x3c   : > { %758 = vmatpush3.bf16.msra.mxu0 %v833_v26  ;;  %783 = vmatpush3.bf16.msra.mxu1 %v833_v26 }
  0x3d   : > { %759 = vmatprep.subr.bf16.mxu0 %v834_v27  ;;  %776 = vmatprep.subr.bf16.mxu1 %v834_v27 }
  0x40   : > { %760 = vmatpush3.bf16.msra.mxu0 %v834_v27  ;;  %784 = vmatpush3.bf16.msra.mxu1 %v834_v27 }
  0x43   : > { %762 = vmatmul.mubr.bf16.vlgmr.msra.gmra.mrb[0].mxu0 %v836_v28  ;;  %766 = vmatmul.mubr.bf16.vlgmr.msra.gmra.mrb[0].mxu1 %v838_v29 }
 0x116   : > { %v763_v30 = vpop.f32.mrb[0].mxu0  ;;  %v767_v31 = vpop.f32.mrb[0].mxu1 }
 0x117   : > { %503 = vst [vmem:[%s330_s30 + $0x10] sm:$0xff] %v763_v30  ;;  %v470_v32 = vpop.f32.mrb[1].mxu0  ;;  %507 = vst [vmem:[%s330_s30 + $0x30] sm:$0xff] %v767_v31  ;;  %v486_v33 = vpop.f32.mrb[1].mxu1  ;;  %v525_v41 = vmul.f32 %v763_v30, %v763_v30  ;;  %v529_v53 = vmul.f32 %v767_v31, %v767_v31 }
 0x118   : > { %501 = vst [vmem:[%s330_s30] sm:$0xff] %v470_v32  ;;  %v764_v34 = vpop.f32.mrb[2].mxu0  ;;  %505 = vst [vmem:[%s330_s30 + $0x20] sm:$0xff] %v486_v33  ;;  %v768_v35 = vpop.f32.mrb[2].mxu1  ;;  %v523_v38 = vmul.f32 %v470_v32, %v470_v32  ;;  %v527_v47 = vmul.f32 %v486_v33, %v486_v33 }
 0x119   : > { %504 = vst [vmem:[%s330_s30 + $0x18] sm:$0xff] %v764_v34  ;;  %v473_v36 = vpop.f32.mrb[3].mxu0  ;;  %508 = vst [vmem:[%s330_s30 + $0x38] sm:$0xff] %v768_v35  ;;  %v489_v37 = vpop.f32.mrb[3].mxu1  ;;  %v526_v44 = vmul.f32 %v764_v34, %v764_v34  ;;  %v530_v56 = vmul.f32 %v768_v35, %v768_v35 }
 0x11a   : > { %502 = vst [vmem:[%s330_s30 + $0x8] sm:$0xff] %v473_v36  ;;  %v509_v39 = vadd.f32 %v473_v36, %v470_v32  ;;  %v524_v40 = vmul.f32 %v473_v36, %v473_v36  ;;  %506 = vst [vmem:[%s330_s30 + $0x28] sm:$0xff] %v489_v37  ;;  %v528_v52 = vmul.f32 %v489_v37, %v489_v37 }
 0x11c   : > { %v510_v42 = vadd.f32 %v763_v30, %v509_v39  ;;  %v531_v43 = vadd.f32 %v524_v40, %v523_v38 }
 0x11e   : > { %v532_v45 = vadd.f32 %v531_v43, %v525_v41  ;;  %v511_v46 = vadd.f32 %v764_v34, %v510_v42 }
 0x120   : > { %v512_v48 = vadd.f32 %v511_v46, %v486_v33  ;;  %v533_v49 = vadd.f32 %v532_v45, %v526_v44 }
 0x122   : > { %v534_v50 = vadd.f32 %v533_v49, %v527_v47  ;;  %v513_v51 = vadd.f32 %v512_v48, %v489_v37 }
 0x124   : > { %v514_v54 = vadd.f32 %v767_v31, %v513_v51  ;;  %v535_v55 = vadd.f32 %v534_v50, %v528_v52 }
 0x126   : > { %v515_v57 = vadd.f32 %v768_v35, %v514_v54  ;;  %v536_v58 = vadd.f32 %v535_v55, %v529_v53 }
 0x128   : > { %v516_v59 = vrot.slane %v515_v57, 4  ;;  %v537_v60 = vadd.f32 %v536_v58, %v530_v56 }
 0x12a   : > { %v517_v61 = vadd.f32 %v516_v59, %v515_v57  ;;  %v538_v62 = vrot.slane %v537_v60, 4 }
 0x12c   : > { %v518_v0 = vrot.slane %v517_v61, 2  ;;  %v539_v1 = vadd.f32 %v538_v62, %v537_v60 }
 0x12e   : > { %v519_v2 = vadd.f32 %v518_v0, %v517_v61  ;;  %v540_v3 = vrot.slane %v539_v1, 2 }
 0x130   : > { %v541_v5 = vadd.f32 %v540_v3, %v539_v1  ;;  %v520_v6 = vrot.slane %v519_v2, 1 }
 0x132   : > { %v542_v7 = vrot.slane %v541_v5, 1  ;;  %v521_v9 = vadd.f32 %v520_v6, %v519_v2 }
 0x134   : > { %v543_v8 = vadd.f32 %v542_v7, %v541_v5 }
 0x136   : > { %v549_v10 = vsel %vm548_vm0, %v543_v8, 0.0 }
 0x137   : > { %v550_v11 = vsel %vm547_vm1, %v521_v9, %v549_v10 }
 0x138   : > { %551 = vst [vmem:[%s338_s7] sm:$0xff] %v550_v11 }
 0x139 PF: > { %s14_s16 = sadd.s32 1, %s877_s16   ;;  %s1037_s12 = smov %s865_s13 }
 0x13a   : > { %p11_p11 = scmp.ge.s32.totalorder %s14_s16, 4   ;;  %s1038_s13 = smov %s934_s20 }
 0x13b   : > { %s1039_s14 = smov %s873_s15  ;;  %s1040_s15 = smov %s1042_s17 }
 0x13c   :  { %13 = sbr.rel (!%p11_p11) target bundleno = 3 (0x3), region = 119 }

// kernel: basic_block_forward.7
= control target key start
LH: loop header
LB: loop body
LE: loop exit
PB: predicated region body
PF: predicated region fallthrough
CT: control target
= control target key end

     0   :  { %s466_s0 = inlined_call_operand.vmem [shape: f32[128,128], index: 0, kind: input, shape index: {}]   ;;  %s467_s1 = inlined_call_operand.vmem [shape: f32[1,128], index: 1, kind: input, shape index: {}]   ;;  %s468_s2 = inlined_call_operand.vmem [shape: f32[1,128], index: 2, kind: input, shape index: {}]   ;;  %s469_s3 = inlined_call_operand.vmem [shape: f32[128,128], index: 3, kind: input, shape index: {}]   ;;  %s470_s4 = inlined_call_operand.vmem [shape: f32[1,128], index: 4, kind: input, shape index: {}]   ;;  %s471_s5 = inlined_call_operand.vmem [shape: f32[1,128], index: 5, kind: input, shape index: {}]   ;;  %s472_s6 = inlined_call_operand.vmem [shape: f32[128,128], index: 6, kind: output, shape index: {}]  }
   0x1   :  { %v23_v0 = vld [vmem:[%s466_s0] sm:$0xff]  ;;  %v24_v8 = vld [vmem:[%s466_s0 + $0x8] sm:$0xff]  ;;  %v25_v10 = vld [vmem:[%s466_s0 + $0x10] sm:$0xff] }
   0x2   :  { %v244_v1 = vld [vmem:[%s467_s1] ss:$0 sm:$0xff]  ;;  %v86_v9 = vld [vmem:[%s469_s3 + $0x8] sm:$0xff]  ;;  %v87_v15 = vld [vmem:[%s469_s3 + $0x10] sm:$0xff] }
   0x3   :  { %v249_v2 = vld [vmem:[%s468_s2] ss:$0 sm:$0xff]  ;;  %v46_v3 = vmul.f32 %v244_v1, %v23_v0  ;;  %v47_v12 = vmul.f32 %v244_v1, %v24_v8  ;;  %v48_v14 = vmul.f32 %v244_v1, %v25_v10  ;;  %v26_v16 = vld [vmem:[%s466_s0 + $0x18] sm:$0xff]  ;;  %v28_v23 = vld [vmem:[%s466_s0 + $0x28] sm:$0xff] }
   0x4   :  { %v85_v4 = vld [vmem:[%s469_s3] sm:$0xff]  ;;  %v88_v17 = vld [vmem:[%s469_s3 + $0x18] sm:$0xff]  ;;  %v49_v19 = vmul.f32 %v244_v1, %v26_v16  ;;  %v90_v28 = vld [vmem:[%s469_s3 + $0x28] sm:$0xff]  ;;  %v51_v33 = vmul.f32 %v244_v1, %v28_v23 }
   0x5   :  { %v258_v5 = vld [vmem:[%s470_s4] ss:$0 sm:$0xff]  ;;  %v69_v11 = vadd.f32 %v249_v2, %v46_v3  ;;  %v70_v25 = vadd.f32 %v249_v2, %v47_v12  ;;  %v71_v26 = vadd.f32 %v249_v2, %v48_v14  ;;  %v29_v29 = vld [vmem:[%s466_s0 + $0x30] sm:$0xff]  ;;  %v30_v39 = vld [vmem:[%s466_s0 + $0x38] sm:$0xff] }
   0x6   :  { %v108_v6 = vmul.f32 %v258_v5, %v85_v4  ;;  %v264_v7 = vld [vmem:[%s471_s5] ss:$0 sm:$0xff]  ;;  %v109_v13 = vmul.f32 %v258_v5, %v86_v9  ;;  %v110_v18 = vmul.f32 %v258_v5, %v87_v15  ;;  %v111_v20 = vmul.f32 %v258_v5, %v88_v17  ;;  %v91_v30 = vld [vmem:[%s469_s3 + $0x30] sm:$0xff]  ;;  %v92_v44 = vld [vmem:[%s469_s3 + $0x38] sm:$0xff] }
   0x7   :  { %v27_v21 = vld [vmem:[%s466_s0 + $0x20] sm:$0xff]  ;;  %v72_v31 = vadd.f32 %v249_v2, %v49_v19  ;;  %v113_v34 = vmul.f32 %v258_v5, %v90_v28  ;;  %v74_v41 = vadd.f32 %v249_v2, %v51_v33  ;;  %v52_v42 = vmul.f32 %v244_v1, %v29_v29  ;;  %v32_v55 = vld [vmem:[%s466_s0 + $0x48] sm:$0xff]  ;;  %v33_v3 = vld [vmem:[%s466_s0 + $0x50] sm:$0xff] }
   0x8   :  { %v89_v22 = vld [vmem:[%s469_s3 + $0x20] sm:$0xff]  ;;  %v124_v24 = vadd.f32 %v108_v6, %v69_v11  ;;  %v50_v27 = vmul.f32 %v244_v1, %v27_v21  ;;  %v125_v36 = vadd.f32 %v109_v13, %v70_v25  ;;  %v126_v37 = vadd.f32 %v110_v18, %v71_v26  ;;  %v94_v60 = vld [vmem:[%s469_s3 + $0x48] sm:$0xff]  ;;  %v95_v4 = vld [vmem:[%s469_s3 + $0x50] sm:$0xff] }
   0x9   :  { %v112_v32 = vmul.f32 %v258_v5, %v89_v22  ;;  %v127_v40 = vadd.f32 %v111_v20, %v72_v31  ;;  %v114_v43 = vmul.f32 %v258_v5, %v91_v30  ;;  %v129_v50 = vadd.f32 %v113_v34, %v74_v41  ;;  %v31_v53 = vld [vmem:[%s466_s0 + $0x40] sm:$0xff]  ;;  %v34_v11 = vld [vmem:[%s466_s0 + $0x58] sm:$0xff]  ;;  %v36_v23 = vld [vmem:[%s466_s0 + $0x68] sm:$0xff] }
   0xa   :  { %v147_v35 = vadd.f32 %v264_v7, %v124_v24  ;;  %v73_v38 = vadd.f32 %v249_v2, %v50_v27  ;;  %v148_v46 = vadd.f32 %v264_v7, %v125_v36  ;;  %v149_v47 = vadd.f32 %v264_v7, %v126_v37  ;;  %v93_v54 = vld [vmem:[%s469_s3 + $0x40] sm:$0xff]  ;;  %v96_v12 = vld [vmem:[%s469_s3 + $0x58] sm:$0xff]  ;;  %v37_v33 = vld [vmem:[%s466_s0 + $0x70] sm:$0xff] }
   0xb   :  { %v150_v49 = vadd.f32 %v264_v7, %v127_v40  ;;  %v75_v51 = vadd.f32 %v249_v2, %v52_v42  ;;  %v53_v52 = vmul.f32 %v244_v1, %v30_v39  ;;  %v115_v59 = vmul.f32 %v258_v5, %v92_v44  ;;  %v35_v17 = vld [vmem:[%s466_s0 + $0x60] sm:$0xff]  ;;  %v99_v42 = vld [vmem:[%s469_s3 + $0x70] sm:$0xff] }
   0xc   :  { %v163_v45 = vmax.f32 %v147_v35, 0.0  ;;  %v128_v48 = vadd.f32 %v112_v32, %v73_v38  ;;  %v164_v56 = vmax.f32 %v148_v46, 0.0  ;;  %v165_v57 = vmax.f32 %v149_v47, 0.0  ;;  %v97_v22 = vld [vmem:[%s469_s3 + $0x60] sm:$0xff]  ;;  %v98_v32 = vld [vmem:[%s469_s3 + $0x68] sm:$0xff]  ;;  %v38_v47 = vld [vmem:[%s466_s0 + $0x78] sm:$0xff] }
   0xd   :  { %v166_v61 = vmax.f32 %v150_v49, 0.0  ;;  %v152_v62 = vadd.f32 %v264_v7, %v129_v50  ;;  %v130_v63 = vadd.f32 %v114_v43, %v75_v51  ;;  %v76_v0 = vadd.f32 %v249_v2, %v53_v52 }
   0xe   :  { %179 = vst [vmem:[%s472_s6] sm:$0xff] %v163_v45  ;;  %v151_v58 = vadd.f32 %v264_v7, %v128_v48  ;;  %180 = vst [vmem:[%s472_s6 + $0x8] sm:$0xff] %v164_v56  ;;  %v54_v8 = vmul.f32 %v244_v1, %v31_v53  ;;  %v116_v9 = vmul.f32 %v258_v5, %v93_v54  ;;  %v100_v48 = vld [vmem:[%s469_s3 + $0x78] sm:$0xff] }
   0xf   :  { %181 = vst [vmem:[%s472_s6 + $0x10] sm:$0xff] %v165_v57  ;;  %v55_v10 = vmul.f32 %v244_v1, %v32_v55  ;;  %182 = vst [vmem:[%s472_s6 + $0x18] sm:$0xff] %v166_v61  ;;  %v168_v13 = vmax.f32 %v152_v62, 0.0  ;;  %v153_v14 = vadd.f32 %v264_v7, %v130_v63  ;;  %v131_v15 = vadd.f32 %v115_v59, %v76_v0 }
  0x10   :  { %v167_v6 = vmax.f32 %v151_v58, 0.0  ;;  %v117_v16 = vmul.f32 %v258_v5, %v94_v60  ;;  %v77_v18 = vadd.f32 %v249_v2, %v54_v8  ;;  %v56_v20 = vmul.f32 %v244_v1, %v33_v3 }
  0x11   :  { %v78_v19 = vadd.f32 %v249_v2, %v55_v10  ;;  %v118_v21 = vmul.f32 %v258_v5, %v95_v4  ;;  %184 = vst [vmem:[%s472_s6 + $0x28] sm:$0xff] %v168_v13  ;;  %v169_v24 = vmax.f32 %v153_v14, 0.0  ;;  %v154_v25 = vadd.f32 %v264_v7, %v131_v15 }
  0x12   :  { %183 = vst [vmem:[%s472_s6 + $0x20] sm:$0xff] %v167_v6  ;;  %v57_v26 = vmul.f32 %v244_v1, %v34_v11  ;;  %v119_v27 = vmul.f32 %v258_v5, %v96_v12  ;;  %v132_v28 = vadd.f32 %v116_v9, %v77_v18  ;;  %v79_v30 = vadd.f32 %v249_v2, %v56_v20 }
  0x13   :  { %v133_v29 = vadd.f32 %v117_v16, %v78_v19  ;;  %v58_v31 = vmul.f32 %v244_v1, %v35_v17  ;;  %185 = vst [vmem:[%s472_s6 + $0x30] sm:$0xff] %v169_v24  ;;  %v170_v34 = vmax.f32 %v154_v25, 0.0  ;;  %v120_v36 = vmul.f32 %v258_v5, %v97_v22 }
  0x14   :  { %v80_v35 = vadd.f32 %v249_v2, %v57_v26  ;;  %v59_v37 = vmul.f32 %v244_v1, %v36_v23  ;;  %v155_v38 = vadd.f32 %v264_v7, %v132_v28  ;;  %v134_v40 = vadd.f32 %v118_v21, %v79_v30 }
  0x15   :  { %v156_v39 = vadd.f32 %v264_v7, %v133_v29  ;;  %v81_v41 = vadd.f32 %v249_v2, %v58_v31  ;;  %186 = vst [vmem:[%s472_s6 + $0x38] sm:$0xff] %v170_v34  ;;  %v121_v45 = vmul.f32 %v258_v5, %v98_v32  ;;  %v60_v46 = vmul.f32 %v244_v1, %v37_v33 }
  0x16   :  { %v135_v43 = vadd.f32 %v119_v27, %v80_v35  ;;  %v82_v44 = vadd.f32 %v249_v2, %v59_v37  ;;  %v171_v49 = vmax.f32 %v155_v38, 0.0  ;;  %v157_v51 = vadd.f32 %v264_v7, %v134_v40 }
  0x17   :  { %v172_v50 = vmax.f32 %v156_v39, 0.0  ;;  %v136_v52 = vadd.f32 %v120_v36, %v81_v41  ;;  %v83_v55 = vadd.f32 %v249_v2, %v60_v46  ;;  %v122_v56 = vmul.f32 %v258_v5, %v99_v42 }
  0x18   :  { %v158_v53 = vadd.f32 %v264_v7, %v135_v43  ;;  %v137_v54 = vadd.f32 %v121_v45, %v82_v44  ;;  %187 = vst [vmem:[%s472_s6 + $0x40] sm:$0xff] %v171_v49  ;;  %v173_v57 = vmax.f32 %v157_v51, 0.0  ;;  %v61_v59 = vmul.f32 %v244_v1, %v38_v47 }
  0x19   :  { %188 = vst [vmem:[%s472_s6 + $0x48] sm:$0xff] %v172_v50  ;;  %v159_v58 = vadd.f32 %v264_v7, %v136_v52  ;;  %v123_v60 = vmul.f32 %v258_v5, %v100_v48  ;;  %v138_v63 = vadd.f32 %v122_v56, %v83_v55 }
  0x1a   :  { %v174_v61 = vmax.f32 %v158_v53, 0.0  ;;  %v160_v62 = vadd.f32 %v264_v7, %v137_v54  ;;  %189 = vst [vmem:[%s472_s6 + $0x50] sm:$0xff] %v173_v57  ;;  %v84_v3 = vadd.f32 %v249_v2, %v61_v59 }
  0x1b   :  { %v175_v0 = vmax.f32 %v159_v58, 0.0  ;;  %v161_v1 = vadd.f32 %v264_v7, %v138_v63 }
  0x1c   :  { %190 = vst [vmem:[%s472_s6 + $0x58] sm:$0xff] %v174_v61  ;;  %v176_v4 = vmax.f32 %v160_v62, 0.0  ;;  %v139_v5 = vadd.f32 %v123_v60, %v84_v3 }
  0x1d   :  { %191 = vst [vmem:[%s472_s6 + $0x60] sm:$0xff] %v175_v0  ;;  %v177_v6 = vmax.f32 %v161_v1, 0.0 }
  0x1e   :  { %192 = vst [vmem:[%s472_s6 + $0x68] sm:$0xff] %v176_v4  ;;  %v162_v8 = vadd.f32 %v264_v7, %v139_v5 }
  0x1f   :  { %193 = vst [vmem:[%s472_s6 + $0x70] sm:$0xff] %v177_v6 }
  0x20   :  { %v178_v2 = vmax.f32 %v162_v8, 0.0 }
  0x22   :  { %194 = vst [vmem:[%s472_s6 + $0x78] sm:$0xff] %v178_v2 }

// kernel: basic_block_forward.4
= control target key start
LH: loop header
LB: loop body
LE: loop exit
PB: predicated region body
PF: predicated region fallthrough
CT: control target
= control target key end

     0   :  { %s3089_s12 = smov 0   ;;  %s3091_s13 = smov 0   ;;  %s3508_s0 = inlined_call_operand.vmem [shape: bf16[2,9,9,512], index: 0, kind: input, shape index: {}]   ;;  %s3509_s1 = inlined_call_operand.vmem [shape: bf16[9,128,128], index: 1, kind: input, shape index: {}]   ;;  %s3510_s2 = inlined_call_operand.vmem [shape: f32[128,128], index: 2, kind: output, shape index: {0}]   ;;  %s3511_s3 = inlined_call_operand.vmem [shape: f32[2,8,128], index: 3, kind: output, shape index: {1}]  }
   0x1   :  { %s3093_s14 = smov 0  }
   0x2 LB: > { %s23_s15 = sadd.s32 1, %s3063_s13  ;;  %p2269_p0 = scmp.ge.s32.totalorder %s3067_s14, 1  ;;  %s3067_s14 = sphi %s3093_s14, %s14_s14   ;;  %s3063_s13 = sphi %s3091_s13, %s3515_s13   ;;  %s3059_s12 = sphi %s3089_s12, %s3514_s12  }
   0x3   : > { %p24_p1 = scmp.ge.s32.totalorder %s23_s15, 2  ;;  %p165_p2 = scmp.lt.s32.totalorder %s3067_s14, 3 }
   0x5   : > { %s3517_s15 = smov (%p24_p1, %s23_s15), 0  ;;  %p166_p3 = pnand %p2269_p0, %p165_p2 }
   0x6   : > { %v2973_v0 = vld [vmem:[%s3509_s1 + $0x40] sm:$0xff] (!%p166_p3)   ;;  %p203_p4 = scmp.lt.s32.totalorder (!%p166_p3), %s3059_s12, 1  ;;  %v2975_v2 = vld [vmem:[%s3509_s1 + $0x48] sm:$0xff] (!%p166_p3)   ;;  %v2977_v4 = vld [vmem:[%s3509_s1 + $0x50] sm:$0xff] (!%p166_p3)   ;;  %vm568_vm0 = vsmask.f32 (!%p166_p3), 3328 }
   0x7   : > { %169 = sbr.rel (%p166_p3) target bundleno = 416 (0x1a0), region = 28  ;;  %v2974_v1 = vld [vmem:[%s3509_s1 + $0x100] sm:$0xff] (!%p166_p3)   ;;  %2652 = vmatprep.subr.bf16.mxu1 (!%p166_p3), %v2973_v0  ;;  %v2976_v3 = vld [vmem:[%s3509_s1 + $0x108] sm:$0xff] (!%p166_p3)   ;;  %v2978_v5 = vld [vmem:[%s3509_s1 + $0x110] sm:$0xff] (!%p166_p3)   ;;  %vm569_vm1 = vsmask.f32 (!%p166_p3), 7440 }
   0x8   : > { %2748 = vmatprep.subr.bf16.mxu0 (!%p166_p3), %v2974_v1  ;;  %2653 = vmatpush3.bf16.msra.mxu1 (!%p166_p3), %v2973_v0  ;;  %v2979_v6 = vld [vmem:[%s3509_s1 + $0x58] sm:$0xff] (!%p166_p3)   ;;  %v2981_v8 = vld [vmem:[%s3509_s1 + $0x60] sm:$0xff] (!%p166_p3)   ;;  %v2983_v10 = vld [vmem:[%s3509_s1 + $0x68] sm:$0xff] (!%p166_p3)   ;;  %s2271_s10 = sshll.u32 (!%p166_p3), %s3059_s12, 3 }
   0x9   : > { %2749 = vmatpush3.bf16.msra.mxu0 (!%p166_p3), %v2974_v1  ;;  %2654 = vmatprep.subr.bf16.mxu1 (!%p166_p3), %v2975_v2  ;;  %v2980_v7 = vld [vmem:[%s3509_s1 + $0x118] sm:$0xff] (!%p166_p3)   ;;  %v2982_v9 = vld [vmem:[%s3509_s1 + $0x120] sm:$0xff] (!%p166_p3)   ;;  %v2984_v13 = vld [vmem:[%s3509_s1 + $0x128] sm:$0xff] (!%p166_p3)   ;;  %p213_p5 = scmp.lt.s32.totalorder (!%p166_p3), %s2271_s10, 15 }
   0xa   : > { %2750 = vmatprep.subr.bf16.mxu0 (!%p166_p3), %v2976_v3  ;;  %v2985_v18 = vld [vmem:[%s3509_s1 + $0x70] sm:$0xff] (!%p166_p3)   ;;  %v2987_v20 = vld [vmem:[%s3509_s1 + $0x78] sm:$0xff] (!%p166_p3)   ;;  %v2989_v23 = vld [vmem:[%s3509_s1] sm:$0xff] (!%p166_p3)  }
   0xb   : > { %v2986_v19 = vld [vmem:[%s3509_s1 + $0x130] sm:$0xff] (!%p166_p3)   ;;  %v2988_v21 = vld [vmem:[%s3509_s1 + $0x138] sm:$0xff] (!%p166_p3)   ;;  %v2990_v27 = vld [vmem:[%s3509_s1 + $0x140] sm:$0xff] (!%p166_p3)  }
   0xc   : > { %2655 = vmatpush3.bf16.msra.mxu1 (!%p166_p3), %v2975_v2  ;;  %v2991_v32 = vld [vmem:[%s3509_s1 + $0x8] sm:$0xff] (!%p166_p3)   ;;  %v2993_v37 = vld [vmem:[%s3509_s1 + $0x10] sm:$0xff] (!%p166_p3)   ;;  %v2995_v45 = vld [vmem:[%s3509_s1 + $0x18] sm:$0xff] (!%p166_p3)  }
   0xd   : > { %2751 = vmatpush3.bf16.msra.mxu0 (!%p166_p3), %v2976_v3  ;;  %2656 = vmatprep.subr.bf16.mxu1 (!%p166_p3), %v2977_v4  ;;  %v2992_v35 = vld [vmem:[%s3509_s1 + $0x148] sm:$0xff] (!%p166_p3)   ;;  %v2994_v43 = vld [vmem:[%s3509_s1 + $0x150] sm:$0xff] (!%p166_p3)   ;;  %v2996_v54 = vld [vmem:[%s3509_s1 + $0x158] sm:$0xff] (!%p166_p3)  }
   0xe   : > { %s3129_s28 = scalar_select %p203_p4, %s3059_s12, 1  ;;  %2752 = vmatprep.subr.bf16.mxu0 %v2978_v5  ;;  %v2997_v1 = vld [vmem:[%s3509_s1 + $0x20] sm:$0xff]   ;;  %vm3221_vm2 = vmor %vm568_vm0, %vm569_vm1 }
   0xf   : > { %v2998_v2 = vld [vmem:[%s3509_s1 + $0x160] sm:$0xff]   ;;  %s3519_s10 = smov (!%p213_p5, %s2271_s10), 15 }
  0x10   : > { %s2948_s6 = smul.u32 288, %s3129_s28  ;;  %2657 = vmatpush3.bf16.msra.mxu1 %v2977_v4  ;;  %s2272_s11 = sshll.u32 %s3519_s10, 3 }
  0x11   : > { %2753 = vmatpush3.bf16.msra.mxu0 %v2978_v5  ;;  %2658 = vmatprep.subr.bf16.mxu1 %v2979_v6  ;;  %s219_s19 = scalar_lea.vmem %s3510_s2, %s2272_s11  ;;  %s2273_s12 = sshll.u32 %s3129_s28, 3 }
  0x12   : > { %2754 = vmatprep.subr.bf16.mxu0 %v2980_v7  ;;  %s3147_s17 = scalar_lea.vmem %s3508_s0, %s2948_s6  ;;  %s227_s22 = scalar_lea.vmem %s3511_s3, %s2273_s12 }
  0x13   : > { %v253_v11 = vld [vmem:[%s3147_s17 + $0x4] sm:$0xf]  ;;  %v1007_v15 = vld [vmem:[%s3147_s17 + $0xc] sm:$0xf]  ;;  %v229_v44 = vld [vmem:[%s3147_s17] sm:$0xf] }
  0x14   : > { %2659 = vmatpush3.bf16.msra.mxu1 %v2979_v6  ;;  %v254_v12 = vld [vmem:[%s3147_s17 + $0x24] sm:$0xf]  ;;  %v1008_v16 = vld [vmem:[%s3147_s17 + $0x2c] sm:$0xf]  ;;  %v230_v47 = vld [vmem:[%s3147_s17 + $0x20] sm:$0xf] }
  0x15   : > { %2755 = vmatpush3.bf16.msra.mxu0 %v2980_v7  ;;  %2660 = vmatprep.subr.bf16.mxu1 %v2981_v8  ;;  %v2290_v14 = vcombine.low %v253_v11, %v254_v12  ;;  %v2386_v17 = vcombine.low %v1007_v15, %v1008_v16  ;;  %v255_v22 = vld [vmem:[%s3147_s17 + $0x44] sm:$0xf]  ;;  %v1009_v25 = vld [vmem:[%s3147_s17 + $0x4c] sm:$0xf]  ;;  %v1177_v49 = vld [vmem:[%s3147_s17 + $0x8] sm:$0xf]  ;;  %v2302_v55 = vcombine.low %v229_v44, %v230_v47 }
  0x16   : > { %2756 = vmatprep.subr.bf16.mxu0 %v2982_v9  ;;  %v256_v24 = vld [vmem:[%s3147_s17 + $0x64] sm:$0xf]  ;;  %v1010_v26 = vld [vmem:[%s3147_s17 + $0x6c] sm:$0xf]  ;;  %v1178_v50 = vld [vmem:[%s3147_s17 + $0x18] sm:$0x1] }
  0x17   : > { %2668 = vmatprep.mubr.bf16.mxu1 %v2290_v14  ;;  %2764 = vmatprep.mubr.bf16.mxu0 %v2386_v17  ;;  %v2291_v28 = vcombine.low %v255_v22, %v256_v24  ;;  %v257_v29 = vld [vmem:[%s3147_s17 + $0x84] sm:$0xf]  ;;  %v2387_v30 = vcombine.low %v1009_v25, %v1010_v26  ;;  %v1011_v33 = vld [vmem:[%s3147_s17 + $0x8c] sm:$0xf]  ;;  %v1179_v51 = vld [vmem:[%s3147_s17 + $0x28] sm:$0xf] }
  0x18   : > { %2661 = vmatpush3.bf16.msra.mxu1 %v2981_v8  ;;  %v258_v31 = vld [vmem:[%s3147_s17 + $0xa4] sm:$0xf]  ;;  %v1012_v34 = vld [vmem:[%s3147_s17 + $0xac] sm:$0xf]  ;;  %v1194_v52 = vshrl.u32 %v1177_v49, 16  ;;  %v1197_v53 = vshll.u32 %v1177_v49, 16 }
  0x19   : > { %2757 = vmatpush3.bf16.msra.mxu0 %v2982_v9  ;;  %2662 = vmatprep.subr.bf16.mxu1 %v2983_v10  ;;  %v2292_v36 = vcombine.low %v257_v29, %v258_v31  ;;  %v2388_v38 = vcombine.low %v1011_v33, %v1012_v34  ;;  %v259_v39 = vld [vmem:[%s3147_s17 + $0xc4] sm:$0xf]  ;;  %v1013_v41 = vld [vmem:[%s3147_s17 + $0xcc] sm:$0xf]  ;;  %v1180_v56 = vld [vmem:[%s3147_s17 + $0x38] sm:$0x1] }
  0x1a   : > { %2758 = vmatprep.subr.bf16.mxu0 %v2984_v13  ;;  %v260_v40 = vld [vmem:[%s3147_s17 + $0xe4] sm:$0xf]  ;;  %v1014_v42 = vld [vmem:[%s3147_s17 + $0xec] sm:$0xf]  ;;  %v1203_v57 = vshll.u32 %v1178_v50, 16  ;;  %v1208_v58 = vshrl.u32 %v1179_v51, 16 }
  0x1b   : > { %v2293_v46 = vcombine.low %v259_v39, %v260_v40  ;;  %v2389_v48 = vcombine.low %v1013_v41, %v1014_v42  ;;  %v1211_v59 = vshll.u32 %v1179_v51, 16  ;;  %v1196_v60 = vrot.slane %v1194_v52, 4  ;;  %v1181_v8 = vld [vmem:[%s3147_s17 + $0x48] sm:$0xf]  ;;  %v1182_v9 = vld [vmem:[%s3147_s17 + $0x58] sm:$0x1] }
  0x1c   : > { %2663 = vmatpush3.bf16.msra.mxu1 %v2983_v10  ;;  %v1199_v61 = vrot.slane %v1197_v53, 5  ;;  %v1217_v62 = vshll.u32 %v1180_v56, 16  ;;  %v1210_v63 = vrot.slane %v1208_v58, 4  ;;  %v1205_v5 = vrot.slane %v1203_v57, 5  ;;  %v1183_v10 = vld [vmem:[%s3147_s17 + $0x68] sm:$0xf] }
  0x1d   : > { %2759 = vmatpush3.bf16.msra.mxu0 %v2984_v13  ;;  %2664 = vmatprep.subr.bf16.mxu1 %v2985_v18  ;;  %v1213_v0 = vrot.slane %v1211_v59, 5  ;;  %v1184_v12 = vld [vmem:[%s3147_s17 + $0x78] sm:$0x1]  ;;  %v1222_v13 = vshrl.u32 %v1181_v8, 16  ;;  %v1225_v14 = vshll.u32 %v1181_v8, 16  ;;  %v1236_v16 = vshrl.u32 %v1183_v10, 16 }
  0x1e   : > { %2760 = vmatprep.subr.bf16.mxu0 %v2986_v19  ;;  %v1200_v4 = vor.u32 %v1199_v61, %v1196_v60  ;;  %v1219_v6 = vrot.slane %v1217_v62, 5  ;;  %v1239_v17 = vshll.u32 %v1183_v10, 16  ;;  %v1231_v22 = vshll.u32 %v1182_v9, 16  ;;  %v231_v39 = vld [vmem:[%s3147_s17 + $0x40] sm:$0xf]  ;;  %v3007_v62 = vld [vmem:[%s3509_s1 + $0x88] sm:$0xff]  }
  0x1f   : > { %v1214_v7 = vor.u32 %v1213_v0, %v1210_v63  ;;  %v1238_v25 = vrot.slane %v1236_v16, 4  ;;  %v3005_v40 = vld [vmem:[%s3509_s1 + $0x80] sm:$0xff]   ;;  %v1185_v47 = vld [vmem:[%s3147_s17 + $0x88] sm:$0xf]  ;;  %v1188_v50 = vld [vmem:[%s3147_s17 + $0xb8] sm:$0x1] }
  0x20   : > { %2665 = vmatpush3.bf16.msra.mxu1 %v2985_v18  ;;  %v1201_v11 = vrot.slane %v1200_v4, 4  ;;  %v2999_v18 = vld [vmem:[%s3509_s1 + $0x28] sm:$0xff]   ;;  %v1241_v26 = vrot.slane %v1239_v17, 5  ;;  %v1233_v33 = vrot.slane %v1231_v22, 5  ;;  %v232_v41 = vld [vmem:[%s3147_s17 + $0x60] sm:$0xf] }
  0x21   : > { %2761 = vmatpush3.bf16.msra.mxu0 %v2986_v19  ;;  %2666 = vmatprep.subr.bf16.mxu1 %v2987_v20  ;;  %v1215_v15 = vrot.slane %v1214_v7, 4  ;;  %v3006_v42 = vld [vmem:[%s3509_s1 + $0x180] sm:$0xff]   ;;  %v1187_v49 = vld [vmem:[%s3147_s17 + $0xa8] sm:$0xf]  ;;  %v1250_v51 = vshrl.u32 %v1185_v47, 16  ;;  %v1253_v52 = vshll.u32 %v1185_v47, 16  ;;  %v2303_v57 = vcombine.low %v231_v39, %v232_v41 }
  0x22   : > { %2762 = vmatprep.subr.bf16.mxu0 %v2988_v21  ;;  %v1206_v19 = vsel %vm3221_vm2, %v1201_v11, %v1205_v5  ;;  %v1242_v31 = vor.u32 %v1241_v26, %v1238_v25  ;;  %v1273_v56 = vshll.u32 %v1188_v50, 16  ;;  %v3273_v5 = vld [vmem:[%s3147_s17 + $0xc0] sm:$0xf]  ;;  %v1189_v7 = vld [vmem:[%s3147_s17 + $0xc8] sm:$0xf]  ;;  %v3009_v16 = vld [vmem:[%s3509_s1 + $0x90] sm:$0xff]  }
  0x23   : > { %v1220_v24 = vsel %vm3221_vm2, %v1215_v15, %v1219_v6  ;;  %v1252_v58 = vrot.slane %v1250_v51, 4  ;;  %v1255_v59 = vrot.slane %v1253_v52, 5  ;;  %v236_v6 = vld [vmem:[%s3147_s17 + $0xe0] sm:$0xf]  ;;  %v1190_v8 = vld [vmem:[%s3147_s17 + $0xd8] sm:$0x1] }
  0x24   : > { %2667 = vmatpush3.bf16.msra.mxu1 %v2987_v20  ;;  %v1224_v20 = vrot.slane %v1222_v13, 4  ;;  %v2414_v29 = vcombine.low %v1206_v19, %v1220_v24  ;;  %v1191_v9 = vld [vmem:[%s3147_s17 + $0xe8] sm:$0xf]  ;;  %v1278_v13 = vshrl.u32 %v1189_v7, 16  ;;  %v1287_v15 = vshll.u32 %v1190_v8, 16  ;;  %v3010_v25 = vld [vmem:[%s3509_s1 + $0x190] sm:$0xff]  }
  0x25   : > { %2763 = vmatpush3.bf16.msra.mxu0 %v2988_v21  ;;  %2676 = vmatprep.subr.bf16.mxu1 %v2989_v23  ;;  %v1227_v21 = vrot.slane %v1225_v14, 5  ;;  %v1256_v4 = vor.u32 %v1255_v59, %v1252_v58  ;;  %v3008_v10 = vld [vmem:[%s3509_s1 + $0x188] sm:$0xff]   ;;  %v1281_v14 = vshll.u32 %v1189_v7, 16  ;;  %v1295_v19 = vshll.u32 %v1191_v9, 16  ;;  %v555_v39 = vld [vmem:[%s3147_s17 + $0x30] sm:$0x1] }
  0x26   : > { %2772 = vmatprep.subr.bf16.mxu0 %v2990_v27  ;;  %v1280_v22 = vrot.slane %v1278_v13, 4  ;;  %v1289_v24 = vrot.slane %v1287_v15, 5  ;;  %v3012_v50 = vld [vmem:[%s3509_s1 + $0x198] sm:$0xff]   ;;  %v2427_v58 = vld [vmem:[%s3147_s17 + $0x40] sm:$0xf]  ;;  %v3016_v15 = vld [vmem:[%s3509_s1 + $0x1a8] sm:$0xff]  }
  0x27   : > { %2669 = vmatmul.mubr.bf16.vlgmr.msra.gmra.mrb[0].mxu1 %v2291_v28  ;;  %v3001_v28 = vld [vmem:[%s3509_s1 + $0x30] sm:$0xff]   ;;  %v1257_v17 = vrot.slane %v1256_v4, 4  ;;  %v3013_v59 = vld [vmem:[%s3509_s1 + $0xa0] sm:$0xff]  }
  0x28   : > { %2677 = vmatpush3.bf16.msra.mxu1 %v2989_v23  ;;  %2765 = vmatmul.mubr.bf16.vlgmr.msra.gmra.mrb[0].mxu0 %v2387_v30  ;;  %v3000_v23 = vld [vmem:[%s3509_s1 + $0x168] sm:$0xff]   ;;  %v1228_v30 = vor.u32 %v1227_v21, %v1224_v20  ;;  %v558_v4 = vld [vmem:[%s3147_s17 + $0x60] sm:$0xf]  ;;  %v559_v8 = vld [vmem:[%s3147_s17 + $0x70] sm:$0x1] }
  0x29   : > { %2773 = vmatpush3.bf16.msra.mxu0 %v2990_v27  ;;  %2678 = vmatprep.subr.bf16.mxu1 %v2991_v32  ;;  %v1245_v27 = vshll.u32 %v1184_v12, 16  ;;  %v1192_v12 = vld [vmem:[%s3147_s17 + $0xf8] sm:$0x1] }
  0x2a   : > { %2774 = vmatprep.subr.bf16.mxu0 %v2992_v35  ;;  %2672 = vmatprep.mubr.bf16.mxu1 %v2292_v36  ;;  %v1243_v36 = vrot.slane %v1242_v31, 4  ;;  %v1301_v20 = vshll.u32 %v1192_v12, 16  ;;  %v2305_v31 = vcombine.low %v3273_v5, %v236_v6  ;;  %v3014_v6 = vld [vmem:[%s3509_s1 + $0x1a0] sm:$0xff]  }
  0x2b   : > { %2768 = vmatprep.mubr.bf16.mxu0 %v2388_v38  ;;  %v1247_v34 = vrot.slane %v1245_v27, 5  ;;  %v3004_v38 = vld [vmem:[%s3509_s1 + $0x178] sm:$0xff]  }
  0x2c   : > { %2679 = vmatpush3.bf16.msra.mxu1 %v2991_v32  ;;  %v3002_v32 = vld [vmem:[%s3509_s1 + $0x170] sm:$0xff]  }
  0x2d   : > { %2775 = vmatpush3.bf16.msra.mxu0 %v2992_v35  ;;  %2680 = vmatprep.subr.bf16.mxu1 %v2993_v37  ;;  %v1229_v35 = vrot.slane %v1228_v30, 4  ;;  %v1248_v44 = vsel %vm3221_vm2, %v1243_v36, %v1247_v34  ;;  %v553_v34 = vld [vmem:[%s3147_s17 + $0x10] sm:$0x1] }
  0x2e   : > { %2776 = vmatprep.subr.bf16.mxu0 %v2994_v43 }
  0x2f   : > { %2673 = vmatmul.mubr.bf16.gmra.mrb[4].mxu1 %v2293_v46  ;;  %v234_v46 = vld [vmem:[%s3147_s17 + $0xa0] sm:$0xf] }
  0x30   : > { %2681 = vmatpush3.bf16.msra.mxu1 %v2993_v37  ;;  %2769 = vmatmul.mubr.bf16.gmra.mrb[4].mxu0 %v2389_v48  ;;  %v3003_v37 = vld [vmem:[%s3509_s1 + $0x38] sm:$0xff]  }
  0x31   : > { %2777 = vmatpush3.bf16.msra.mxu0 %v2994_v43  ;;  %2682 = vmatprep.subr.bf16.mxu1 %v2995_v45  ;;  %v1234_v43 = vsel %vm3221_vm2, %v1229_v35, %v1233_v33  ;;  %v1186_v48 = vld [vmem:[%s3147_s17 + $0x98] sm:$0x1]  ;;  %v552_v33 = vld [vmem:[%s3147_s17] sm:$0xf] }
  0x32   : > { %2778 = vmatprep.subr.bf16.mxu0 %v2996_v54  ;;  %2692 = vmatprep.mubr.bf16.mxu1 %v2302_v55  ;;  %v1259_v53 = vshll.u32 %v1186_v48, 16  ;;  %v1267_v55 = vshll.u32 %v1187_v49, 16  ;;  %v2415_v61 = vcombine.low %v1234_v43, %v1248_v44  ;;  %v3011_v35 = vld [vmem:[%s3509_s1 + $0x98] sm:$0xff]   ;;  %v575_v41 = vshll.u32 %v552_v33, 16 }
  0x33   : > { %2788 = vmatprep.mubr.bf16.mxu0 %v2414_v29  ;;  %v1303_v29 = vrot.slane %v1301_v20, 5  ;;  %v581_v43 = vshll.u32 %v553_v34, 16  ;;  %v2429_v34 = vld [vmem:[%s3147_s17 + $0x80] sm:$0xf] }
  0x34   : > { %2683 = vmatpush3.bf16.msra.mxu1 %v2995_v45  ;;  %v233_v45 = vld [vmem:[%s3147_s17 + $0x80] sm:$0xf]  ;;  %v1261_v63 = vrot.slane %v1259_v53, 5  ;;  %v1269_v0 = vrot.slane %v1267_v55, 5  ;;  %v577_v48 = vrot.slane %v575_v41, 5 }
  0x35   : > { %2779 = vmatpush3.bf16.msra.mxu0 %v2996_v54  ;;  %2684 = vmatprep.subr.bf16.mxu1 %v2997_v1  ;;  %v1264_v54 = vshrl.u32 %v1187_v49, 16  ;;  %v595_v49 = vshll.u32 %v555_v39, 16  ;;  %v562_v39 = vld [vmem:[%s3147_s17 + $0xa0] sm:$0xf]  ;;  %v563_v41 = vld [vmem:[%s3147_s17 + $0xb0] sm:$0x1] }
  0x36   : > { %2780 = vmatprep.subr.bf16.mxu0 %v2998_v2  ;;  %v1262_v26 = vsel %vm3221_vm2, %v1257_v17, %v1261_v63 }
  0x37   : > { %v1266_v60 = vrot.slane %v1264_v54, 4  ;;  %v2426_v54 = vld [vmem:[%s3147_s17 + $0x20] sm:$0xf] }
  0x38   : > { %2685 = vmatpush3.bf16.msra.mxu1 %v2997_v1  ;;  %v1275_v1 = vrot.slane %v1273_v56, 5  ;;  %v2450_v63 = vcombine.low %v2426_v54, %v2427_v58 }
  0x39   : > { %2781 = vmatpush3.bf16.msra.mxu0 %v2998_v2  ;;  %2686 = vmatprep.subr.bf16.mxu1 %v2999_v18  ;;  %v2304_v2 = vcombine.low %v233_v45, %v234_v46  ;;  %v1270_v11 = vor.u32 %v1269_v0, %v1266_v60  ;;  %v556_v0 = vld [vmem:[%s3147_s17 + $0x40] sm:$0xf] }
  0x3a   : > { %2782 = vmatprep.subr.bf16.mxu0 %v3000_v23  ;;  %v600_v5 = vshrl.u32 %v556_v0, 16 }
  0x3b   : > { %v1271_v21 = vrot.slane %v1270_v11, 4  ;;  %v3015_v11 = vld [vmem:[%s3509_s1 + $0xa8] sm:$0xff]  }
  0x3c   : > { %2687 = vmatpush3.bf16.msra.mxu1 %v2999_v18  ;;  %v1292_v18 = vshrl.u32 %v1191_v9, 16  ;;  %v603_v9 = vshll.u32 %v556_v0, 16  ;;  %v602_v13 = vrot.slane %v600_v5, 4  ;;  %v567_v0 = vld [vmem:[%s3147_s17 + $0xf0] sm:$0x1]  ;;  %v3023_v5 = vld [vmem:[%s3509_s1 + $0xc8] sm:$0xff]  }
  0x3d   : > { %2783 = vmatpush3.bf16.msra.mxu0 %v3000_v23  ;;  %2688 = vmatprep.subr.bf16.mxu1 %v3001_v28  ;;  %v1283_v23 = vrot.slane %v1281_v14, 5  ;;  %v1276_v30 = vsel %vm3221_vm2, %v1271_v21, %v1275_v1  ;;  %v617_v14 = vshll.u32 %v558_v4, 16 }
  0x3e   : > { %2784 = vmatprep.subr.bf16.mxu0 %v3002_v32  ;;  %v1294_v27 = vrot.slane %v1292_v18, 4  ;;  %v2416_v36 = vcombine.low %v1262_v26, %v1276_v30  ;;  %v605_v17 = vrot.slane %v603_v9, 5  ;;  %v3018_v26 = vld [vmem:[%s3509_s1 + $0x1b0] sm:$0xff]   ;;  %v679_v9 = vshll.u32 %v567_v0, 16  ;;  %v2464_v0 = vld [vmem:[%s3147_s17 + $0x64] sm:$0xf] }
  0x3f   : > { %v619_v21 = vrot.slane %v617_v14, 5  ;;  %v3024_v14 = vld [vmem:[%s3509_s1 + $0x1c8] sm:$0xff]  }
  0x40   : > { %2689 = vmatpush3.bf16.msra.mxu1 %v3001_v28  ;;  %v1297_v28 = vrot.slane %v1295_v19, 5 }
  0x41   : > { %2785 = vmatpush3.bf16.msra.mxu0 %v3002_v32  ;;  %2690 = vmatprep.subr.bf16.mxu1 %v3003_v37  ;;  %v1284_v32 = vor.u32 %v1283_v23, %v1280_v22  ;;  %v623_v22 = vshll.u32 %v559_v8, 16  ;;  %v606_v23 = vor.u32 %v605_v17, %v602_v13 }
  0x42   : > { %2786 = vmatprep.subr.bf16.mxu0 %v3004_v38 }
  0x44   : > { %2691 = vmatpush3.bf16.msra.mxu1 %v3003_v37  ;;  %v1298_v37 = vor.u32 %v1297_v28, %v1294_v27  ;;  %v625_v28 = vrot.slane %v623_v22, 5 }
  0x45   : > { %2787 = vmatpush3.bf16.msra.mxu0 %v3004_v38  ;;  %2700 = vmatprep.subr.bf16.mxu1 %v3005_v40  ;;  %v554_v38 = vld [vmem:[%s3147_s17 + $0x20] sm:$0xf] }
  0x46   : > { %2796 = vmatprep.subr.bf16.mxu0 %v3006_v42  ;;  %v586_v44 = vshrl.u32 %v554_v38, 16  ;;  %v589_v45 = vshll.u32 %v554_v38, 16  ;;  %v1299_v46 = vrot.slane %v1298_v37, 4  ;;  %v560_v37 = vld [vmem:[%s3147_s17 + $0x80] sm:$0xf] }
  0x47   : > { %2693 = vmatmul.mubr.bf16.vlgmr.msra.gmra.mrb[0].mxu1 %v2303_v57  ;;  %v583_v57 = vrot.slane %v581_v43, 5  ;;  %v561_v38 = vld [vmem:[%s3147_s17 + $0x90] sm:$0x1]  ;;  %v631_v43 = vshll.u32 %v560_v37, 16 }
  0x48   : > { %2701 = vmatpush3.bf16.msra.mxu1 %v3005_v40  ;;  %2789 = vmatmul.mubr.bf16.vlgmr.msra.gmra.mrb[0].mxu0 %v2415_v61  ;;  %v572_v40 = vshrl.u32 %v552_v33, 16  ;;  %v588_v52 = vrot.slane %v586_v44, 4  ;;  %v591_v53 = vrot.slane %v589_v45, 5  ;;  %v1304_v55 = vsel %vm3221_vm2, %v1299_v46, %v1303_v29  ;;  %v3343_v33 = vld [vmem:[%s3147_s17 + $0x60] sm:$0xf] }
  0x49   : > { %2797 = vmatpush3.bf16.msra.mxu0 %v3006_v42  ;;  %2702 = vmatprep.subr.bf16.mxu1 %v3007_v62  ;;  %v1285_v42 = vrot.slane %v1284_v32, 4  ;;  %v607_v29 = vrot.slane %v606_v23, 4  ;;  %v3020_v32 = vld [vmem:[%s3509_s1 + $0x1b8] sm:$0xff]   ;;  %v637_v44 = vshll.u32 %v561_v38, 16  ;;  %v642_v45 = vshrl.u32 %v562_v39, 16  ;;  %v3022_v46 = vld [vmem:[%s3509_s1 + $0x1c0] sm:$0xff]  }
  0x4a   : > { %2798 = vmatprep.subr.bf16.mxu0 %v3008_v10  ;;  %2696 = vmatprep.mubr.bf16.mxu1 %v2304_v2  ;;  %v574_v47 = vrot.slane %v572_v40, 4  ;;  %v592_v61 = vor.u32 %v591_v53, %v588_v52  ;;  %v557_v2 = vld [vmem:[%s3147_s17 + $0x50] sm:$0x1]  ;;  %v3021_v40 = vld [vmem:[%s3509_s1 + $0xc0] sm:$0xff]   ;;  %v633_v53 = vrot.slane %v631_v43, 5 }
  0x4b   : > { %2792 = vmatprep.mubr.bf16.mxu0 %v2416_v36  ;;  %v1290_v51 = vsel %vm3221_vm2, %v1285_v42, %v1289_v24  ;;  %v609_v18 = vshll.u32 %v557_v2, 16  ;;  %v3017_v24 = vld [vmem:[%s3509_s1 + $0xb0] sm:$0xff]   ;;  %v628_v42 = vshrl.u32 %v560_v37, 16  ;;  %v639_v54 = vrot.slane %v637_v44, 5  ;;  %v2463_v37 = vld [vmem:[%s3147_s17 + $0x44] sm:$0xf] }
  0x4c   : > { %2703 = vmatpush3.bf16.msra.mxu1 %v3007_v62  ;;  %v578_v56 = vor.u32 %v577_v48, %v574_v47  ;;  %v2417_v60 = vcombine.low %v1290_v51, %v1304_v55  ;;  %v597_v62 = vrot.slane %v595_v49, 5  ;;  %v593_v7 = vrot.slane %v592_v61, 4  ;;  %v2431_v51 = vld [vmem:[%s3147_s17 + $0xc0] sm:$0xf]  ;;  %v565_v61 = vld [vmem:[%s3147_s17 + $0xd0] sm:$0x1] }
  0x4d   : > { %2799 = vmatpush3.bf16.msra.mxu0 %v3008_v10  ;;  %2704 = vmatprep.subr.bf16.mxu1 %v3009_v16  ;;  %v614_v10 = vshrl.u32 %v558_v4, 16  ;;  %v611_v27 = vrot.slane %v609_v18, 5  ;;  %v2451_v47 = vcombine.low %v3343_v33, %v2429_v34  ;;  %v645_v48 = vshll.u32 %v562_v39, 16  ;;  %v3027_v33 = vld [vmem:[%s3509_s1 + $0xd8] sm:$0xff]   ;;  %v3030_v43 = vld [vmem:[%s3509_s1 + $0x1e0] sm:$0xff]   ;;  %v3031_v44 = vld [vmem:[%s3509_s1 + $0xe8] sm:$0xff]  }
  0x4e   : > { %2800 = vmatprep.subr.bf16.mxu0 %v3010_v25  ;;  %v579_v1 = vrot.slane %v578_v56, 4  ;;  %v651_v49 = vshll.u32 %v563_v41, 16  ;;  %v630_v52 = vrot.slane %v628_v42, 4  ;;  %v644_v55 = vrot.slane %v642_v45, 4  ;;  %v564_v56 = vld [vmem:[%s3147_s17 + $0xc0] sm:$0xf] }
  0x4f   : > { %2697 = vmatmul.mubr.bf16.gmra.mrb[4].mxu1 %v2305_v31  ;;  %v616_v19 = vrot.slane %v614_v10, 4  ;;  %v3019_v31 = vld [vmem:[%s3509_s1 + $0xb8] sm:$0xff]   ;;  %v647_v58 = vrot.slane %v645_v48, 5  ;;  %v659_v2 = vshll.u32 %v564_v56, 16  ;;  %v665_v4 = vshll.u32 %v565_v61, 16  ;;  %v3029_v42 = vld [vmem:[%s3509_s1 + $0xe0] sm:$0xff]  }
  0x50   : > { %2705 = vmatpush3.bf16.msra.mxu1 %v3009_v16  ;;  %2793 = vmatmul.mubr.bf16.gmra.mrb[4].mxu0 %v2417_v60  ;;  %v584_v12 = vsel %vm3221_vm2, %v579_v1, %v583_v57  ;;  %v598_v16 = vsel %vm3221_vm2, %v593_v7, %v597_v62  ;;  %v566_v62 = vld [vmem:[%s3147_s17 + $0xe0] sm:$0xf]  ;;  %v656_v1 = vshrl.u32 %v564_v56, 16  ;;  %v681_v18 = vrot.slane %v679_v9, 5  ;;  %v3028_v39 = vld [vmem:[%s3509_s1 + $0x1d8] sm:$0xff]   ;;  %v3032_v45 = vld [vmem:[%s3509_s1 + $0x1e8] sm:$0xff]  }
  0x51   : > { %2801 = vmatpush3.bf16.msra.mxu0 %v3010_v25  ;;  %2706 = vmatprep.subr.bf16.mxu1 %v3011_v35  ;;  %v2330_v20 = vcombine.low %v584_v12, %v598_v16  ;;  %v620_v25 = vor.u32 %v619_v21, %v616_v19  ;;  %v670_v7 = vshrl.u32 %v566_v62, 16  ;;  %v673_v8 = vshll.u32 %v566_v62, 16  ;;  %v2432_v21 = vld [vmem:[%s3147_s17 + $0xe0] sm:$0xf]  ;;  %v3033_v48 = vld [vmem:[%s3509_s1 + $0xf0] sm:$0xff]  }
  0x52   : > { %2802 = vmatprep.subr.bf16.mxu0 %v3012_v50  ;;  %2812 = vmatprep.mubr.bf16.mxu0 %v2450_v63  ;;  %v634_v63 = vor.u32 %v633_v53, %v630_v52  ;;  %v661_v12 = vrot.slane %v659_v2, 5  ;;  %v667_v13 = vrot.slane %v665_v4, 5  ;;  %v2499_v2 = vld [vmem:[%s3147_s17 + $0x30] sm:$0x1] }
  0x53   : > { %2716 = vmatprep.mubr.bf16.mxu1 %v2330_v20  ;;  %v621_v30 = vrot.slane %v620_v25, 4  ;;  %v672_v16 = vrot.slane %v670_v7, 4  ;;  %v675_v17 = vrot.slane %v673_v8, 5  ;;  %v3025_v25 = vld [vmem:[%s3509_s1 + $0xd0] sm:$0xff]  }
  0x54   : > { %2707 = vmatpush3.bf16.msra.mxu1 %v3011_v35  ;;  %v612_v35 = vsel %vm3221_vm2, %v607_v29, %v611_v27  ;;  %v635_v10 = vrot.slane %v634_v63, 4  ;;  %v840_v63 = vld [vmem:[%s3147_s17 + $0x68] sm:$0xf]  ;;  %v2501_v8 = vld [vmem:[%s3147_s17 + $0x50] sm:$0x1] }
  0x55   : > { %2803 = vmatpush3.bf16.msra.mxu0 %v3012_v50  ;;  %2708 = vmatprep.subr.bf16.mxu1 %v3013_v59  ;;  %v626_v36 = vsel %vm3221_vm2, %v621_v30, %v625_v28  ;;  %v2430_v50 = vld [vmem:[%s3147_s17 + $0xa0] sm:$0xf]  ;;  %v676_v23 = vor.u32 %v675_v17, %v672_v16  ;;  %v3026_v28 = vld [vmem:[%s3509_s1 + $0x1d0] sm:$0xff]  }
  0x56   : > { %2804 = vmatprep.subr.bf16.mxu0 %v3014_v6  ;;  %v2331_v57 = vcombine.low %v612_v35, %v626_v36  ;;  %v2452_v60 = vcombine.low %v2430_v50, %v2431_v51  ;;  %v640_v19 = vsel %vm3221_vm2, %v635_v10, %v639_v54  ;;  %v2462_v36 = vld [vmem:[%s3147_s17 + $0x24] sm:$0xf]  ;;  %v3034_v50 = vld [vmem:[%s3509_s1 + $0x1f0] sm:$0xff]   ;;  %v2508_v51 = vld [vmem:[%s3147_s17 + $0xc0] sm:$0xf] }
  0x57   : > { %v677_v29 = vrot.slane %v676_v23, 4  ;;  %v2486_v41 = vcombine.low %v2462_v36, %v2463_v37  ;;  %v1887_v61 = vshrl.u32 %v2508_v51, 16  ;;  %v1890_v62 = vshll.u32 %v2508_v51, 16 }
  0x58   : > { %2709 = vmatpush3.bf16.msra.mxu1 %v3013_v59  ;;  %v653_v59 = vrot.slane %v651_v49, 5  ;;  %v2506_v49 = vld [vmem:[%s3147_s17 + $0xa0] sm:$0xf]  ;;  %v1826_v23 = vshll.u32 %v2499_v2, 16 }
  0x59   : > { %2805 = vmatpush3.bf16.msra.mxu0 %v3014_v6  ;;  %2710 = vmatprep.subr.bf16.mxu1 %v3015_v11  ;;  %v648_v6 = vor.u32 %v647_v58, %v644_v55  ;;  %v682_v34 = vsel %vm3221_vm2, %v677_v29, %v681_v18  ;;  %v1873_v56 = vshrl.u32 %v2506_v49, 16  ;;  %v3035_v58 = vld [vmem:[%s3509_s1 + $0xf8] sm:$0xff]   ;;  %v841_v18 = vld [vmem:[%s3147_s17 + $0x88] sm:$0xf] }
  0x5a   : > { %2806 = vmatprep.subr.bf16.mxu0 %v3016_v15 }
  0x5b   : > { %v1875_v9 = vrot.slane %v1873_v56, 4  ;;  %v2502_v56 = vld [vmem:[%s3147_s17 + $0x60] sm:$0xf] }
  0x5c   : > { %2711 = vmatpush3.bf16.msra.mxu1 %v3015_v11  ;;  %v658_v11 = vrot.slane %v656_v1, 4  ;;  %v2465_v1 = vld [vmem:[%s3147_s17 + $0x84] sm:$0xf] }
  0x5d   : > { %2807 = vmatpush3.bf16.msra.mxu0 %v3016_v15  ;;  %2712 = vmatprep.subr.bf16.mxu1 %v3017_v24  ;;  %v649_v15 = vrot.slane %v648_v6, 4  ;;  %v2487_v17 = vcombine.low %v2464_v0, %v2465_v1  ;;  %v1845_v0 = vshrl.u32 %v2502_v56, 16  ;;  %v1848_v1 = vshll.u32 %v2502_v56, 16 }
  0x5e   : > { %2808 = vmatprep.subr.bf16.mxu0 %v3018_v26  ;;  %v662_v20 = vor.u32 %v661_v12, %v658_v11  ;;  %v1889_v11 = vrot.slane %v1887_v61, 4  ;;  %v1892_v12 = vrot.slane %v1890_v62, 5 }
  0x5f   : > { %v654_v22 = vsel %vm3221_vm2, %v649_v15, %v653_v59  ;;  %v3036_v59 = vld [vmem:[%s3509_s1 + $0x1f8] sm:$0xff]   ;;  %v2509_v15 = vld [vmem:[%s3147_s17 + $0xd0] sm:$0x1] }
  0x60   : > { %2713 = vmatpush3.bf16.msra.mxu1 %v3017_v24  ;;  %v2433_v24 = vld [vmem:[%s3147_s17 + $0x100] sm:$0xf]  ;;  %v663_v27 = vrot.slane %v662_v20, 4  ;;  %v2466_v20 = vld [vmem:[%s3147_s17 + $0xa4] sm:$0xf]  ;;  %v1896_v29 = vshll.u32 %v2509_v15, 16 }
  0x61   : > { %2809 = vmatpush3.bf16.msra.mxu0 %v3018_v26  ;;  %2714 = vmatprep.subr.bf16.mxu1 %v3019_v31  ;;  %v2332_v26 = vcombine.low %v640_v19, %v654_v22  ;;  %v2453_v35 = vcombine.low %v2432_v21, %v2433_v24  ;;  %v842_v19 = vld [vmem:[%s3147_s17 + $0xa8] sm:$0xf]  ;;  %v2467_v21 = vld [vmem:[%s3147_s17 + $0xc4] sm:$0xf]  ;;  %v2513_v15 = vld [vmem:[%s3147_s17 + $0x110] sm:$0x1] }
  0x62   : > { %2810 = vmatprep.subr.bf16.mxu0 %v3020_v32  ;;  %v668_v30 = vsel %vm3221_vm2, %v663_v27, %v667_v13  ;;  %v3037_v13 = vld [vmem:[%s3509_s1 + $0x200] sm:$0xff]  }
  0x63   : > { %v2333_v38 = vcombine.low %v668_v30, %v682_v34  ;;  %v3038_v30 = vld [vmem:[%s3509_s1 + $0x208] sm:$0xff]  }
  0x64   : > { %2715 = vmatpush3.bf16.msra.mxu1 %v3019_v31  ;;  %v837_v31 = vld [vmem:[%s3147_s17 + $0x8] sm:$0xf] }
  0x65   : > { %2811 = vmatpush3.bf16.msra.mxu0 %v3020_v32  ;;  %2724 = vmatprep.subr.bf16.mxu1 %v3021_v40  ;;  %v838_v32 = vld [vmem:[%s3147_s17 + $0x28] sm:$0xf] }
  0x66   : > { %2820 = vmatprep.subr.bf16.mxu0 %v3022_v46 }
  0x67   : > { %2717 = vmatmul.mubr.bf16.vlgmr.msra.gmra.mrb[0].mxu1 %v2331_v57  ;;  %v1876_v57 = vshll.u32 %v2506_v49, 16 }
  0x68   : > { %2725 = vmatpush3.bf16.msra.mxu1 %v3021_v40  ;;  %2813 = vmatmul.mubr.bf16.vlgmr.msra.gmra.mrb[0].mxu0 %v2451_v47  ;;  %v2358_v40 = vcombine.low %v837_v31, %v838_v32  ;;  %v2500_v47 = vld [vmem:[%s3147_s17 + $0x40] sm:$0xf]  ;;  %v2360_v31 = vcombine.low %v841_v18, %v842_v19  ;;  %v2488_v32 = vcombine.low %v2466_v20, %v2467_v21  ;;  %v1924_v21 = vshll.u32 %v2513_v15, 16 }
  0x69   : > { %2821 = vmatpush3.bf16.msra.mxu0 %v3022_v46  ;;  %2726 = vmatprep.subr.bf16.mxu1 %v3023_v5  ;;  %v2498_v46 = vld [vmem:[%s3147_s17 + $0x20] sm:$0xf]  ;;  %v1831_v54 = vshrl.u32 %v2500_v47, 16  ;;  %v1834_v55 = vshll.u32 %v2500_v47, 16  ;;  %v1878_v10 = vrot.slane %v1876_v57, 5 }
  0x6a   : > { %2822 = vmatprep.subr.bf16.mxu0 %v3024_v14  ;;  %2816 = vmatprep.mubr.bf16.mxu0 %v2452_v60  ;;  %v1817_v52 = vshrl.u32 %v2498_v46, 16  ;;  %v1820_v53 = vshll.u32 %v2498_v46, 16  ;;  %v839_v60 = vld [vmem:[%s3147_s17 + $0x48] sm:$0xf]  ;;  %v2504_v57 = vld [vmem:[%s3147_s17 + $0x80] sm:$0xf] }
  0x6b   : > { %2720 = vmatprep.mubr.bf16.mxu1 %v2332_v26  ;;  %v1833_v6 = vrot.slane %v1831_v54, 4  ;;  %v1836_v7 = vrot.slane %v1834_v55, 5  ;;  %v2359_v16 = vcombine.low %v839_v60, %v840_v63  ;;  %v1879_v26 = vor.u32 %v1878_v10, %v1875_v9  ;;  %v2512_v54 = vld [vmem:[%s3147_s17 + $0x100] sm:$0xf] }
  0x6c   : > { %2727 = vmatpush3.bf16.msra.mxu1 %v3023_v5  ;;  %v1819_v4 = vrot.slane %v1817_v52, 4  ;;  %v1822_v5 = vrot.slane %v1820_v53, 5  ;;  %v3040_v52 = vld [vmem:[%s3509_s1 + $0x218] sm:$0xff]   ;;  %v2510_v53 = vld [vmem:[%s3147_s17 + $0xe0] sm:$0xf]  ;;  %v1915_v61 = vshrl.u32 %v2512_v54, 16 }
  0x6d   : > { %2823 = vmatpush3.bf16.msra.mxu0 %v3024_v14  ;;  %2728 = vmatprep.subr.bf16.mxu1 %v3025_v25  ;;  %v2507_v14 = vld [vmem:[%s3147_s17 + $0xb0] sm:$0x1]  ;;  %v1837_v24 = vor.u32 %v1836_v7, %v1833_v6  ;;  %v1904_v60 = vshll.u32 %v2510_v53, 16  ;;  %v1918_v62 = vshll.u32 %v2512_v54, 16  ;;  %v3041_v63 = vld [vmem:[%s3509_s1 + $0x220] sm:$0xff]   ;;  %v1859_v2 = vshrl.u32 %v2504_v57, 16 }
  0x6e   : > { %2824 = vmatprep.subr.bf16.mxu0 %v3026_v28  ;;  %v1823_v22 = vor.u32 %v1822_v5, %v1819_v4  ;;  %v1882_v27 = vshll.u32 %v2507_v14, 16  ;;  %v1862_v4 = vshll.u32 %v2504_v57, 16  ;;  %v3042_v5 = vld [vmem:[%s3509_s1 + $0x228] sm:$0xff]   ;;  %v2511_v6 = vld [vmem:[%s3147_s17 + $0xf0] sm:$0x1]  ;;  %v1917_v9 = vrot.slane %v1915_v61, 4 }
  0x6f   : > { %2721 = vmatmul.mubr.bf16.gmra.mrb[4].mxu1 %v2333_v38  ;;  %v1838_v36 = vrot.slane %v1837_v24, 4  ;;  %v844_v38 = vld [vmem:[%s3147_s17 + $0xe8] sm:$0xf]  ;;  %v1920_v10 = vrot.slane %v1918_v62, 5  ;;  %v1910_v19 = vshll.u32 %v2511_v6, 16 }
  0x70   : > { %2729 = vmatpush3.bf16.msra.mxu1 %v3025_v25  ;;  %2817 = vmatmul.mubr.bf16.gmra.mrb[4].mxu0 %v2453_v35  ;;  %v1840_v25 = vshll.u32 %v2501_v8, 16  ;;  %v1824_v34 = vrot.slane %v1823_v22, 4  ;;  %v1828_v35 = vrot.slane %v1826_v23, 5  ;;  %v1906_v8 = vrot.slane %v1904_v60, 5  ;;  %v3043_v22 = vld [vmem:[%s3509_s1 + $0x230] sm:$0xff]  }
  0x71   : > { %2825 = vmatpush3.bf16.msra.mxu0 %v3026_v28  ;;  %2730 = vmatprep.subr.bf16.mxu1 %v3027_v33  ;;  %v1893_v28 = vor.u32 %v1892_v12, %v1889_v11  ;;  %v1847_v11 = vrot.slane %v1845_v0, 4  ;;  %v1850_v12 = vrot.slane %v1848_v1, 5  ;;  %v1864_v14 = vrot.slane %v1862_v4, 5 }
  0x72   : > { %2826 = vmatprep.subr.bf16.mxu0 %v3028_v39  ;;  %2740 = vmatprep.mubr.bf16.mxu1 %v2358_v40  ;;  %v1842_v37 = vrot.slane %v1840_v25, 5  ;;  %v1884_v40 = vrot.slane %v1882_v27, 5  ;;  %v1829_v47 = vsel %vm3221_vm2, %v1824_v34, %v1828_v35  ;;  %v1921_v20 = vor.u32 %v1920_v10, %v1917_v9 }
  0x73   : > { %2836 = vmatprep.mubr.bf16.mxu0 %v2486_v41  ;;  %v1894_v41 = vrot.slane %v1893_v28, 4  ;;  %v1851_v23 = vor.u32 %v1850_v12, %v1847_v11  ;;  %v1912_v28 = vrot.slane %v1910_v19, 5 }
  0x74   : > { %2731 = vmatpush3.bf16.msra.mxu1 %v3027_v33  ;;  %v843_v33 = vld [vmem:[%s3147_s17 + $0xc8] sm:$0xf] }
  0x75   : > { %2827 = vmatpush3.bf16.msra.mxu0 %v3028_v39  ;;  %2732 = vmatprep.subr.bf16.mxu1 %v3029_v42  ;;  %v1880_v39 = vrot.slane %v1879_v26, 4  ;;  %v2361_v46 = vcombine.low %v843_v33, %v844_v38 }
  0x76   : > { %2828 = vmatprep.subr.bf16.mxu0 %v3030_v43 }
  0x78   : > { %2733 = vmatpush3.bf16.msra.mxu1 %v3029_v42  ;;  %v1898_v42 = vrot.slane %v1896_v29, 5  ;;  %v1922_v29 = vrot.slane %v1921_v20, 4 }
  0x79   : > { %2829 = vmatpush3.bf16.msra.mxu0 %v3030_v43  ;;  %2734 = vmatprep.subr.bf16.mxu1 %v3031_v44  ;;  %v2468_v43 = vld [vmem:[%s3147_s17 + $0xe4] sm:$0xf] }
  0x7a   : > { %2830 = vmatprep.subr.bf16.mxu0 %v3032_v45  ;;  %v1899_v51 = vsel %vm3221_vm2, %v1894_v41, %v1898_v42 }
  0x7c   : > { %2735 = vmatpush3.bf16.msra.mxu1 %v3031_v44  ;;  %v2469_v44 = vld [vmem:[%s3147_s17 + $0x104] sm:$0xf] }
  0x7d   : > { %2831 = vmatpush3.bf16.msra.mxu0 %v3032_v45  ;;  %2736 = vmatprep.subr.bf16.mxu1 %v3033_v48  ;;  %v3039_v45 = vld [vmem:[%s3509_s1 + $0x210] sm:$0xff]   ;;  %v2489_v49 = vcombine.low %v2468_v43, %v2469_v44 }
  0x7e   : > { %2832 = vmatprep.subr.bf16.mxu0 %v3034_v50 }
  0x80   : > { %2737 = vmatpush3.bf16.msra.mxu1 %v3033_v48  ;;  %v1843_v48 = vsel %vm3221_vm2, %v1838_v36, %v1842_v37 }
  0x81   : > { %2833 = vmatpush3.bf16.msra.mxu0 %v3034_v50  ;;  %2738 = vmatprep.subr.bf16.mxu1 %v3035_v58  ;;  %v1885_v50 = vsel %vm3221_vm2, %v1880_v39, %v1884_v40  ;;  %v2530_v55 = vcombine.low %v1829_v47, %v1843_v48 }
  0x82   : > { %2834 = vmatprep.subr.bf16.mxu0 %v3036_v59 }
  0x84   : > { %2739 = vmatpush3.bf16.msra.mxu1 %v3035_v58  ;;  %v2532_v58 = vcombine.low %v1885_v50, %v1899_v51 }
  0x85   : > { %2835 = vmatpush3.bf16.msra.mxu0 %v3036_v59  ;;  %2868 = vmatprep.subr.bf16.mxu1 %v3037_v13  ;;  %v1901_v59 = vshrl.u32 %v2510_v53, 16 }
  0x86   : > { %2844 = vmatprep.subr.bf16.mxu0 %v3037_v13 }
  0x87   : > { %2741 = vmatmul.mubr.bf16.vlgmr.msra.gmra.mrb[0].mxu1 %v2359_v16  ;;  %v1903_v7 = vrot.slane %v1901_v59, 4  ;;  %v2503_v16 = vld [vmem:[%s3147_s17 + $0x70] sm:$0x1] }
  0x88   : > { %2837 = vmatmul.mubr.bf16.vlgmr.msra.gmra.mrb[0].mxu0 %v2487_v17  ;;  %2876 = vmatpush3.bf16.msra.mxu1 %v3037_v13  ;;  %v2505_v17 = vld [vmem:[%s3147_s17 + $0x90] sm:$0x1]  ;;  %v1854_v24 = vshll.u32 %v2503_v16, 16 }
  0x89   : > { %2845 = vmatpush3.bf16.msra.mxu0 %v3037_v13  ;;  %2869 = vmatprep.subr.bf16.mxu1 %v3038_v30  ;;  %v1861_v13 = vrot.slane %v1859_v2, 4  ;;  %v1907_v18 = vor.u32 %v1906_v8, %v1903_v7  ;;  %v1868_v26 = vshll.u32 %v2505_v17, 16 }
  0x8a   : > { %2846 = vmatprep.subr.bf16.mxu0 %v3038_v30  ;;  %2744 = vmatprep.mubr.bf16.mxu1 %v2360_v31  ;;  %v3044_v31 = vld [vmem:[%s3509_s1 + $0x238] sm:$0xff]   ;;  %v1856_v33 = vrot.slane %v1854_v24, 5 }
  0x8b   : > { %2840 = vmatprep.mubr.bf16.mxu0 %v2488_v32  ;;  %v1865_v25 = vor.u32 %v1864_v14, %v1861_v13  ;;  %v1908_v27 = vrot.slane %v1907_v18, 4  ;;  %v1852_v32 = vrot.slane %v1851_v23, 4  ;;  %v1870_v35 = vrot.slane %v1868_v26, 5 }
  0x8c   : > { %2877 = vmatpush3.bf16.msra.mxu1 %v3038_v30 }
  0x8d   : > { %2847 = vmatpush3.bf16.msra.mxu0 %v3038_v30  ;;  %2870 = vmatprep.subr.bf16.mxu1 %v3039_v45  ;;  %v1926_v30 = vrot.slane %v1924_v21, 5  ;;  %v1866_v34 = vrot.slane %v1865_v25, 4  ;;  %v1913_v36 = vsel %vm3221_vm2, %v1908_v27, %v1912_v28  ;;  %v1857_v38 = vsel %vm3221_vm2, %v1852_v32, %v1856_v33 }
  0x8e   : > { %2848 = vmatprep.subr.bf16.mxu0 %v3039_v45 }
  0x8f   : > { %2745 = vmatmul.mubr.bf16.gmra.mrb[4].mxu1 %v2361_v46  ;;  %v1927_v37 = vsel %vm3221_vm2, %v1922_v29, %v1926_v30  ;;  %v1871_v39 = vsel %vm3221_vm2, %v1866_v34, %v1870_v35  ;;  %v2126_v35 = vlaneseq }
  0x90   : > { %2841 = vmatmul.mubr.bf16.gmra.mrb[4].mxu0 %v2489_v49  ;;  %2878 = vmatpush3.bf16.msra.mxu1 %v3039_v45  ;;  %v2533_v40 = vcombine.low %v1913_v36, %v1927_v37  ;;  %v2531_v41 = vcombine.low %v1857_v38, %v1871_v39 }
  0x91   : > { %2849 = vmatpush3.bf16.msra.mxu0 %v3039_v45  ;;  %2871 = vmatprep.subr.bf16.mxu1 %v3040_v52 }
  0x92   : > { %2850 = vmatprep.subr.bf16.mxu0 %v3040_v52  ;;  %2860 = vmatprep.mubr.bf16.mxu0 %v2530_v55 }
  0x93   : > { %2864 = vmatprep.mubr.bf16.mxu1 %v2532_v58 }
  0x94   : > { %2879 = vmatpush3.bf16.msra.mxu1 %v3040_v52 }
  0x95   : > { %2851 = vmatpush3.bf16.msra.mxu0 %v3040_v52  ;;  %2872 = vmatprep.subr.bf16.mxu1 %v3041_v63 }
  0x96   : > { %2852 = vmatprep.subr.bf16.mxu0 %v3041_v63 }
  0x98   : > { %2880 = vmatpush3.bf16.msra.mxu1 %v3041_v63 }
  0x99   : > { %2853 = vmatpush3.bf16.msra.mxu0 %v3041_v63  ;;  %2873 = vmatprep.subr.bf16.mxu1 %v3042_v5 }
  0x9a   : > { %2854 = vmatprep.subr.bf16.mxu0 %v3042_v5 }
  0x9c   : > { %2881 = vmatpush3.bf16.msra.mxu1 %v3042_v5 }
  0x9d   : > { %2855 = vmatpush3.bf16.msra.mxu0 %v3042_v5  ;;  %2874 = vmatprep.subr.bf16.mxu1 %v3043_v22 }
  0x9e   : > { %2856 = vmatprep.subr.bf16.mxu0 %v3043_v22 }
  0xa0   : > { %2882 = vmatpush3.bf16.msra.mxu1 %v3043_v22 }
  0xa1   : > { %2857 = vmatpush3.bf16.msra.mxu0 %v3043_v22  ;;  %2875 = vmatprep.subr.bf16.mxu1 %v3044_v31 }
  0xa2   : > { %2858 = vmatprep.subr.bf16.mxu0 %v3044_v31 }
  0xa4   : > { %2883 = vmatpush3.bf16.msra.mxu1 %v3044_v31 }
  0xa5   : > { %2859 = vmatpush3.bf16.msra.mxu0 %v3044_v31 }
  0xa7   : > { %2865 = vmatmul.mubr.bf16.vlgmr.msra.gmra.mrb[8].mxu1 %v2533_v40  ;;  %v2127_v40 = vshrl.u32 %v2126_v35, 7 }
  0xa8   : > { %2861 = vmatmul.mubr.bf16.vlgmr.msra.gmra.mrb[0].mxu0 %v2531_v41 }
  0xa9   : > { %vm2129_vm3 = vcmp.eq.s32.totalorder %v2127_v40, 1  ;;  %vm2128_vm4 = vcmp.eq.s32.totalorder %v2127_v40, 0 }
 0x15a   : > { %v2742_v42 = vpop.f32.mrb[0].mxu1 }
 0x15b   : > { %v968_v43 = vpop.f32.mrb[1].mxu1 }
 0x15c   : > { %v2743_v44 = vpop.f32.mrb[2].mxu1 }
 0x15d   : > { %v971_v45 = vpop.f32.mrb[3].mxu1 }
 0x162   : > { %v2746_v46 = vpop.f32.mrb[4].mxu1 }
 0x163   : > { %v2842_v47 = vpop.f32.mrb[4].mxu0  ;;  %v984_v48 = vpop.f32.mrb[5].mxu1 }
 0x164   : > { %v2888_v49 = vadd.f32 %v2842_v47, %v2746_v46  ;;  %v1777_v50 = vpop.f32.mrb[5].mxu0  ;;  %v2747_v51 = vpop.f32.mrb[6].mxu1 }
 0x165   : > { %v2890_v3 = vadd.f32 %v1777_v50, %v984_v48  ;;  %v2843_v52 = vpop.f32.mrb[6].mxu0  ;;  %v987_v53 = vpop.f32.mrb[7].mxu1 }
 0x166   : > { %v2892_v54 = vadd.f32 %v2843_v52, %v2747_v51  ;;  %v1780_v55 = vpop.f32.mrb[7].mxu0 }
 0x167   : > { %v2894_v56 = vadd.f32 %v1780_v55, %v987_v53 }
 0x17a   : > { %v2866_v57 = vpop.f32.mrb[8].mxu1 }
 0x17b   : > { %v2862_v58 = vpop.f32.mrb[0].mxu0  ;;  %v2889_v59 = vadd.f32 %v2888_v49, %v2866_v57  ;;  %v2059_v60 = vpop.f32.mrb[9].mxu1 }
 0x17c   : > { %v2884_v61 = vadd.f32 %v2862_v58, %v2742_v42  ;;  %v2043_v62 = vpop.f32.mrb[1].mxu0  ;;  %v2891_v63 = vadd.f32 %v2890_v3, %v2059_v60  ;;  %v2867_v0 = vpop.f32.mrb[10].mxu1 }
 0x17d   : > { %2088 = vst [vmem:[%s219_s19 + $0x30] sm:$0xff] %v2889_v59  ;;  %v2885_v1 = vadd.f32 %v2043_v62, %v968_v43  ;;  %v2863_v2 = vpop.f32.mrb[2].mxu0  ;;  %v2893_v4 = vadd.f32 %v2892_v54, %v2867_v0  ;;  %v2062_v5 = vpop.f32.mrb[11].mxu1  ;;  %v2110_v25 = vmul.f32 %v2889_v59, %v2889_v59 }
 0x17e   : > { %2084 = vst [vmem:[%s219_s19 + $0x10] sm:$0xff] %v2884_v61  ;;  %2086 = vst [vmem:[%s219_s19 + $0x20] sm:$0xff] %v2891_v63  ;;  %v2886_v6 = vadd.f32 %v2863_v2, %v2743_v44  ;;  %v2046_v7 = vpop.f32.mrb[3].mxu0  ;;  %v2895_v8 = vadd.f32 %v2894_v56, %v2062_v5  ;;  %v2106_v13 = vmul.f32 %v2884_v61, %v2884_v61 }
 0x17f   : > { %2082 = vst [vmem:[%s219_s19] sm:$0xff] %v2885_v1  ;;  %2089 = vst [vmem:[%s219_s19 + $0x38] sm:$0xff] %v2893_v4  ;;  %v2887_v9 = vadd.f32 %v2046_v7, %v971_v45  ;;  %v2104_v10 = vmul.f32 %v2885_v1, %v2885_v1  ;;  %v2108_v19 = vmul.f32 %v2891_v63, %v2891_v63 }
 0x180   : > { %2085 = vst [vmem:[%s219_s19 + $0x18] sm:$0xff] %v2886_v6  ;;  %2087 = vst [vmem:[%s219_s19 + $0x28] sm:$0xff] %v2895_v8  ;;  %v2107_v16 = vmul.f32 %v2886_v6, %v2886_v6  ;;  %v2109_v23 = vmul.f32 %v2895_v8, %v2895_v8  ;;  %v2111_v28 = vmul.f32 %v2893_v4, %v2893_v4 }
 0x181   : > { %2083 = vst [vmem:[%s219_s19 + $0x8] sm:$0xff] %v2887_v9  ;;  %v2090_v11 = vadd.f32 %v2887_v9, %v2885_v1  ;;  %v2105_v12 = vmul.f32 %v2887_v9, %v2887_v9 }
 0x183   : > { %v2091_v14 = vadd.f32 %v2884_v61, %v2090_v11  ;;  %v2112_v15 = vadd.f32 %v2105_v12, %v2104_v10 }
 0x185   : > { %v2113_v17 = vadd.f32 %v2112_v15, %v2106_v13  ;;  %v2092_v18 = vadd.f32 %v2886_v6, %v2091_v14 }
 0x187   : > { %v2093_v20 = vadd.f32 %v2891_v63, %v2092_v18  ;;  %v2114_v21 = vadd.f32 %v2113_v17, %v2107_v16 }
 0x189   : > { %v2094_v22 = vadd.f32 %v2895_v8, %v2093_v20  ;;  %v2115_v24 = vadd.f32 %v2114_v21, %v2108_v19 }
 0x18b   : > { %v2095_v26 = vadd.f32 %v2889_v59, %v2094_v22  ;;  %v2116_v27 = vadd.f32 %v2115_v24, %v2109_v23 }
 0x18d   : > { %v2096_v29 = vadd.f32 %v2893_v4, %v2095_v26  ;;  %v2117_v30 = vadd.f32 %v2116_v27, %v2110_v25 }
 0x18f   : > { %v2097_v31 = vrot.slane %v2096_v29, 4  ;;  %v2118_v32 = vadd.f32 %v2117_v30, %v2111_v28 }
 0x191   : > { %v2098_v33 = vadd.f32 %v2097_v31, %v2096_v29  ;;  %v2119_v34 = vrot.slane %v2118_v32, 4 }
 0x193   : > { %v2099_v36 = vrot.slane %v2098_v33, 2  ;;  %v2120_v37 = vadd.f32 %v2119_v34, %v2118_v32 }
 0x195   : > { %v2100_v38 = vadd.f32 %v2099_v36, %v2098_v33  ;;  %v2121_v39 = vrot.slane %v2120_v37, 2 }
 0x197   : > { %v2122_v41 = vadd.f32 %v2121_v39, %v2120_v37  ;;  %v2101_v42 = vrot.slane %v2100_v38, 1 }
 0x199   : > { %v2123_v43 = vrot.slane %v2122_v41, 1  ;;  %v2102_v45 = vadd.f32 %v2101_v42, %v2100_v38 }
 0x19b   : > { %v2124_v44 = vadd.f32 %v2123_v43, %v2122_v41 }
 0x19d   : > { %v2130_v46 = vsel %vm2129_vm3, %v2124_v44, 0.0 }
 0x19e   : > { %v2131_v47 = vsel %vm2128_vm4, %v2102_v45, %v2130_v46 }
 0x19f   : > { %2132 = vst [vmem:[%s227_s22] sm:$0xff] %v2131_v47 }
 0x1a0 PF: > { %s14_s14 = sadd.s32 1, %s3067_s14   ;;  %s3514_s12 = smov %s3063_s13 }
 0x1a1   : > { %p11_p6 = scmp.ge.s32.totalorder %s14_s14, 4   ;;  %s3515_s13 = smov %s3517_s15 }
 0x1a3   :  { %13 = sbr.rel (!%p11_p6) target bundleno = 2 (0x2), region = 82 }

// kernel: basic_block_forward.5
= control target key start
LH: loop header
LB: loop body
LE: loop exit
PB: predicated region body
PF: predicated region fallthrough
CT: control target
= control target key end

     0   :  { %s2970_s18 = smov 0   ;;  %s2972_s19 = smov 0   ;;  %s3388_s0 = inlined_call_operand.vmem [shape: f32[2,8,8,128], index: 0, kind: input, shape index: {}]   ;;  %s3389_s1 = inlined_call_operand.vmem [shape: f32[1,128], index: 1, kind: input, shape index: {}]   ;;  %s3390_s2 = inlined_call_operand.vmem [shape: f32[1,128], index: 2, kind: input, shape index: {}]   ;;  %s3391_s3 = inlined_call_operand.vmem [shape: bf16[9,128,128], index: 3, kind: input, shape index: {}]   ;;  %s3392_s4 = inlined_call_operand.vmem [shape: f32[128,128], index: 4, kind: output, shape index: {0}]   ;;  %s3393_s5 = inlined_call_operand.vmem [shape: f32[2,8,128], index: 5, kind: output, shape index: {1}]  }
   0x1   :  { %s2974_s20 = smov 0  }
   0x2 LB: > { %s25_s21 = sadd.s32 1, %s2933_s19  ;;  %p2131_p0 = scmp.ge.s32.totalorder %s2937_s20, 1  ;;  %s2937_s20 = sphi %s2974_s20, %s16_s20   ;;  %s2933_s19 = sphi %s2972_s19, %s3395_s19   ;;  %s2929_s18 = sphi %s2970_s18, %s3394_s18  }
   0x3   : > { %p26_p1 = scmp.ge.s32.totalorder %s25_s21, 2  ;;  %p215_p2 = scmp.lt.s32.totalorder %s2937_s20, 3 }
   0x5   : > { %s3397_s21 = smov (%p26_p1, %s25_s21), 0  ;;  %p216_p3 = pnand %p2131_p0, %p215_p2 }
   0x6   : > { %v2843_v0 = vld [vmem:[%s3391_s3 + $0x40] sm:$0xff] (!%p216_p3)   ;;  %v2845_v2 = vld [vmem:[%s3391_s3 + $0x48] sm:$0xff] (!%p216_p3)   ;;  %p257_p4 = scmp.lt.s32.totalorder (!%p216_p3), %s2929_s18, 1  ;;  %v2939_v3 = vmov (!%p216_p3), 0.0   ;;  %v2847_v5 = vld [vmem:[%s3391_s3 + $0x50] sm:$0xff] (!%p216_p3)   ;;  %s2134_s10 = sshll.u32 (!%p216_p3), %s2929_s18, 3 }
   0x7   : > { %219 = sbr.rel (%p216_p3) target bundleno = 416 (0x1a0), region = 36  ;;  %v2844_v1 = vld [vmem:[%s3391_s3 + $0x100] sm:$0xff] (!%p216_p3)   ;;  %2522 = vmatprep.subr.bf16.mxu1 (!%p216_p3), %v2843_v0  ;;  %285 = vst [vmem:[#allocation2] sm:$0xff] (!%p216_p3), %v2939_v3  ;;  %286 = vst [vmem:[#allocation2 + $0x8] sm:$0x3] (!%p216_p3), %v2939_v3  ;;  %v2846_v4 = vld [vmem:[%s3391_s3 + $0x108] sm:$0xff] (!%p216_p3)  }
   0x8   : > { %287 = vst [vmem:[#allocation2 + $0x10] sm:$0xff] (!%p216_p3), %v2939_v3  ;;  %288 = vst [vmem:[#allocation2 + $0x18] sm:$0x3] (!%p216_p3), %v2939_v3  ;;  %2618 = vmatprep.subr.bf16.mxu0 (!%p216_p3), %v2844_v1  ;;  %2523 = vmatpush3.bf16.msra.mxu1 (!%p216_p3), %v2843_v0  ;;  %v2848_v6 = vld [vmem:[%s3391_s3 + $0x110] sm:$0xff] (!%p216_p3)   ;;  %v2849_v7 = vld [vmem:[%s3391_s3 + $0x58] sm:$0xff] (!%p216_p3)   ;;  %p267_p5 = scmp.lt.s32.totalorder (!%p216_p3), %s2134_s10, 15 }
   0x9   : > { %289 = vst [vmem:[#allocation2 + $0x20] sm:$0xff] (!%p216_p3), %v2939_v3  ;;  %290 = vst [vmem:[#allocation2 + $0x28] sm:$0x3] (!%p216_p3), %v2939_v3  ;;  %2619 = vmatpush3.bf16.msra.mxu0 (!%p216_p3), %v2844_v1  ;;  %2524 = vmatprep.subr.bf16.mxu1 (!%p216_p3), %v2845_v2  ;;  %v2850_v8 = vld [vmem:[%s3391_s3 + $0x118] sm:$0xff] (!%p216_p3)   ;;  %v2851_v9 = vld [vmem:[%s3391_s3 + $0x60] sm:$0xff] (!%p216_p3)  }
   0xa   : > { %291 = vst [vmem:[#allocation2 + $0x30] sm:$0xff] (!%p216_p3), %v2939_v3  ;;  %292 = vst [vmem:[#allocation2 + $0x38] sm:$0x3] (!%p216_p3), %v2939_v3  ;;  %2620 = vmatprep.subr.bf16.mxu0 (!%p216_p3), %v2846_v4  ;;  %v2852_v10 = vld [vmem:[%s3391_s3 + $0x120] sm:$0xff] (!%p216_p3)   ;;  %v2853_v11 = vld [vmem:[%s3391_s3 + $0x68] sm:$0xff] (!%p216_p3)  }
   0xb   : > { %293 = vst [vmem:[#allocation2 + $0x40] sm:$0xff] (!%p216_p3), %v2939_v3  ;;  %294 = vst [vmem:[#allocation2 + $0x48] sm:$0x3] (!%p216_p3), %v2939_v3  ;;  %v3058_v12 = vld [vmem:[%s3389_s1] ss:$0 sm:$0xff] (!%p216_p3)  ;;  %v2854_v15 = vld [vmem:[%s3391_s3 + $0x128] sm:$0xff] (!%p216_p3)  }
   0xc   : > { %295 = vst [vmem:[#allocation2 + $0x50] sm:$0xff] (!%p216_p3), %v2939_v3  ;;  %296 = vst [vmem:[#allocation2 + $0x58] sm:$0x3] (!%p216_p3), %v2939_v3  ;;  %2525 = vmatpush3.bf16.msra.mxu1 (!%p216_p3), %v2845_v2  ;;  %v3063_v13 = vld [vmem:[%s3390_s2] ss:$0 sm:$0xff] (!%p216_p3)  ;;  %v2855_v17 = vld [vmem:[%s3391_s3 + $0x70] sm:$0xff] (!%p216_p3)  }
   0xd   : > { %297 = vst [vmem:[#allocation2 + $0x60] sm:$0xff] (!%p216_p3), %v2939_v3  ;;  %298 = vst [vmem:[#allocation2 + $0x68] sm:$0x3] (!%p216_p3), %v2939_v3  ;;  %2621 = vmatpush3.bf16.msra.mxu0 (!%p216_p3), %v2846_v4  ;;  %2526 = vmatprep.subr.bf16.mxu1 (!%p216_p3), %v2847_v5  ;;  %v2856_v25 = vld [vmem:[%s3391_s3 + $0x130] sm:$0xff] (!%p216_p3)   ;;  %v2857_v33 = vld [vmem:[%s3391_s3 + $0x78] sm:$0xff] (!%p216_p3)  }
   0xe   : > { %299 = vst [vmem:[#allocation2 + $0x70] sm:$0xff] %v2939_v3  ;;  %300 = vst [vmem:[#allocation2 + $0x78] sm:$0x3] %v2939_v3  ;;  %s3032_s9 = scalar_select %p257_p4, %s2929_s18, 1  ;;  %2622 = vmatprep.subr.bf16.mxu0 %v2848_v6  ;;  %v390_v20 = vld [vmem:[#allocation2 + $0x1] sm:$0xff]  ;;  %v2858_v35 = vld [vmem:[%s3391_s3 + $0x138] sm:$0xff]  }
   0xf   : > { %301 = vst [vmem:[#allocation2 + $0x80] sm:$0xff] %v2939_v3  ;;  %302 = vst [vmem:[#allocation2 + $0x88] sm:$0x3] %v2939_v3  ;;  %v2859_v38 = vld [vmem:[%s3391_s3] sm:$0xff]   ;;  %v2861_v43 = vld [vmem:[%s3391_s3 + $0x8] sm:$0xff]   ;;  %s3399_s10 = smov (!%p267_p5, %s2134_s10), 15 }
  0x10   : > { %303 = vst [vmem:[#allocation2 + $0x90] sm:$0xff] %v2939_v3  ;;  %304 = vst [vmem:[#allocation2 + $0x98] sm:$0x3] %v2939_v3  ;;  %s2377_s14 = sshll.u32 %s3032_s9, 6  ;;  %2527 = vmatpush3.bf16.msra.mxu1 %v2847_v5  ;;  %v2860_v39 = vld [vmem:[%s3391_s3 + $0x140] sm:$0xff]   ;;  %v2862_v46 = vld [vmem:[%s3391_s3 + $0x148] sm:$0xff]  }
  0x11   : > { %2623 = vmatpush3.bf16.msra.mxu0 %v2848_v6  ;;  %2528 = vmatprep.subr.bf16.mxu1 %v2849_v7  ;;  %s3050_s25 = scalar_lea.vmem %s3388_s0, %s2377_s14  ;;  %v2863_v55 = vld [vmem:[%s3391_s3 + $0x10] sm:$0xff]   ;;  %v2865_v4 = vld [vmem:[%s3391_s3 + $0x18] sm:$0xff]   ;;  %s2135_s11 = sshll.u32 %s3399_s10, 3 }
  0x12   : > { %2624 = vmatprep.subr.bf16.mxu0 %v2850_v8  ;;  %v305_v14 = vld [vmem:[%s3050_s25] sm:$0xff]  ;;  %v306_v18 = vld [vmem:[%s3050_s25 + $0x8] sm:$0xff]  ;;  %v307_v22 = vld [vmem:[%s3050_s25 + $0x10] sm:$0xff]  ;;  %s273_s14 = scalar_lea.vmem %s3392_s4, %s2135_s11  ;;  %s2136_s18 = sshll.u32 %s3032_s9, 3 }
  0x13   : > { %v319_v16 = vmul.f32 %v3058_v12, %v305_v14  ;;  %v320_v21 = vmul.f32 %v3058_v12, %v306_v18  ;;  %v321_v23 = vmul.f32 %v3058_v12, %v307_v22  ;;  %v308_v24 = vld [vmem:[%s3050_s25 + $0x18] sm:$0xff]  ;;  %v309_v41 = vld [vmem:[%s3050_s25 + $0x20] sm:$0xff]  ;;  %v310_v45 = vld [vmem:[%s3050_s25 + $0x28] sm:$0xff]  ;;  %s281_s17 = scalar_lea.vmem %s3393_s5, %s2136_s18 }
  0x14   : > { %2529 = vmatpush3.bf16.msra.mxu1 %v2849_v7  ;;  %v322_v28 = vmul.f32 %v3058_v12, %v308_v24  ;;  %v323_v44 = vmul.f32 %v3058_v12, %v309_v41  ;;  %v324_v47 = vmul.f32 %v3058_v12, %v310_v45  ;;  %v311_v49 = vld [vmem:[%s3050_s25 + $0x30] sm:$0xff]  ;;  %v312_v50 = vld [vmem:[%s3050_s25 + $0x38] sm:$0xff]  ;;  %v2876_v22 = vld [vmem:[%s3391_s3 + $0x180] sm:$0xff]  }
  0x15   : > { %2625 = vmatpush3.bf16.msra.mxu0 %v2850_v8  ;;  %2530 = vmatprep.subr.bf16.mxu1 %v2851_v9  ;;  %v333_v19 = vadd.f32 %v3063_v13, %v319_v16  ;;  %v334_v27 = vadd.f32 %v3063_v13, %v320_v21  ;;  %v335_v29 = vadd.f32 %v3063_v13, %v321_v23  ;;  %v2864_v59 = vld [vmem:[%s3391_s3 + $0x150] sm:$0xff]   ;;  %v2866_v7 = vld [vmem:[%s3391_s3 + $0x158] sm:$0xff]  }
  0x16   : > { %2626 = vmatprep.subr.bf16.mxu0 %v2852_v10  ;;  %v336_v32 = vadd.f32 %v3063_v13, %v322_v28  ;;  %v337_v48 = vadd.f32 %v3063_v13, %v323_v44  ;;  %v338_v51 = vadd.f32 %v3063_v13, %v324_v47  ;;  %v325_v52 = vmul.f32 %v3058_v12, %v311_v49  ;;  %v2871_v14 = vld [vmem:[%s3391_s3 + $0x30] sm:$0xff]   ;;  %v2873_v16 = vld [vmem:[%s3391_s3 + $0x38] sm:$0xff]   ;;  %v2883_v47 = vld [vmem:[%s3391_s3 + $0xa0] sm:$0xff]  }
  0x17   : > { %v341_v26 = vmax.f32 %v333_v19, 0.0  ;;  %v342_v31 = vmax.f32 %v334_v27, 0.0  ;;  %v343_v34 = vmax.f32 %v335_v29, 0.0  ;;  %v326_v53 = vmul.f32 %v3058_v12, %v312_v50  ;;  %v2869_v12 = vld [vmem:[%s3391_s3 + $0x28] sm:$0xff]   ;;  %v2881_v44 = vld [vmem:[%s3391_s3 + $0x98] sm:$0xff]  }
  0x18   : > { %2531 = vmatpush3.bf16.msra.mxu1 %v2851_v9  ;;  %v344_v37 = vmax.f32 %v336_v32, 0.0  ;;  %v345_v54 = vmax.f32 %v337_v48, 0.0  ;;  %v346_v56 = vmax.f32 %v338_v51, 0.0  ;;  %v339_v57 = vadd.f32 %v3063_v13, %v325_v52  ;;  %v2877_v27 = vld [vmem:[%s3391_s3 + $0x88] sm:$0xff]   ;;  %v2882_v45 = vld [vmem:[%s3391_s3 + $0x198] sm:$0xff]   ;;  %v2884_v48 = vld [vmem:[%s3391_s3 + $0x1a0] sm:$0xff]  }
  0x19   : > { %2627 = vmatpush3.bf16.msra.mxu0 %v2852_v10  ;;  %2532 = vmatprep.subr.bf16.mxu1 %v2853_v11  ;;  %350 = vst [vmem:[#allocation2 + $0x11] sm:$0xff] %v341_v26  ;;  %v2378_v30 = vpack.c.bf16 %v341_v26, %v390_v20  ;;  %351 = vst [vmem:[#allocation2 + $0x21] sm:$0xff] %v342_v31  ;;  %v2394_v36 = vpack.c.bf16 %v342_v31, %v341_v26  ;;  %v2867_v10 = vld [vmem:[%s3391_s3 + $0x20] sm:$0xff]   ;;  %v2885_v49 = vld [vmem:[%s3391_s3 + $0xa8] sm:$0xff]  }
  0x1a   : > { %2628 = vmatprep.subr.bf16.mxu0 %v2854_v15  ;;  %352 = vst [vmem:[#allocation2 + $0x31] sm:$0xff] %v343_v34  ;;  %353 = vst [vmem:[#allocation2 + $0x41] sm:$0xff] %v344_v37  ;;  %v3098_v40 = vpack.c.bf16 %v343_v34, %v342_v31  ;;  %v2395_v42 = vpack.c.bf16 %v344_v37, %v343_v34  ;;  %v340_v58 = vadd.f32 %v3063_v13, %v326_v53  ;;  %v2870_v13 = vld [vmem:[%s3391_s3 + $0x168] sm:$0xff]   ;;  %v2875_v20 = vld [vmem:[%s3391_s3 + $0x80] sm:$0xff]  }
  0x1b   : > { %2538 = vmatprep.mubr.bf16.mxu1 %v2378_v30  ;;  %2634 = vmatprep.mubr.bf16.mxu0 %v2394_v36  ;;  %354 = vst [vmem:[#allocation2 + $0x51] sm:$0xff] %v345_v54  ;;  %v3125_v60 = vpack.c.bf16 %v345_v54, %v344_v37  ;;  %355 = vst [vmem:[#allocation2 + $0x61] sm:$0xff] %v346_v56  ;;  %v2396_v61 = vpack.c.bf16 %v346_v56, %v345_v54  ;;  %v347_v62 = vmax.f32 %v339_v57, 0.0  ;;  %v2878_v31 = vld [vmem:[%s3391_s3 + $0x188] sm:$0xff]   ;;  %v2879_v34 = vld [vmem:[%s3391_s3 + $0x90] sm:$0xff]  }
  0x1c   : > { %2533 = vmatpush3.bf16.msra.mxu1 %v2853_v11  ;;  %v3127_v63 = vmax.f32 %v340_v58, 0.0  ;;  %v2868_v11 = vld [vmem:[%s3391_s3 + $0x160] sm:$0xff]   ;;  %v2886_v50 = vld [vmem:[%s3391_s3 + $0x1a8] sm:$0xff]   ;;  %v2887_v51 = vld [vmem:[%s3391_s3 + $0xb0] sm:$0xff]  }
  0x1d   : > { %2629 = vmatpush3.bf16.msra.mxu0 %v2854_v15  ;;  %2534 = vmatprep.subr.bf16.mxu1 %v2855_v17  ;;  %356 = vst [vmem:[#allocation2 + $0x71] sm:$0xff] %v347_v62  ;;  %v3139_v5 = vpack.c.bf16 %v347_v62, %v346_v56  ;;  %v2872_v15 = vld [vmem:[%s3391_s3 + $0x170] sm:$0xff]   ;;  %v2889_v53 = vld [vmem:[%s3391_s3 + $0xb8] sm:$0xff]   ;;  %v2892_v56 = vld [vmem:[%s3391_s3 + $0x1c0] sm:$0xff]  }
  0x1e   : > { %2630 = vmatprep.subr.bf16.mxu0 %v2856_v25  ;;  %357 = vst [vmem:[#allocation2 + $0x81] sm:$0xff] %v3127_v63  ;;  %v2397_v6 = vpack.c.bf16 %v3127_v63, %v347_v62  ;;  %v2888_v52 = vld [vmem:[%s3391_s3 + $0x1b0] sm:$0xff]   ;;  %v2890_v54 = vld [vmem:[%s3391_s3 + $0x1b8] sm:$0xff]   ;;  %v2893_v58 = vld [vmem:[%s3391_s3 + $0xc8] sm:$0xff]  }
  0x1f   : > { %v2895_v62 = vld [vmem:[%s3391_s3 + $0xd0] sm:$0xff]  }
  0x20   : > { %2535 = vmatpush3.bf16.msra.mxu1 %v2855_v17  ;;  %v3129_v0 = vld [vmem:[#allocation2 + $0x10] sm:$0xff]  ;;  %v3134_v2 = vld [vmem:[#allocation2 + $0x22] sm:$0xff]  ;;  %v2874_v17 = vld [vmem:[%s3391_s3 + $0x178] sm:$0xff]  }
  0x21   : > { %2631 = vmatpush3.bf16.msra.mxu0 %v2856_v25  ;;  %2536 = vmatprep.subr.bf16.mxu1 %v2857_v33  ;;  %v3132_v1 = vld [vmem:[#allocation2 + $0x12] sm:$0xff]  ;;  %v2382_v8 = vpack.c.bf16 %v3129_v0, %v2939_v3  ;;  %v3175_v18 = vld [vmem:[#allocation2 + $0x20] sm:$0xff] }
  0x22   : > { %2632 = vmatprep.subr.bf16.mxu0 %v2858_v35  ;;  %v2398_v9 = vpack.c.bf16 %v3134_v2, %v3132_v1  ;;  %v3177_v19 = vld [vmem:[#allocation2 + $0x30] sm:$0xff]  ;;  %v3187_v23 = vld [vmem:[#allocation2 + $0x42] sm:$0xff] }
  0x23   : > { %v3182_v21 = vld [vmem:[#allocation2 + $0x32] sm:$0xff]  ;;  %v3189_v24 = vld [vmem:[#allocation2 + $0x40] sm:$0xff]  ;;  %v2383_v26 = vpack.c.bf16 %v3177_v19, %v3175_v18 }
  0x24   : > { %2537 = vmatpush3.bf16.msra.mxu1 %v2857_v33  ;;  %v3191_v25 = vld [vmem:[#allocation2 + $0x50] sm:$0xff]  ;;  %v2399_v29 = vpack.c.bf16 %v3187_v23, %v3182_v21  ;;  %v3202_v30 = vld [vmem:[#allocation2 + $0x62] sm:$0xff]  ;;  %v3271_v57 = vpack.c.bf16 %v3182_v21, %v3134_v2 }
  0x25   : > { %2633 = vmatpush3.bf16.msra.mxu0 %v2858_v35  ;;  %2546 = vmatprep.subr.bf16.mxu1 %v2859_v38  ;;  %v3198_v28 = vld [vmem:[#allocation2 + $0x52] sm:$0xff]  ;;  %v3209_v32 = vpack.c.bf16 %v3191_v25, %v3189_v24  ;;  %v3211_v33 = vld [vmem:[#allocation2 + $0x60] sm:$0xff] }
  0x26   : > { %2642 = vmatprep.subr.bf16.mxu0 %v2860_v39  ;;  %v2400_v35 = vpack.c.bf16 %v3202_v30, %v3198_v28  ;;  %v3218_v36 = vld [vmem:[#allocation2 + $0x70] sm:$0xff] }
  0x27   : > { %2539 = vmatmul.mubr.bf16.vlgmr.msra.gmra.mrb[0].mxu1 %v3098_v40  ;;  %v3220_v37 = vld [vmem:[#allocation2 + $0x72] sm:$0xff]  ;;  %v2385_v41 = vpack.c.bf16 %v3218_v36, %v3211_v33 }
  0x28   : > { %2547 = vmatpush3.bf16.msra.mxu1 %v2859_v38  ;;  %2635 = vmatmul.mubr.bf16.vlgmr.msra.gmra.mrb[0].mxu0 %v2395_v42  ;;  %v3222_v38 = vld [vmem:[#allocation2 + $0x82] sm:$0xff]  ;;  %v2896_v2 = vld [vmem:[%s3391_s3 + $0x1d0] sm:$0xff]  }
  0x29   : > { %2643 = vmatpush3.bf16.msra.mxu0 %v2860_v39  ;;  %2548 = vmatprep.subr.bf16.mxu1 %v2861_v43  ;;  %v2880_v39 = vld [vmem:[%s3391_s3 + $0x190] sm:$0xff]   ;;  %v697_v42 = vld [vmem:[#allocation2 + $0x2] sm:$0xff] }
  0x2a   : > { %2644 = vmatprep.subr.bf16.mxu0 %v2862_v46  ;;  %2542 = vmatprep.mubr.bf16.mxu1 %v3125_v60 }
  0x2b   : > { %2638 = vmatprep.mubr.bf16.mxu0 %v2396_v61  ;;  %v3281_v61 = vpack.c.bf16 %v3198_v28, %v3187_v23  ;;  %v2913_v23 = vld [vmem:[%s3391_s3 + $0x230] sm:$0xff]  }
  0x2c   : > { %2549 = vmatpush3.bf16.msra.mxu1 %v2861_v43  ;;  %v2401_v43 = vpack.c.bf16 %v3222_v38, %v3220_v37 }
  0x2d   : > { %2645 = vmatpush3.bf16.msra.mxu0 %v2862_v46  ;;  %2550 = vmatprep.subr.bf16.mxu1 %v2863_v55  ;;  %v2386_v46 = vpack.c.bf16 %v3132_v1, %v697_v42  ;;  %v3288_v1 = vld [vmem:[#allocation2 + $0x80] sm:$0xff] }
  0x2e   : > { %2646 = vmatprep.subr.bf16.mxu0 %v2864_v59  ;;  %v2393_v21 = vpack.c.bf16 %v3288_v1, %v3218_v36 }
  0x2f   : > { %2543 = vmatmul.mubr.bf16.gmra.mrb[4].mxu1 %v3139_v5 }
  0x30   : > { %2551 = vmatpush3.bf16.msra.mxu1 %v2863_v55  ;;  %2639 = vmatmul.mubr.bf16.gmra.mrb[4].mxu0 %v2397_v6  ;;  %v2891_v55 = vld [vmem:[%s3391_s3 + $0xc0] sm:$0xff]   ;;  %v2405_v6 = vpack.c.bf16 %v2939_v3, %v3288_v1 }
  0x31   : > { %2647 = vmatpush3.bf16.msra.mxu0 %v2864_v59  ;;  %2552 = vmatprep.subr.bf16.mxu1 %v2865_v4  ;;  %v2894_v59 = vld [vmem:[%s3391_s3 + $0x1c8] sm:$0xff]   ;;  %v2899_v3 = vld [vmem:[%s3391_s3 + $0xe0] sm:$0xff]  }
  0x32   : > { %2648 = vmatprep.subr.bf16.mxu0 %v2866_v7  ;;  %2562 = vmatprep.mubr.bf16.mxu1 %v2382_v8  ;;  %v2898_v8 = vld [vmem:[%s3391_s3 + $0x1d8] sm:$0xff]  }
  0x33   : > { %2658 = vmatprep.mubr.bf16.mxu0 %v2398_v9  ;;  %v2390_v9 = vpack.c.bf16 %v3175_v18, %v3129_v0  ;;  %v2901_v0 = vld [vmem:[%s3391_s3 + $0xe8] sm:$0xff]   ;;  %v2392_v18 = vpack.c.bf16 %v3211_v33, %v3191_v25  ;;  %v1773_v25 = vld [vmem:[#allocation2 + $0x92] sm:$0xff] }
  0x34   : > { %2553 = vmatpush3.bf16.msra.mxu1 %v2865_v4  ;;  %v3296_v4 = vpack.c.bf16 %v3220_v37, %v3202_v30 }
  0x35   : > { %2649 = vmatpush3.bf16.msra.mxu0 %v2866_v7  ;;  %2554 = vmatprep.subr.bf16.mxu1 %v2867_v10  ;;  %v2897_v7 = vld [vmem:[%s3391_s3 + $0xd8] sm:$0xff]  }
  0x36   : > { %2650 = vmatprep.subr.bf16.mxu0 %v2868_v11 }
  0x38   : > { %2555 = vmatpush3.bf16.msra.mxu1 %v2867_v10  ;;  %v2900_v10 = vld [vmem:[%s3391_s3 + $0x1e0] sm:$0xff]  }
  0x39   : > { %2651 = vmatpush3.bf16.msra.mxu0 %v2868_v11  ;;  %2556 = vmatprep.subr.bf16.mxu1 %v2869_v12  ;;  %v2902_v11 = vld [vmem:[%s3391_s3 + $0x1e8] sm:$0xff]  }
  0x3a   : > { %2652 = vmatprep.subr.bf16.mxu0 %v2870_v13 }
  0x3c   : > { %2557 = vmatpush3.bf16.msra.mxu1 %v2869_v12  ;;  %v2903_v12 = vld [vmem:[%s3391_s3 + $0xf0] sm:$0xff]  }
  0x3d   : > { %2653 = vmatpush3.bf16.msra.mxu0 %v2870_v13  ;;  %2558 = vmatprep.subr.bf16.mxu1 %v2871_v14  ;;  %v2905_v13 = vld [vmem:[%s3391_s3 + $0xf8] sm:$0xff]  }
  0x3e   : > { %2654 = vmatprep.subr.bf16.mxu0 %v2872_v15 }
  0x40   : > { %2559 = vmatpush3.bf16.msra.mxu1 %v2871_v14  ;;  %v2906_v14 = vld [vmem:[%s3391_s3 + $0x1f8] sm:$0xff]  }
  0x41   : > { %2655 = vmatpush3.bf16.msra.mxu0 %v2872_v15  ;;  %2560 = vmatprep.subr.bf16.mxu1 %v2873_v16  ;;  %v2907_v15 = vld [vmem:[%s3391_s3 + $0x200] sm:$0xff]  }
  0x42   : > { %2656 = vmatprep.subr.bf16.mxu0 %v2874_v17 }
  0x44   : > { %2561 = vmatpush3.bf16.msra.mxu1 %v2873_v16  ;;  %v2391_v16 = vpack.c.bf16 %v3189_v24, %v3177_v19  ;;  %v2909_v19 = vld [vmem:[%s3391_s3 + $0x210] sm:$0xff]   ;;  %v2914_v24 = vld [vmem:[%s3391_s3 + $0x238] sm:$0xff]  }
  0x45   : > { %2657 = vmatpush3.bf16.msra.mxu0 %v2874_v17  ;;  %2570 = vmatprep.subr.bf16.mxu1 %v2875_v20  ;;  %v2908_v17 = vld [vmem:[%s3391_s3 + $0x208] sm:$0xff]  }
  0x46   : > { %2666 = vmatprep.subr.bf16.mxu0 %v2876_v22 }
  0x47   : > { %2563 = vmatmul.mubr.bf16.vlgmr.msra.gmra.mrb[0].mxu1 %v2383_v26 }
  0x48   : > { %2571 = vmatpush3.bf16.msra.mxu1 %v2875_v20  ;;  %2659 = vmatmul.mubr.bf16.vlgmr.msra.gmra.mrb[0].mxu0 %v2399_v29  ;;  %v1595_v20 = vld [vmem:[#allocation2 + $0x91] sm:$0xff] }
  0x49   : > { %2667 = vmatpush3.bf16.msra.mxu0 %v2876_v22  ;;  %2572 = vmatprep.subr.bf16.mxu1 %v2877_v27  ;;  %v2409_v22 = vpack.c.bf16 %v1595_v20, %v3127_v63  ;;  %v2912_v63 = vld [vmem:[%s3391_s3 + $0x228] sm:$0xff]  }
  0x4a   : > { %2668 = vmatprep.subr.bf16.mxu0 %v2878_v31  ;;  %2566 = vmatprep.mubr.bf16.mxu1 %v3209_v32 }
  0x4b   : > { %2662 = vmatprep.mubr.bf16.mxu0 %v2400_v35 }
  0x4c   : > { %2573 = vmatpush3.bf16.msra.mxu1 %v2877_v27 }
  0x4d   : > { %2669 = vmatpush3.bf16.msra.mxu0 %v2878_v31  ;;  %2574 = vmatprep.subr.bf16.mxu1 %v2879_v34 }
  0x4e   : > { %2670 = vmatprep.subr.bf16.mxu0 %v2880_v39 }
  0x4f   : > { %2567 = vmatmul.mubr.bf16.gmra.mrb[4].mxu1 %v2385_v41 }
  0x50   : > { %2575 = vmatpush3.bf16.msra.mxu1 %v2879_v34  ;;  %2663 = vmatmul.mubr.bf16.gmra.mrb[4].mxu0 %v2401_v43 }
  0x51   : > { %2671 = vmatpush3.bf16.msra.mxu0 %v2880_v39  ;;  %2576 = vmatprep.subr.bf16.mxu1 %v2881_v44 }
  0x52   : > { %2672 = vmatprep.subr.bf16.mxu0 %v2882_v45  ;;  %2586 = vmatprep.mubr.bf16.mxu1 %v2386_v46 }
  0x53   : > { %2682 = vmatprep.mubr.bf16.mxu0 %v2383_v26  ;;  %v2413_v26 = vpack.c.bf16 %v1773_v25, %v3222_v38 }
  0x54   : > { %2577 = vmatpush3.bf16.msra.mxu1 %v2881_v44 }
  0x55   : > { %2673 = vmatpush3.bf16.msra.mxu0 %v2882_v45  ;;  %2578 = vmatprep.subr.bf16.mxu1 %v2883_v47 }
  0x56   : > { %2674 = vmatprep.subr.bf16.mxu0 %v2884_v48 }
  0x58   : > { %2579 = vmatpush3.bf16.msra.mxu1 %v2883_v47 }
  0x59   : > { %2675 = vmatpush3.bf16.msra.mxu0 %v2884_v48  ;;  %2580 = vmatprep.subr.bf16.mxu1 %v2885_v49 }
  0x5a   : > { %2676 = vmatprep.subr.bf16.mxu0 %v2886_v50 }
  0x5c   : > { %2581 = vmatpush3.bf16.msra.mxu1 %v2885_v49 }
  0x5d   : > { %2677 = vmatpush3.bf16.msra.mxu0 %v2886_v50  ;;  %2582 = vmatprep.subr.bf16.mxu1 %v2887_v51 }
  0x5e   : > { %2678 = vmatprep.subr.bf16.mxu0 %v2888_v52 }
  0x60   : > { %2583 = vmatpush3.bf16.msra.mxu1 %v2887_v51 }
  0x61   : > { %2679 = vmatpush3.bf16.msra.mxu0 %v2888_v52  ;;  %2584 = vmatprep.subr.bf16.mxu1 %v2889_v53 }
  0x62   : > { %2680 = vmatprep.subr.bf16.mxu0 %v2890_v54 }
  0x64   : > { %2585 = vmatpush3.bf16.msra.mxu1 %v2889_v53 }
  0x65   : > { %2681 = vmatpush3.bf16.msra.mxu0 %v2890_v54  ;;  %2594 = vmatprep.subr.bf16.mxu1 %v2891_v55 }
  0x66   : > { %2690 = vmatprep.subr.bf16.mxu0 %v2892_v56 }
  0x67   : > { %2587 = vmatmul.mubr.bf16.vlgmr.msra.gmra.mrb[0].mxu1 %v3271_v57 }
  0x68   : > { %2595 = vmatpush3.bf16.msra.mxu1 %v2891_v55  ;;  %2683 = vmatmul.mubr.bf16.vlgmr.msra.gmra.mrb[0].mxu0 %v3209_v32 }
  0x69   : > { %2691 = vmatpush3.bf16.msra.mxu0 %v2892_v56  ;;  %2596 = vmatprep.subr.bf16.mxu1 %v2893_v58 }
  0x6a   : > { %2692 = vmatprep.subr.bf16.mxu0 %v2894_v59  ;;  %2590 = vmatprep.mubr.bf16.mxu1 %v3281_v61 }
  0x6b   : > { %2686 = vmatprep.mubr.bf16.mxu0 %v2385_v41 }
  0x6c   : > { %2597 = vmatpush3.bf16.msra.mxu1 %v2893_v58 }
  0x6d   : > { %2693 = vmatpush3.bf16.msra.mxu0 %v2894_v59  ;;  %2598 = vmatprep.subr.bf16.mxu1 %v2895_v62 }
  0x6e   : > { %2694 = vmatprep.subr.bf16.mxu0 %v2896_v2 }
  0x6f   : > { %2591 = vmatmul.mubr.bf16.gmra.mrb[4].mxu1 %v3296_v4 }
  0x70   : > { %2599 = vmatpush3.bf16.msra.mxu1 %v2895_v62  ;;  %2687 = vmatmul.mubr.bf16.gmra.mrb[4].mxu0 %v2405_v6 }
  0x71   : > { %2695 = vmatpush3.bf16.msra.mxu0 %v2896_v2  ;;  %2600 = vmatprep.subr.bf16.mxu1 %v2897_v7 }
  0x72   : > { %2696 = vmatprep.subr.bf16.mxu0 %v2898_v8  ;;  %2610 = vmatprep.mubr.bf16.mxu1 %v2390_v9 }
  0x73   : > { %2706 = vmatprep.mubr.bf16.mxu0 %v3098_v40  ;;  %v2904_v40 = vld [vmem:[%s3391_s3 + $0x1f0] sm:$0xff]  }
  0x74   : > { %2601 = vmatpush3.bf16.msra.mxu1 %v2897_v7 }
  0x75   : > { %2697 = vmatpush3.bf16.msra.mxu0 %v2898_v8  ;;  %2602 = vmatprep.subr.bf16.mxu1 %v2899_v3 }
  0x76   : > { %2698 = vmatprep.subr.bf16.mxu0 %v2900_v10 }
  0x78   : > { %2603 = vmatpush3.bf16.msra.mxu1 %v2899_v3 }
  0x79   : > { %2699 = vmatpush3.bf16.msra.mxu0 %v2900_v10  ;;  %2604 = vmatprep.subr.bf16.mxu1 %v2901_v0 }
  0x7a   : > { %2700 = vmatprep.subr.bf16.mxu0 %v2902_v11 }
  0x7c   : > { %2605 = vmatpush3.bf16.msra.mxu1 %v2901_v0 }
  0x7d   : > { %2701 = vmatpush3.bf16.msra.mxu0 %v2902_v11  ;;  %2606 = vmatprep.subr.bf16.mxu1 %v2903_v12 }
  0x7e   : > { %2702 = vmatprep.subr.bf16.mxu0 %v2904_v40 }
  0x80   : > { %2607 = vmatpush3.bf16.msra.mxu1 %v2903_v12 }
  0x81   : > { %2703 = vmatpush3.bf16.msra.mxu0 %v2904_v40  ;;  %2608 = vmatprep.subr.bf16.mxu1 %v2905_v13 }
  0x82   : > { %2704 = vmatprep.subr.bf16.mxu0 %v2906_v14 }
  0x84   : > { %2609 = vmatpush3.bf16.msra.mxu1 %v2905_v13 }
  0x85   : > { %2705 = vmatpush3.bf16.msra.mxu0 %v2906_v14  ;;  %2738 = vmatprep.subr.bf16.mxu1 %v2907_v15 }
  0x86   : > { %2714 = vmatprep.subr.bf16.mxu0 %v2907_v15 }
  0x87   : > { %2611 = vmatmul.mubr.bf16.vlgmr.msra.gmra.mrb[0].mxu1 %v2391_v16 }
  0x88   : > { %2707 = vmatmul.mubr.bf16.vlgmr.msra.gmra.mrb[0].mxu0 %v3125_v60  ;;  %2746 = vmatpush3.bf16.msra.mxu1 %v2907_v15  ;;  %v2910_v60 = vld [vmem:[%s3391_s3 + $0x218] sm:$0xff]  }
  0x89   : > { %2715 = vmatpush3.bf16.msra.mxu0 %v2907_v15  ;;  %2739 = vmatprep.subr.bf16.mxu1 %v2908_v17 }
  0x8a   : > { %2716 = vmatprep.subr.bf16.mxu0 %v2908_v17  ;;  %2614 = vmatprep.mubr.bf16.mxu1 %v2392_v18 }
  0x8b   : > { %2710 = vmatprep.mubr.bf16.mxu0 %v3139_v5  ;;  %v2911_v5 = vld [vmem:[%s3391_s3 + $0x220] sm:$0xff]  }
  0x8c   : > { %2747 = vmatpush3.bf16.msra.mxu1 %v2908_v17 }
  0x8d   : > { %2717 = vmatpush3.bf16.msra.mxu0 %v2908_v17  ;;  %2740 = vmatprep.subr.bf16.mxu1 %v2909_v19 }
  0x8e   : > { %2718 = vmatprep.subr.bf16.mxu0 %v2909_v19 }
  0x8f   : > { %2615 = vmatmul.mubr.bf16.gmra.mrb[4].mxu1 %v2393_v21 }
  0x90   : > { %2711 = vmatmul.mubr.bf16.gmra.mrb[4].mxu0 %v2409_v22  ;;  %2748 = vmatpush3.bf16.msra.mxu1 %v2909_v19 }
  0x91   : > { %2719 = vmatpush3.bf16.msra.mxu0 %v2909_v19  ;;  %2741 = vmatprep.subr.bf16.mxu1 %v2910_v60 }
  0x92   : > { %2720 = vmatprep.subr.bf16.mxu0 %v2910_v60  ;;  %2730 = vmatprep.mubr.bf16.mxu0 %v3271_v57 }
  0x93   : > { %2734 = vmatprep.mubr.bf16.mxu1 %v3296_v4 }
  0x94   : > { %2749 = vmatpush3.bf16.msra.mxu1 %v2910_v60 }
  0x95   : > { %2721 = vmatpush3.bf16.msra.mxu0 %v2910_v60  ;;  %2742 = vmatprep.subr.bf16.mxu1 %v2911_v5  ;;  %v1988_v60 = vlaneseq }
  0x96   : > { %2722 = vmatprep.subr.bf16.mxu0 %v2911_v5 }
  0x97   : > { %v1989_v25 = vshrl.u32 %v1988_v60, 7 }
  0x98   : > { %2750 = vmatpush3.bf16.msra.mxu1 %v2911_v5 }
  0x99   : > { %2723 = vmatpush3.bf16.msra.mxu0 %v2911_v5  ;;  %2743 = vmatprep.subr.bf16.mxu1 %v2912_v63  ;;  %vm1991_vm0 = vcmp.eq.s32.totalorder %v1989_v25, 1  ;;  %vm1990_vm1 = vcmp.eq.s32.totalorder %v1989_v25, 0 }
  0x9a   : > { %2724 = vmatprep.subr.bf16.mxu0 %v2912_v63 }
  0x9c   : > { %2751 = vmatpush3.bf16.msra.mxu1 %v2912_v63 }
  0x9d   : > { %2725 = vmatpush3.bf16.msra.mxu0 %v2912_v63  ;;  %2744 = vmatprep.subr.bf16.mxu1 %v2913_v23 }
  0x9e   : > { %2726 = vmatprep.subr.bf16.mxu0 %v2913_v23 }
  0xa0   : > { %2752 = vmatpush3.bf16.msra.mxu1 %v2913_v23 }
  0xa1   : > { %2727 = vmatpush3.bf16.msra.mxu0 %v2913_v23  ;;  %2745 = vmatprep.subr.bf16.mxu1 %v2914_v24 }
  0xa2   : > { %2728 = vmatprep.subr.bf16.mxu0 %v2914_v24 }
  0xa4   : > { %2753 = vmatpush3.bf16.msra.mxu1 %v2914_v24 }
  0xa5   : > { %2729 = vmatpush3.bf16.msra.mxu0 %v2914_v24 }
  0xa7   : > { %2735 = vmatmul.mubr.bf16.vlgmr.msra.gmra.mrb[8].mxu1 %v2413_v26 }
  0xa8   : > { %2731 = vmatmul.mubr.bf16.vlgmr.msra.gmra.mrb[0].mxu0 %v3281_v61 }
 0x15a   : > { %v2612_v27 = vpop.f32.mrb[0].mxu1 }
 0x15b   : > { %v1014_v28 = vpop.f32.mrb[1].mxu1 }
 0x15c   : > { %v2613_v29 = vpop.f32.mrb[2].mxu1 }
 0x15d   : > { %v1017_v30 = vpop.f32.mrb[3].mxu1 }
 0x162   : > { %v2616_v31 = vpop.f32.mrb[4].mxu1 }
 0x163   : > { %v2712_v32 = vpop.f32.mrb[4].mxu0  ;;  %v1030_v33 = vpop.f32.mrb[5].mxu1 }
 0x164   : > { %v2758_v34 = vadd.f32 %v2712_v32, %v2616_v31  ;;  %v1743_v35 = vpop.f32.mrb[5].mxu0  ;;  %v2617_v36 = vpop.f32.mrb[6].mxu1 }
 0x165   : > { %v2760_v37 = vadd.f32 %v1743_v35, %v1030_v33  ;;  %v2713_v39 = vpop.f32.mrb[6].mxu0  ;;  %v1033_v41 = vpop.f32.mrb[7].mxu1 }
 0x166   : > { %v2762_v38 = vadd.f32 %v2713_v39, %v2617_v36  ;;  %v1746_v42 = vpop.f32.mrb[7].mxu0 }
 0x167   : > { %v2764_v43 = vadd.f32 %v1746_v42, %v1033_v41 }
 0x17a   : > { %v2736_v44 = vpop.f32.mrb[8].mxu1 }
 0x17b   : > { %v2732_v45 = vpop.f32.mrb[0].mxu0  ;;  %v2759_v46 = vadd.f32 %v2758_v34, %v2736_v44  ;;  %v1921_v47 = vpop.f32.mrb[9].mxu1 }
 0x17c   : > { %v2754_v48 = vadd.f32 %v2732_v45, %v2612_v27  ;;  %v1905_v49 = vpop.f32.mrb[1].mxu0  ;;  %v2761_v50 = vadd.f32 %v2760_v37, %v1921_v47  ;;  %v2737_v51 = vpop.f32.mrb[10].mxu1 }
 0x17d   : > { %1950 = vst [vmem:[%s273_s14 + $0x30] sm:$0xff] %v2759_v46  ;;  %v2755_v52 = vadd.f32 %v1905_v49, %v1014_v28  ;;  %v2733_v53 = vpop.f32.mrb[2].mxu0  ;;  %v2763_v54 = vadd.f32 %v2762_v38, %v2737_v51  ;;  %v1924_v55 = vpop.f32.mrb[11].mxu1  ;;  %v1972_v13 = vmul.f32 %v2759_v46, %v2759_v46 }
 0x17e   : > { %1946 = vst [vmem:[%s273_s14 + $0x10] sm:$0xff] %v2754_v48  ;;  %1948 = vst [vmem:[%s273_s14 + $0x20] sm:$0xff] %v2761_v50  ;;  %v2756_v56 = vadd.f32 %v2733_v53, %v2613_v29  ;;  %v1908_v57 = vpop.f32.mrb[3].mxu0  ;;  %v2765_v58 = vadd.f32 %v2764_v43, %v1924_v55  ;;  %v1968_v2 = vmul.f32 %v2754_v48, %v2754_v48 }
 0x17f   : > { %1944 = vst [vmem:[%s273_s14] sm:$0xff] %v2755_v52  ;;  %1951 = vst [vmem:[%s273_s14 + $0x38] sm:$0xff] %v2763_v54  ;;  %v2757_v59 = vadd.f32 %v1908_v57, %v1017_v30  ;;  %v1966_v61 = vmul.f32 %v2755_v52, %v2755_v52  ;;  %v1970_v3 = vmul.f32 %v2761_v50, %v2761_v50 }
 0x180   : > { %1947 = vst [vmem:[%s273_s14 + $0x18] sm:$0xff] %v2756_v56  ;;  %1949 = vst [vmem:[%s273_s14 + $0x28] sm:$0xff] %v2765_v58  ;;  %v1969_v7 = vmul.f32 %v2756_v56, %v2756_v56  ;;  %v1971_v12 = vmul.f32 %v2765_v58, %v2765_v58  ;;  %v1973_v16 = vmul.f32 %v2763_v54, %v2763_v54 }
 0x181   : > { %1945 = vst [vmem:[%s273_s14 + $0x8] sm:$0xff] %v2757_v59  ;;  %v1952_v62 = vadd.f32 %v2757_v59, %v2755_v52  ;;  %v1967_v1 = vmul.f32 %v2757_v59, %v2757_v59 }
 0x183   : > { %v1953_v4 = vadd.f32 %v2754_v48, %v1952_v62  ;;  %v1974_v6 = vadd.f32 %v1967_v1, %v1966_v61 }
 0x185   : > { %v1975_v8 = vadd.f32 %v1974_v6, %v1968_v2  ;;  %v1954_v9 = vadd.f32 %v2756_v56, %v1953_v4 }
 0x187   : > { %v1955_v10 = vadd.f32 %v2761_v50, %v1954_v9  ;;  %v1976_v0 = vadd.f32 %v1975_v8, %v1969_v7 }
 0x189   : > { %v1956_v11 = vadd.f32 %v2765_v58, %v1955_v10  ;;  %v1977_v40 = vadd.f32 %v1976_v0, %v1970_v3 }
 0x18b   : > { %v1957_v14 = vadd.f32 %v2759_v46, %v1956_v11  ;;  %v1978_v15 = vadd.f32 %v1977_v40, %v1971_v12 }
 0x18d   : > { %v1958_v17 = vadd.f32 %v2763_v54, %v1957_v14  ;;  %v1979_v18 = vadd.f32 %v1978_v15, %v1972_v13 }
 0x18f   : > { %v1959_v20 = vrot.slane %v1958_v17, 4  ;;  %v1980_v19 = vadd.f32 %v1979_v18, %v1973_v16 }
 0x191   : > { %v1960_v21 = vadd.f32 %v1959_v20, %v1958_v17  ;;  %v1981_v22 = vrot.slane %v1980_v19, 4 }
 0x193   : > { %v1961_v5 = vrot.slane %v1960_v21, 2  ;;  %v1982_v63 = vadd.f32 %v1981_v22, %v1980_v19 }
 0x195   : > { %v1962_v23 = vadd.f32 %v1961_v5, %v1960_v21  ;;  %v1983_v24 = vrot.slane %v1982_v63, 2 }
 0x197   : > { %v1984_v26 = vadd.f32 %v1983_v24, %v1982_v63  ;;  %v1963_v27 = vrot.slane %v1962_v23, 1 }
 0x199   : > { %v1985_v28 = vrot.slane %v1984_v26, 1  ;;  %v1964_v30 = vadd.f32 %v1963_v27, %v1962_v23 }
 0x19b   : > { %v1986_v29 = vadd.f32 %v1985_v28, %v1984_v26 }
 0x19d   : > { %v1992_v31 = vsel %vm1991_vm0, %v1986_v29, 0.0 }
 0x19e   : > { %v1993_v32 = vsel %vm1990_vm1, %v1964_v30, %v1992_v31 }
 0x19f   : > { %1994 = vst [vmem:[%s281_s17] sm:$0xff] %v1993_v32 }
 0x1a0 PF: > { %s16_s20 = sadd.s32 1, %s2937_s20   ;;  %s3394_s18 = smov %s2933_s19 }
 0x1a1   : > { %p13_p6 = scmp.ge.s32.totalorder %s16_s20, 4   ;;  %s3395_s19 = smov %s3397_s21 }
 0x1a3   :  { %15 = sbr.rel (!%p13_p6) target bundleno = 2 (0x2), region = 91 }

</bundles_post_ra>
